<compile_context>
chip_gen: v7x
topology: tpu7x:2x2x1
jax: 0.10.0
libtpu: 0.0.40
codegen_flags: <defaults>
</compile_context>

<pallas_src>
import functools

import jax
import jax.numpy as jnp
from jax import lax
from jax.experimental import pallas as pl
from jax.experimental.pallas import tpu as pltpu


def _round_up(x, m):
    return ((x + m - 1) // m) * m


def _pad_k(K):
    """Pad the contraction dim: prefer lane-dense (128) unless it >2x's bytes."""
    k128 = _round_up(K, 128)
    return k128 if k128 <= 2 * K else _round_up(K, 16)


def _choose_tm(M):
    """Row-tile: >=2 grid steps whenever padded M >= 256 (v7x megacore), <=512 rows."""
    mp16 = _round_up(M, 16)
    if mp16 < 256:
        return mp16
    n_tiles = max(2, -(-M // 512))
    return _round_up(-(-M // n_tiles), 16)


# ---------------------------------------------------------------------------
# Pallas kernels
# ---------------------------------------------------------------------------
def _conv_pool_kernel(x_ref, w_ref, b_ref, o_ref, *, n_shift, act):
    """out = act(max_s(x[s] @ w) + b).

    x_ref: (S, TM, Kp) bf16 (S pooling shifts of the same patch tensor),
    w_ref: (Kp, Np) bf16, b_ref: (1, Np) f32, o_ref: (TM, Np) bf16/f32.
    Max over shifts before bias/ReLU is valid because the bias is shift-shared
    and ReLU is monotone (asserted in the wrapper).
    """
    w = w_ref[...]
    y = jnp.dot(x_ref[0], w, preferred_element_type=jnp.float32)
    for s in range(1, n_shift):
        y = jnp.maximum(y, jnp.dot(x_ref[s], w, preferred_element_type=jnp.float32))
    y = y + b_ref[...]
    if act == "relu":
        y = jnp.maximum(y, 0.0)
    elif act == "tanh":
        y = jnp.tanh(y)
    o_ref[...] = y.astype(o_ref.dtype)


def _fc_fused_kernel(x_ref, w1_ref, b1_ref, w2_ref, b2_ref, enc_ref, dec_ref):
    """encoded = x @ w1 + b1 ; decoded_vec = encoded @ w2 + b2 (10-wide stays in VMEM)."""
    enc = jnp.dot(x_ref[...], w1_ref[...], preferred_element_type=jnp.float32)
    enc = enc + b1_ref[...]
    enc_ref[...] = enc.astype(enc_ref.dtype)
    dec = jnp.dot(enc.astype(jnp.bfloat16), w2_ref[...],
                  preferred_element_type=jnp.float32)
    dec_ref[...] = (dec + b2_ref[...]).astype(dec_ref.dtype)


# ---------------------------------------------------------------------------
# Glue: pooled-resolution im2col (NHWC, no full-res patch tensor)
# ---------------------------------------------------------------------------
def _pooled_patches(x, kh, kw, stride, padding, pool_k, pool_stride):
    """x: (N,H,W,C) -> (S, N*Hp*Wp, kh*kw*C) with S = pool_k**2 pooling shifts.

    Patch feature order is (ki, kj, cin); shift s=(dy,dx) holds the patches of
    the conv output positions (i*pool_stride+dy, j*pool_stride+dx)."""
    N, H, W, C = x.shape
    xp = jnp.pad(x, ((0, 0), (padding, padding), (padding, padding), (0, 0)))
    Ho = (H + 2 * padding - kh) // stride + 1
    Wo = (W + 2 * padding - kw) // stride + 1
    Hp = (Ho - pool_k) // pool_stride + 1
    Wp = (Wo - pool_k) // pool_stride + 1
    s_eff = stride * pool_stride
    shifts = []
    for dy in range(pool_k):
        for dx in range(pool_k):
            cols = []
            for ki in range(kh):
                for kj in range(kw):
                    r0 = stride * dy + ki
                    c0 = stride * dx + kj
                    cols.append(xp[:, r0:r0 + s_eff * (Hp - 1) + 1:s_eff,
                                      c0:c0 + s_eff * (Wp - 1) + 1:s_eff, :])
            shifts.append(jnp.concatenate(cols, axis=-1).reshape(N * Hp * Wp, kh * kw * C))
    return jnp.stack(shifts, axis=0), Hp, Wp


# ---------------------------------------------------------------------------
# Pallas wrappers
# ---------------------------------------------------------------------------
def conv_pool_layer(x, wm, b, *, kh, kw, stride, padding, pool_k, pool_stride,
                    act, out_dtype):
    """Fused Conv2d(+ReLU)(+MaxPool). x: (N,H,W,Cin) NHWC; wm: (kh*kw*Cin, Cout)."""
    N = x.shape[0]
    Cout = wm.shape[1]
    patches, Hp, Wp = _pooled_patches(x, kh, kw, stride, padding, pool_k, pool_stride)
    S, M, K = patches.shape
    if S > 1:
        # max-over-shifts fusion requires a shift-shared bias + monotone activation
        assert act == "relu", "pool fusion only valid for monotone activations"

    Kp = _pad_k(K)
    Np = _round_up(Cout, 128)
    TM = _choose_tm(M)
    Mp = _round_up(M, TM)

    xs = jnp.pad(patches, ((0, 0), (0, Mp - M), (0, Kp - K))).astype(jnp.bfloat16)
    wp = jnp.pad(wm, ((0, Kp - K), (0, Np - Cout))).astype(jnp.bfloat16)
    bp = jnp.pad(b.astype(jnp.float32).reshape(1, -1), ((0, 0), (0, Np - Cout)))

    out = pl.pallas_call(
        functools.partial(_conv_pool_kernel, n_shift=S, act=act),
        out_shape=jax.ShapeDtypeStruct((Mp, Np), out_dtype),
        grid=(Mp // TM,),
        in_specs=[pl.BlockSpec((S, TM, Kp), lambda i: (0, i, 0)),
                  pl.BlockSpec((Kp, Np), lambda i: (0, 0)),
                  pl.BlockSpec((1, Np), lambda i: (0, 0))],
        out_specs=pl.BlockSpec((TM, Np), lambda i: (i, 0)),
        compiler_params=pltpu.CompilerParams(dimension_semantics=("parallel",)),
    )(xs, wp, bp)
    # slice + reshape fuses into the next layer's (single) glue fusion under jit
    return out[:M, :Cout].reshape(N, Hp, Wp, Cout)


def conv_transpose_layer(x, wm, b, *, kh, kw, stride, padding, act, out_dtype):
    """PyTorch ConvTranspose2d semantics via zero-dilation + pad + stride-1 conv.

    wm is the matmul-form *forward-conv* weight (kh*kw*Cin, Cout), already
    spatially flipped / channel-swapped in prepare_params."""
    N, H, W, C = x.shape
    if stride > 1:
        Hd, Wd = (H - 1) * stride + 1, (W - 1) * stride + 1
        xd = jnp.zeros((N, Hd, Wd, C), x.dtype).at[:, ::stride, ::stride, :].set(x)
    else:
        xd = x
    pad_eff = kh - 1 - padding          # square kernels only (true for this model)
    xd = jnp.pad(xd, ((0, 0), (pad_eff, pad_eff), (pad_eff, pad_eff), (0, 0)))
    # TODO(synk): stride x stride sub-convolution decomposition to skip zero taps.
    return conv_pool_layer(xd, wm, b, kh=kh, kw=kw, stride=1, padding=0,
                           pool_k=1, pool_stride=1, act=act, out_dtype=out_dtype)


def fc_encode_decode(h_flat, w_enc, b_enc, w_dec, b_dec):
    """Fused Linear(200,10) + Linear(10,32). Returns ((N,10) f32, (N,32) bf16)."""
    Nb, K = h_flat.shape
    n1, n2 = w_enc.shape[1], w_dec.shape[1]
    Kp = _pad_k(K)
    Np1 = _round_up(n1, 128)
    Np2 = _round_up(n2, 128)
    TM = _choose_tm(Nb)
    Mp = _round_up(Nb, TM)

    xb = jnp.pad(h_flat, ((0, Mp - Nb), (0, Kp - K))).astype(jnp.bfloat16)
    w1 = jnp.pad(w_enc, ((0, Kp - K), (0, Np1 - n1))).astype(jnp.bfloat16)
    b1 = jnp.pad(b_enc.astype(jnp.float32).reshape(1, -1), ((0, 0), (0, Np1 - n1)))
    # zero rows >= n1 in w2 cancel the (zero) padded columns of `enc`.
    w2 = jnp.pad(w_dec, ((0, Np1 - n1), (0, Np2 - n2))).astype(jnp.bfloat16)
    b2 = jnp.pad(b_dec.astype(jnp.float32).reshape(1, -1), ((0, 0), (0, Np2 - n2)))

    enc, dec = pl.pallas_call(
        _fc_fused_kernel,
        out_shape=(jax.ShapeDtypeStruct((Mp, Np1), jnp.float32),
                   jax.ShapeDtypeStruct((Mp, Np2), jnp.bfloat16)),
        grid=(Mp // TM,),
        in_specs=[pl.BlockSpec((TM, Kp), lambda i: (i, 0)),
                  pl.BlockSpec((Kp, Np1), lambda i: (0, 0)),
                  pl.BlockSpec((1, Np1), lambda i: (0, 0)),
                  pl.BlockSpec((Np1, Np2), lambda i: (0, 0)),
                  pl.BlockSpec((1, Np2), lambda i: (0, 0))],
        out_specs=(pl.BlockSpec((TM, Np1), lambda i: (i, 0)),
                   pl.BlockSpec((TM, Np2), lambda i: (i, 0))),
        compiler_params=pltpu.CompilerParams(dimension_semantics=("parallel",)),
    )(xb, w1, b1, w2, b2)
    return enc[:Nb, :n1], dec[:Nb, :n2]


# ---------------------------------------------------------------------------
# Parameters (PyTorch layouts) and one-time matmul-form preparation
# ---------------------------------------------------------------------------
def init_params(key):
    ks = jax.random.split(key, 16)
    s = 0.1

    def w(k, shape):
        return (s * jax.random.normal(k, shape)).astype(jnp.float32)

    return {
        "conv1_w": w(ks[0], (16, 3, 3, 3)),  "conv1_b": w(ks[1], (16,)),
        "conv2_w": w(ks[2], (8, 16, 3, 3)),  "conv2_b": w(ks[3], (8,)),
        "fc_enc_w": w(ks[4], (10, 200)),     "fc_enc_b": w(ks[5], (10,)),
        "fc_dec_w": w(ks[6], (32, 10)),      "fc_dec_b": w(ks[7], (32,)),
        "dec1_w": w(ks[8], (8, 16, 3, 3)),   "dec1_b": w(ks[9], (16,)),
        "dec2_w": w(ks[10], (16, 8, 5, 5)),  "dec2_b": w(ks[11], (8,)),
        "dec3_w": w(ks[12], (8, 1, 2, 2)),   "dec3_b": w(ks[13], (1,)),
    }


def prepare_params(p):
    """Permute/reshape the tiny weights once (outside jit) to match the NHWC
    patch layout; all permutations preserve the PyTorch semantics."""
    def conv_w(w):                      # (Cout,Cin,kh,kw) -> (kh*kw*Cin, Cout)
        Cout, Cin, kh, kw = w.shape
        return jnp.transpose(w, (2, 3, 1, 0)).reshape(kh * kw * Cin, Cout)

    def convT_w(w):                     # (Cin,Cout,kh,kw) -> forward-conv matmul form
        wc = jnp.transpose(jnp.flip(w, axis=(2, 3)), (1, 0, 2, 3))
        return conv_w(wc)

    # Linear(200,10): PyTorch flatten order is (c,h,w); ours is NHWC (h,w,c).
    fc_enc_w = (p["fc_enc_w"].reshape(10, 8, 5, 5)
                .transpose(0, 2, 3, 1).reshape(10, 200).T)          # (200, 10)
    # Linear(10,32): Deflatten views the 32 outputs as (c=8,h=2,w=2); reorder
    # output columns/bias to (h,w,c) so the result reshapes directly to NHWC.
    fc_dec_w = (p["fc_dec_w"].T.reshape(10, 8, 2, 2)
                .transpose(0, 2, 3, 1).reshape(10, 32))             # (10, 32)
    fc_dec_b = p["fc_dec_b"].reshape(8, 2, 2).transpose(1, 2, 0).reshape(32)

    return {
        "conv1_w": conv_w(p["conv1_w"]), "conv1_b": p["conv1_b"],
        "conv2_w": conv_w(p["conv2_w"]), "conv2_b": p["conv2_b"],
        "fc_enc_w": fc_enc_w,            "fc_enc_b": p["fc_enc_b"],
        "fc_dec_w": fc_dec_w,            "fc_dec_b": fc_dec_b,
        "dec1_w": convT_w(p["dec1_w"]),  "dec1_b": p["dec1_b"],
        "dec2_w": convT_w(p["dec2_w"]),  "dec2_b": p["dec2_b"],
        "dec3_w": convT_w(p["dec3_w"]),  "dec3_b": p["dec3_b"],
    }


# ---------------------------------------------------------------------------
# Forward pass (NCHW in / NCHW out, NHWC + bf16 internally)
# ---------------------------------------------------------------------------
def autoencoder_forward(x_nchw, q):
    N = x_nchw.shape[0]
    x = jnp.transpose(x_nchw, (0, 2, 3, 1))                         # NHWC, once

    # ----- encoder -----
    h = conv_pool_layer(x, q["conv1_w"], q["conv1_b"], kh=3, kw=3, stride=3,
                        padding=1, pool_k=2, pool_stride=2,
                        act="relu", out_dtype=jnp.bfloat16)         # (N,11,11,16)
    h = conv_pool_layer(h, q["conv2_w"], q["conv2_b"], kh=3, kw=3, stride=2,
                        padding=1, pool_k=2, pool_stride=1,
                        act="relu", out_dtype=jnp.bfloat16)         # (N,5,5,8)
    h = h.reshape(N, -1)                                            # (N,200)
    encoded, d = fc_encode_decode(h, q["fc_enc_w"], q["fc_enc_b"],
                                  q["fc_dec_w"], q["fc_dec_b"])     # (N,10),(N,32)

    # ----- decoder -----
    d = d.reshape(N, 2, 2, 8)                                       # NHWC Deflatten
    d = conv_transpose_layer(d, q["dec1_w"], q["dec1_b"], kh=3, kw=3, stride=2,
                             padding=0, act="relu",
                             out_dtype=jnp.bfloat16)                # (N,5,5,16)
    d = conv_transpose_layer(d, q["dec2_w"], q["dec2_b"], kh=5, kw=5, stride=3,
                             padding=1, act="relu",
                             out_dtype=jnp.bfloat16)                # (N,15,15,8)
    d = conv_transpose_layer(d, q["dec3_w"], q["dec3_b"], kh=2, kw=2, stride=2,
                             padding=1, act="tanh",
                             out_dtype=jnp.float32)                 # (N,28,28,1)
    return encoded, jnp.transpose(d, (0, 3, 1, 2))                  # (N,1,28,28)


# ---------------------------------------------------------------------------
# Pure-JAX reference (PyTorch layouts / f32) for correctness at bf16 tolerance
# ---------------------------------------------------------------------------
def reference_forward(x, p):
    relu = lambda t: jnp.maximum(t, 0.0)

    def conv(x, w, b, stride, padding):
        y = lax.conv_general_dilated(
            x, w, window_strides=(stride, stride),
            padding=[(padding, padding), (padding, padding)],
            dimension_numbers=("NCHW", "OIHW", "NCHW"))
        return y + b.reshape(1, -1, 1, 1)

    def convT(x, w, b, stride, padding):
        kh, kw = w.shape[2], w.shape[3]
        wc = jnp.transpose(jnp.flip(w, axis=(2, 3)), (1, 0, 2, 3))
        y = lax.conv_general_dilated(
            x, wc, window_strides=(1, 1),
            padding=[(kh - 1 - padding, kh - 1 - padding),
                     (kw - 1 - padding, kw - 1 - padding)],
            lhs_dilation=(stride, stride),
            dimension_numbers=("NCHW", "OIHW", "NCHW"))
        return y + b.reshape(1, -1, 1, 1)

    def maxpool(x, k, stride):
        return lax.reduce_window(x, -jnp.inf, lax.max,
                                 (1, 1, k, k), (1, 1, stride, stride), "VALID")

    h = maxpool(relu(conv(x, p["conv1_w"], p["conv1_b"], 3, 1)), 2, 2)
    h = maxpool(relu(conv(h, p["conv2_w"], p["conv2_b"], 2, 1)), 2, 1)
    h = h.reshape(x.shape[0], -1)
    enc = h @ p["fc_enc_w"].T + p["fc_enc_b"]
    d = enc @ p["fc_dec_w"].T + p["fc_dec_b"]
    d = d.reshape(x.shape[0], 8, 2, 2)
    d = relu(convT(d, p["dec1_w"], p["dec1_b"], 2, 0))
    d = relu(convT(d, p["dec2_w"], p["dec2_b"], 3, 1))
    d = jnp.tanh(convT(d, p["dec3_w"], p["dec3_b"], 2, 1))
    return enc, d


if __name__ == "__main__":
    # Spatial size must be 64x64 so Flatten yields 200 features (Linear(200,10)).
    key = jax.random.PRNGKey(0)
    k_in, k_par = jax.random.split(key)
    x = jax.random.normal(k_in, (2, 3, 64, 64), dtype=jnp.float32)
    params = init_params(k_par)
    q = prepare_params(params)

    fwd = jax.jit(autoencoder_forward)
    encoded, decoded = fwd(x, q)
    encoded, decoded = jax.block_until_ready((encoded, decoded))

    assert encoded.shape == (2, 10), encoded.shape
    assert decoded.shape == (2, 1, 28, 28), decoded.shape
    assert bool(jnp.all(jnp.isfinite(encoded))) and bool(jnp.all(jnp.isfinite(decoded)))

    enc_ref, dec_ref = jax.block_until_ready(jax.jit(reference_forward)(x, params))
    enc_err = float(jnp.max(jnp.abs(encoded - enc_ref)))
    dec_err = float(jnp.max(jnp.abs(decoded - dec_ref)))
    assert enc_err < 5e-2 and dec_err < 5e-2, (enc_err, dec_err)  # bf16 MXU tolerance

    print("KERNEL_OK")
</pallas_src>

<mosaic_0001>
module attributes {stable_mosaic.version = 11 : i64} {
  func.func @_conv_pool_kernel(%arg0: i32, %arg1: memref<4x128x32xbf16, #tpu.memory_space<vmem>>, %arg2: memref<32x128xbf16, #tpu.memory_space<vmem>>, %arg3: memref<1x128xf32, #tpu.memory_space<vmem>>, %arg4: memref<128x128xbf16, #tpu.memory_space<vmem>>) attributes {dimension_semantics = [#tpu.dimension_semantics<parallel>], iteration_bounds = array<i64: 2>, scalar_prefetch = 0 : i64, scratch_operands = 0 : i64, tpu.core_type = #tpu.core_type<tc>, window_params = [{transform_indices = @transform_0, window_bounds = array<i64: 4, 128, 32>}, {pipeline_mode = #tpu.pipeline_mode<synchronous>, transform_indices = @transform_1, window_bounds = array<i64: 32, 128>}, {pipeline_mode = #tpu.pipeline_mode<synchronous>, transform_indices = @transform_2, window_bounds = array<i64: 1, 128>}, {transform_indices = @transform_3, window_bounds = array<i64: 128, 128>}]} {
    %c0 = arith.constant 0 : index
    %c0_0 = arith.constant 0 : index
    %0 = vector.load %arg2[%c0, %c0_0] : memref<32x128xbf16, #tpu.memory_space<vmem>>, vector<32x128xbf16>
    %c0_1 = arith.constant 0 : index
    %c0_2 = arith.constant 0 : index
    %c0_3 = arith.constant 0 : index
    %1 = vector.load %arg1[%c0_1, %c0_2, %c0_3] : memref<4x128x32xbf16, #tpu.memory_space<vmem>>, vector<1x128x32xbf16>
    %2 = vector.shape_cast %1 : vector<1x128x32xbf16> to vector<128x32xbf16>
    %cst = arith.constant dense<0.000000e+00> : vector<128x128xf32>
    %3 = tpu.matmul %2, %0, %cst {dimension_numbers = #tpu.dot_dimension_numbers<[1], [0], [0], [1], [0, 0, 1, 1], [], []>} : vector<128x32xbf16>, vector<32x128xbf16>, vector<128x128xf32> -> vector<128x128xf32>
    %c1 = arith.constant 1 : index
    %c0_4 = arith.constant 0 : index
    %c0_5 = arith.constant 0 : index
    %4 = vector.load %arg1[%c1, %c0_4, %c0_5] : memref<4x128x32xbf16, #tpu.memory_space<vmem>>, vector<1x128x32xbf16>
    %5 = vector.shape_cast %4 : vector<1x128x32xbf16> to vector<128x32xbf16>
    %cst_6 = arith.constant dense<0.000000e+00> : vector<128x128xf32>
    %6 = tpu.matmul %5, %0, %cst_6 {dimension_numbers = #tpu.dot_dimension_numbers<[1], [0], [0], [1], [0, 0, 1, 1], [], []>} : vector<128x32xbf16>, vector<32x128xbf16>, vector<128x128xf32> -> vector<128x128xf32>
    %7 = arith.maximumf %3, %6 : vector<128x128xf32>
    %c2 = arith.constant 2 : index
    %c0_7 = arith.constant 0 : index
    %c0_8 = arith.constant 0 : index
    %8 = vector.load %arg1[%c2, %c0_7, %c0_8] : memref<4x128x32xbf16, #tpu.memory_space<vmem>>, vector<1x128x32xbf16>
    %9 = vector.shape_cast %8 : vector<1x128x32xbf16> to vector<128x32xbf16>
    %cst_9 = arith.constant dense<0.000000e+00> : vector<128x128xf32>
    %10 = tpu.matmul %9, %0, %cst_9 {dimension_numbers = #tpu.dot_dimension_numbers<[1], [0], [0], [1], [0, 0, 1, 1], [], []>} : vector<128x32xbf16>, vector<32x128xbf16>, vector<128x128xf32> -> vector<128x128xf32>
    %11 = arith.maximumf %7, %10 : vector<128x128xf32>
    %c3 = arith.constant 3 : index
    %c0_10 = arith.constant 0 : index
    %c0_11 = arith.constant 0 : index
    %12 = vector.load %arg1[%c3, %c0_10, %c0_11] : memref<4x128x32xbf16, #tpu.memory_space<vmem>>, vector<1x128x32xbf16>
    %13 = vector.shape_cast %12 : vector<1x128x32xbf16> to vector<128x32xbf16>
    %cst_12 = arith.constant dense<0.000000e+00> : vector<128x128xf32>
    %14 = tpu.matmul %13, %0, %cst_12 {dimension_numbers = #tpu.dot_dimension_numbers<[1], [0], [0], [1], [0, 0, 1, 1], [], []>} : vector<128x32xbf16>, vector<32x128xbf16>, vector<128x128xf32> -> vector<128x128xf32>
    %15 = arith.maximumf %11, %14 : vector<128x128xf32>
    %c0_13 = arith.constant 0 : index
    %c0_14 = arith.constant 0 : index
    %16 = vector.load %arg3[%c0_13, %c0_14] : memref<1x128xf32, #tpu.memory_space<vmem>>, vector<1x128xf32>
    %17 = vector.broadcast %16 : vector<1x128xf32> to vector<128x128xf32>
    %18 = arith.addf %15, %17 : vector<128x128xf32>
    %cst_15 = arith.constant 0.000000e+00 : f32
    %19 = vector.broadcast %cst_15 : f32 to vector<128x128xf32>
    %20 = arith.maximumf %18, %19 : vector<128x128xf32>
    %21 = arith.truncf %20 : vector<128x128xf32> to vector<128x128xbf16>
    %c0_16 = arith.constant 0 : index
    %c0_17 = arith.constant 0 : index
    %22 = vector.load %arg4[%c0_16, %c0_17] : memref<128x128xbf16, #tpu.memory_space<vmem>>, vector<128x128xbf16>
    tpu.vector_store %arg4[%c0_16, %c0_17], %21 {strides = array<i32>} : memref<128x128xbf16, #tpu.memory_space<vmem>>, vector<128x128xbf16>,
    return
  }
  func.func @transform_0(%arg0: i32) -> (i32, i32, i32) {
    %c0_i32 = arith.constant 0 : i32
    %c0_i32_0 = arith.constant 0 : i32
    %c0_i32_1 = arith.constant 0 : i32
    return %c0_i32, %arg0, %c0_i32_0 : i32, i32, i32
  }
  func.func @transform_1(%arg0: i32) -> (i32, i32) {
    %c0_i32 = arith.constant 0 : i32
    %c0_i32_0 = arith.constant 0 : i32
    %c0_i32_1 = arith.constant 0 : i32
    return %c0_i32, %c0_i32_0 : i32, i32
  }
  func.func @transform_2(%arg0: i32) -> (i32, i32) {
    %c0_i32 = arith.constant 0 : i32
    %c0_i32_0 = arith.constant 0 : i32
    %c0_i32_1 = arith.constant 0 : i32
    return %c0_i32, %c0_i32_0 : i32, i32
  }
  func.func @transform_3(%arg0: i32) -> (i32, i32) {
    %c0_i32 = arith.constant 0 : i32
    %c0_i32_0 = arith.constant 0 : i32
    return %arg0, %c0_i32 : i32, i32
  }
}

module attributes {stable_mosaic.version = 11 : i64} {
  func.func @_conv_pool_kernel(%arg0: i32, %arg1: memref<4x64x256xbf16, #tpu.memory_space<vmem>>, %arg2: memref<256x128xbf16, #tpu.memory_space<vmem>>, %arg3: memref<1x128xf32, #tpu.memory_space<vmem>>, %arg4: memref<64x128xbf16, #tpu.memory_space<vmem>>) attributes {dimension_semantics = [#tpu.dimension_semantics<parallel>], iteration_bounds = array<i64: 1>, scalar_prefetch = 0 : i64, scratch_operands = 0 : i64, tpu.core_type = #tpu.core_type<tc>, window_params = [{transform_indices = @transform_0, window_bounds = array<i64: 4, 64, 256>}, {pipeline_mode = #tpu.pipeline_mode<synchronous>, transform_indices = @transform_1, window_bounds = array<i64: 256, 128>}, {pipeline_mode = #tpu.pipeline_mode<synchronous>, transform_indices = @transform_2, window_bounds = array<i64: 1, 128>}, {transform_indices = @transform_3, window_bounds = array<i64: 64, 128>}]} {
    %c0 = arith.constant 0 : index
    %c0_0 = arith.constant 0 : index
    %0 = vector.load %arg2[%c0, %c0_0] : memref<256x128xbf16, #tpu.memory_space<vmem>>, vector<256x128xbf16>
    %c0_1 = arith.constant 0 : index
    %c0_2 = arith.constant 0 : index
    %c0_3 = arith.constant 0 : index
    %1 = vector.load %arg1[%c0_1, %c0_2, %c0_3] : memref<4x64x256xbf16, #tpu.memory_space<vmem>>, vector<1x64x256xbf16>
    %2 = vector.shape_cast %1 : vector<1x64x256xbf16> to vector<64x256xbf16>
    %cst = arith.constant dense<0.000000e+00> : vector<64x128xf32>
    %3 = tpu.matmul %2, %0, %cst {dimension_numbers = #tpu.dot_dimension_numbers<[1], [0], [0], [1], [0, 0, 1, 1], [], []>} : vector<64x256xbf16>, vector<256x128xbf16>, vector<64x128xf32> -> vector<64x128xf32>
    %c1 = arith.constant 1 : index
    %c0_4 = arith.constant 0 : index
    %c0_5 = arith.constant 0 : index
    %4 = vector.load %arg1[%c1, %c0_4, %c0_5] : memref<4x64x256xbf16, #tpu.memory_space<vmem>>, vector<1x64x256xbf16>
    %5 = vector.shape_cast %4 : vector<1x64x256xbf16> to vector<64x256xbf16>
    %cst_6 = arith.constant dense<0.000000e+00> : vector<64x128xf32>
    %6 = tpu.matmul %5, %0, %cst_6 {dimension_numbers = #tpu.dot_dimension_numbers<[1], [0], [0], [1], [0, 0, 1, 1], [], []>} : vector<64x256xbf16>, vector<256x128xbf16>, vector<64x128xf32> -> vector<64x128xf32>
    %7 = arith.maximumf %3, %6 : vector<64x128xf32>
    %c2 = arith.constant 2 : index
    %c0_7 = arith.constant 0 : index
    %c0_8 = arith.constant 0 : index
    %8 = vector.load %arg1[%c2, %c0_7, %c0_8] : memref<4x64x256xbf16, #tpu.memory_space<vmem>>, vector<1x64x256xbf16>
    %9 = vector.shape_cast %8 : vector<1x64x256xbf16> to vector<64x256xbf16>
    %cst_9 = arith.constant dense<0.000000e+00> : vector<64x128xf32>
    %10 = tpu.matmul %9, %0, %cst_9 {dimension_numbers = #tpu.dot_dimension_numbers<[1], [0], [0], [1], [0, 0, 1, 1], [], []>} : vector<64x256xbf16>, vector<256x128xbf16>, vector<64x128xf32> -> vector<64x128xf32>
    %11 = arith.maximumf %7, %10 : vector<64x128xf32>
    %c3 = arith.constant 3 : index
    %c0_10 = arith.constant 0 : index
    %c0_11 = arith.constant 0 : index
    %12 = vector.load %arg1[%c3, %c0_10, %c0_11] : memref<4x64x256xbf16, #tpu.memory_space<vmem>>, vector<1x64x256xbf16>
    %13 = vector.shape_cast %12 : vector<1x64x256xbf16> to vector<64x256xbf16>
    %cst_12 = arith.constant dense<0.000000e+00> : vector<64x128xf32>
    %14 = tpu.matmul %13, %0, %cst_12 {dimension_numbers = #tpu.dot_dimension_numbers<[1], [0], [0], [1], [0, 0, 1, 1], [], []>} : vector<64x256xbf16>, vector<256x128xbf16>, vector<64x128xf32> -> vector<64x128xf32>
    %15 = arith.maximumf %11, %14 : vector<64x128xf32>
    %c0_13 = arith.constant 0 : index
    %c0_14 = arith.constant 0 : index
    %16 = vector.load %arg3[%c0_13, %c0_14] : memref<1x128xf32, #tpu.memory_space<vmem>>, vector<1x128xf32>
    %17 = vector.broadcast %16 : vector<1x128xf32> to vector<64x128xf32>
    %18 = arith.addf %15, %17 : vector<64x128xf32>
    %cst_15 = arith.constant 0.000000e+00 : f32
    %19 = vector.broadcast %cst_15 : f32 to vector<64x128xf32>
    %20 = arith.maximumf %18, %19 : vector<64x128xf32>
    %21 = arith.truncf %20 : vector<64x128xf32> to vector<64x128xbf16>
    %c0_16 = arith.constant 0 : index
    %c0_17 = arith.constant 0 : index
    %22 = vector.load %arg4[%c0_16, %c0_17] : memref<64x128xbf16, #tpu.memory_space<vmem>>, vector<64x128xbf16>
    tpu.vector_store %arg4[%c0_16, %c0_17], %21 {strides = array<i32>} : memref<64x128xbf16, #tpu.memory_space<vmem>>, vector<64x128xbf16>,
    return
  }
  func.func @transform_0(%arg0: i32) -> (i32, i32, i32) {
    %c0_i32 = arith.constant 0 : i32
    %c0_i32_0 = arith.constant 0 : i32
    %c0_i32_1 = arith.constant 0 : i32
    return %c0_i32, %arg0, %c0_i32_0 : i32, i32, i32
  }
  func.func @transform_1(%arg0: i32) -> (i32, i32) {
    %c0_i32 = arith.constant 0 : i32
    %c0_i32_0 = arith.constant 0 : i32
    %c0_i32_1 = arith.constant 0 : i32
    return %c0_i32, %c0_i32_0 : i32, i32
  }
  func.func @transform_2(%arg0: i32) -> (i32, i32) {
    %c0_i32 = arith.constant 0 : i32
    %c0_i32_0 = arith.constant 0 : i32
    %c0_i32_1 = arith.constant 0 : i32
    return %c0_i32, %c0_i32_0 : i32, i32
  }
  func.func @transform_3(%arg0: i32) -> (i32, i32) {
    %c0_i32 = arith.constant 0 : i32
    %c0_i32_0 = arith.constant 0 : i32
    return %arg0, %c0_i32 : i32, i32
  }
}

module attributes {stable_mosaic.version = 11 : i64} {
  func.func @_fc_fused_kernel(%arg0: i32, %arg1: memref<16x256xbf16, #tpu.memory_space<vmem>>, %arg2: memref<256x128xbf16, #tpu.memory_space<vmem>>, %arg3: memref<1x128xf32, #tpu.memory_space<vmem>>, %arg4: memref<128x128xbf16, #tpu.memory_space<vmem>>, %arg5: memref<1x128xf32, #tpu.memory_space<vmem>>, %arg6: memref<16x128xf32, #tpu.memory_space<vmem>>, %arg7: memref<16x128xbf16, #tpu.memory_space<vmem>>) attributes {dimension_semantics = [#tpu.dimension_semantics<parallel>], iteration_bounds = array<i64: 1>, scalar_prefetch = 0 : i64, scratch_operands = 0 : i64, tpu.core_type = #tpu.core_type<tc>, window_params = [{transform_indices = @transform_0, window_bounds = array<i64: 16, 256>}, {pipeline_mode = #tpu.pipeline_mode<synchronous>, transform_indices = @transform_1, window_bounds = array<i64: 256, 128>}, {pipeline_mode = #tpu.pipeline_mode<synchronous>, transform_indices = @transform_2, window_bounds = array<i64: 1, 128>}, {pipeline_mode = #tpu.pipeline_mode<synchronous>, transform_indices = @transform_3, window_bounds = array<i64: 128, 128>}, {pipeline_mode = #tpu.pipeline_mode<synchronous>, transform_indices = @transform_4, window_bounds = array<i64: 1, 128>}, {transform_indices = @transform_5, window_bounds = array<i64: 16, 128>}, {transform_indices = @transform_6, window_bounds = array<i64: 16, 128>}]} {
    %c0 = arith.constant 0 : index
    %c0_0 = arith.constant 0 : index
    %0 = vector.load %arg1[%c0, %c0_0] : memref<16x256xbf16, #tpu.memory_space<vmem>>, vector<16x256xbf16>
    %c0_1 = arith.constant 0 : index
    %c0_2 = arith.constant 0 : index
    %1 = vector.load %arg2[%c0_1, %c0_2] : memref<256x128xbf16, #tpu.memory_space<vmem>>, vector<256x128xbf16>
    %cst = arith.constant dense<0.000000e+00> : vector<16x128xf32>
    %2 = tpu.matmul %0, %1, %cst {dimension_numbers = #tpu.dot_dimension_numbers<[1], [0], [0], [1], [0, 0, 1, 1], [], []>} : vector<16x256xbf16>, vector<256x128xbf16>, vector<16x128xf32> -> vector<16x128xf32>
    %c0_3 = arith.constant 0 : index
    %c0_4 = arith.constant 0 : index
    %3 = vector.load %arg3[%c0_3, %c0_4] : memref<1x128xf32, #tpu.memory_space<vmem>>, vector<1x128xf32>
    %4 = vector.broadcast %3 : vector<1x128xf32> to vector<16x128xf32>
    %5 = arith.addf %2, %4 : vector<16x128xf32>
    %c0_5 = arith.constant 0 : index
    %c0_6 = arith.constant 0 : index
    %6 = vector.load %arg6[%c0_5, %c0_6] : memref<16x128xf32, #tpu.memory_space<vmem>>, vector<16x128xf32>
    tpu.vector_store %arg6[%c0_5, %c0_6], %5 {strides = array<i32>} : memref<16x128xf32, #tpu.memory_space<vmem>>, vector<16x128xf32>,
    %7 = arith.truncf %5 : vector<16x128xf32> to vector<16x128xbf16>
    %c0_7 = arith.constant 0 : index
    %c0_8 = arith.constant 0 : index
    %8 = vector.load %arg4[%c0_7, %c0_8] : memref<128x128xbf16, #tpu.memory_space<vmem>>, vector<128x128xbf16>
    %cst_9 = arith.constant dense<0.000000e+00> : vector<16x128xf32>
    %9 = tpu.matmul %7, %8, %cst_9 {dimension_numbers = #tpu.dot_dimension_numbers<[1], [0], [0], [1], [0, 0, 1, 1], [], []>} : vector<16x128xbf16>, vector<128x128xbf16>, vector<16x128xf32> -> vector<16x128xf32>
    %c0_10 = arith.constant 0 : index
    %c0_11 = arith.constant 0 : index
    %10 = vector.load %arg5[%c0_10, %c0_11] : memref<1x128xf32, #tpu.memory_space<vmem>>, vector<1x128xf32>
    %11 = vector.broadcast %10 : vector<1x128xf32> to vector<16x128xf32>
    %12 = arith.addf %9, %11 : vector<16x128xf32>
    %13 = arith.truncf %12 : vector<16x128xf32> to vector<16x128xbf16>
    %c0_12 = arith.constant 0 : index
    %c0_13 = arith.constant 0 : index
    %14 = vector.load %arg7[%c0_12, %c0_13] : memref<16x128xbf16, #tpu.memory_space<vmem>>, vector<16x128xbf16>
    tpu.vector_store %arg7[%c0_12, %c0_13], %13 {strides = array<i32>} : memref<16x128xbf16, #tpu.memory_space<vmem>>, vector<16x128xbf16>,
    return
  }
  func.func @transform_0(%arg0: i32) -> (i32, i32) {
    %c0_i32 = arith.constant 0 : i32
    %c0_i32_0 = arith.constant 0 : i32
    return %arg0, %c0_i32 : i32, i32
  }
  func.func @transform_1(%arg0: i32) -> (i32, i32) {
    %c0_i32 = arith.constant 0 : i32
    %c0_i32_0 = arith.constant 0 : i32
    %c0_i32_1 = arith.constant 0 : i32
    return %c0_i32, %c0_i32_0 : i32, i32
  }
  func.func @transform_2(%arg0: i32) -> (i32, i32) {
    %c0_i32 = arith.constant 0 : i32
    %c0_i32_0 = arith.constant 0 : i32
    %c0_i32_1 = arith.constant 0 : i32
    return %c0_i32, %c0_i32_0 : i32, i32
  }
  func.func @transform_3(%arg0: i32) -> (i32, i32) {
    %c0_i32 = arith.constant 0 : i32
    %c0_i32_0 = arith.constant 0 : i32
    %c0_i32_1 = arith.constant 0 : i32
    return %c0_i32, %c0_i32_0 : i32, i32
  }
  func.func @transform_4(%arg0: i32) -> (i32, i32) {
    %c0_i32 = arith.constant 0 : i32
    %c0_i32_0 = arith.constant 0 : i32
    %c0_i32_1 = arith.constant 0 : i32
    return %c0_i32, %c0_i32_0 : i32, i32
  }
  func.func @transform_5(%arg0: i32) -> (i32, i32) {
    %c0_i32 = arith.constant 0 : i32
    %c0_i32_0 = arith.constant 0 : i32
    return %arg0, %c0_i32 : i32, i32
  }
  func.func @transform_6(%arg0: i32) -> (i32, i32) {
    %c0_i32 = arith.constant 0 : i32
    %c0_i32_0 = arith.constant 0 : i32
    return %arg0, %c0_i32 : i32, i32
  }
}

module attributes {stable_mosaic.version = 11 : i64} {
  func.func @_conv_pool_kernel(%arg0: i32, %arg1: memref<1x64x128xbf16, #tpu.memory_space<vmem>>, %arg2: memref<128x128xbf16, #tpu.memory_space<vmem>>, %arg3: memref<1x128xf32, #tpu.memory_space<vmem>>, %arg4: memref<64x128xbf16, #tpu.memory_space<vmem>>) attributes {dimension_semantics = [#tpu.dimension_semantics<parallel>], iteration_bounds = array<i64: 1>, scalar_prefetch = 0 : i64, scratch_operands = 0 : i64, tpu.core_type = #tpu.core_type<tc>, window_params = [{transform_indices = @transform_0, window_bounds = array<i64: 1, 64, 128>}, {pipeline_mode = #tpu.pipeline_mode<synchronous>, transform_indices = @transform_1, window_bounds = array<i64: 128, 128>}, {pipeline_mode = #tpu.pipeline_mode<synchronous>, transform_indices = @transform_2, window_bounds = array<i64: 1, 128>}, {transform_indices = @transform_3, window_bounds = array<i64: 64, 128>}]} {
    %c0 = arith.constant 0 : index
    %c0_0 = arith.constant 0 : index
    %0 = vector.load %arg2[%c0, %c0_0] : memref<128x128xbf16, #tpu.memory_space<vmem>>, vector<128x128xbf16>
    %c0_1 = arith.constant 0 : index
    %c0_2 = arith.constant 0 : index
    %c0_3 = arith.constant 0 : index
    %1 = vector.load %arg1[%c0_1, %c0_2, %c0_3] : memref<1x64x128xbf16, #tpu.memory_space<vmem>>, vector<1x64x128xbf16>
    %2 = vector.shape_cast %1 : vector<1x64x128xbf16> to vector<64x128xbf16>
    %cst = arith.constant dense<0.000000e+00> : vector<64x128xf32>
    %3 = tpu.matmul %2, %0, %cst {dimension_numbers = #tpu.dot_dimension_numbers<[1], [0], [0], [1], [0, 0, 1, 1], [], []>} : vector<64x128xbf16>, vector<128x128xbf16>, vector<64x128xf32> -> vector<64x128xf32>
    %c0_4 = arith.constant 0 : index
    %c0_5 = arith.constant 0 : index
    %4 = vector.load %arg3[%c0_4, %c0_5] : memref<1x128xf32, #tpu.memory_space<vmem>>, vector<1x128xf32>
    %5 = vector.broadcast %4 : vector<1x128xf32> to vector<64x128xf32>
    %6 = arith.addf %3, %5 : vector<64x128xf32>
    %cst_6 = arith.constant 0.000000e+00 : f32
    %7 = vector.broadcast %cst_6 : f32 to vector<64x128xf32>
    %8 = arith.maximumf %6, %7 : vector<64x128xf32>
    %9 = arith.truncf %8 : vector<64x128xf32> to vector<64x128xbf16>
    %c0_7 = arith.constant 0 : index
    %c0_8 = arith.constant 0 : index
    %10 = vector.load %arg4[%c0_7, %c0_8] : memref<64x128xbf16, #tpu.memory_space<vmem>>, vector<64x128xbf16>
    tpu.vector_store %arg4[%c0_7, %c0_8], %9 {strides = array<i32>} : memref<64x128xbf16, #tpu.memory_space<vmem>>, vector<64x128xbf16>,
    return
  }
  func.func @transform_0(%arg0: i32) -> (i32, i32, i32) {
    %c0_i32 = arith.constant 0 : i32
    %c0_i32_0 = arith.constant 0 : i32
    %c0_i32_1 = arith.constant 0 : i32
    return %c0_i32, %arg0, %c0_i32_0 : i32, i32, i32
  }
  func.func @transform_1(%arg0: i32) -> (i32, i32) {
    %c0_i32 = arith.constant 0 : i32
    %c0_i32_0 = arith.constant 0 : i32
    %c0_i32_1 = arith.constant 0 : i32
    return %c0_i32, %c0_i32_0 : i32, i32
  }
  func.func @transform_2(%arg0: i32) -> (i32, i32) {
    %c0_i32 = arith.constant 0 : i32
    %c0_i32_0 = arith.constant 0 : i32
    %c0_i32_1 = arith.constant 0 : i32
    return %c0_i32, %c0_i32_0 : i32, i32
  }
  func.func @transform_3(%arg0: i32) -> (i32, i32) {
    %c0_i32 = arith.constant 0 : i32
    %c0_i32_0 = arith.constant 0 : i32
    return %arg0, %c0_i32 : i32, i32
  }
}

module attributes {stable_mosaic.version = 11 : i64} {
  func.func @_conv_pool_kernel(%arg0: i32, %arg1: memref<1x240x512xbf16, #tpu.memory_space<vmem>>, %arg2: memref<512x128xbf16, #tpu.memory_space<vmem>>, %arg3: memref<1x128xf32, #tpu.memory_space<vmem>>, %arg4: memref<240x128xbf16, #tpu.memory_space<vmem>>) attributes {dimension_semantics = [#tpu.dimension_semantics<parallel>], iteration_bounds = array<i64: 2>, scalar_prefetch = 0 : i64, scratch_operands = 0 : i64, tpu.core_type = #tpu.core_type<tc>, window_params = [{transform_indices = @transform_0, window_bounds = array<i64: 1, 240, 512>}, {pipeline_mode = #tpu.pipeline_mode<synchronous>, transform_indices = @transform_1, window_bounds = array<i64: 512, 128>}, {pipeline_mode = #tpu.pipeline_mode<synchronous>, transform_indices = @transform_2, window_bounds = array<i64: 1, 128>}, {transform_indices = @transform_3, window_bounds = array<i64: 240, 128>}]} {
    %c0 = arith.constant 0 : index
    %c0_0 = arith.constant 0 : index
    %0 = vector.load %arg2[%c0, %c0_0] : memref<512x128xbf16, #tpu.memory_space<vmem>>, vector<512x128xbf16>
    %c0_1 = arith.constant 0 : index
    %c0_2 = arith.constant 0 : index
    %c0_3 = arith.constant 0 : index
    %1 = vector.load %arg1[%c0_1, %c0_2, %c0_3] : memref<1x240x512xbf16, #tpu.memory_space<vmem>>, vector<1x240x512xbf16>
    %2 = vector.shape_cast %1 : vector<1x240x512xbf16> to vector<240x512xbf16>
    %cst = arith.constant dense<0.000000e+00> : vector<240x128xf32>
    %3 = tpu.matmul %2, %0, %cst {dimension_numbers = #tpu.dot_dimension_numbers<[1], [0], [0], [1], [0, 0, 1, 1], [], []>} : vector<240x512xbf16>, vector<512x128xbf16>, vector<240x128xf32> -> vector<240x128xf32>
    %c0_4 = arith.constant 0 : index
    %c0_5 = arith.constant 0 : index
    %4 = vector.load %arg3[%c0_4, %c0_5] : memref<1x128xf32, #tpu.memory_space<vmem>>, vector<1x128xf32>
    %5 = vector.broadcast %4 : vector<1x128xf32> to vector<240x128xf32>
    %6 = arith.addf %3, %5 : vector<240x128xf32>
    %cst_6 = arith.constant 0.000000e+00 : f32
    %7 = vector.broadcast %cst_6 : f32 to vector<240x128xf32>
    %8 = arith.maximumf %6, %7 : vector<240x128xf32>
    %9 = arith.truncf %8 : vector<240x128xf32> to vector<240x128xbf16>
    %c0_7 = arith.constant 0 : index
    %c0_8 = arith.constant 0 : index
    %10 = vector.load %arg4[%c0_7, %c0_8] : memref<240x128xbf16, #tpu.memory_space<vmem>>, vector<240x128xbf16>
    tpu.vector_store %arg4[%c0_7, %c0_8], %9 {strides = array<i32>} : memref<240x128xbf16, #tpu.memory_space<vmem>>, vector<240x128xbf16>,
    return
  }
  func.func @transform_0(%arg0: i32) -> (i32, i32, i32) {
    %c0_i32 = arith.constant 0 : i32
    %c0_i32_0 = arith.constant 0 : i32
    %c0_i32_1 = arith.constant 0 : i32
    return %c0_i32, %arg0, %c0_i32_0 : i32, i32, i32
  }
  func.func @transform_1(%arg0: i32) -> (i32, i32) {
    %c0_i32 = arith.constant 0 : i32
    %c0_i32_0 = arith.constant 0 : i32
    %c0_i32_1 = arith.constant 0 : i32
    return %c0_i32, %c0_i32_0 : i32, i32
  }
  func.func @transform_2(%arg0: i32) -> (i32, i32) {
    %c0_i32 = arith.constant 0 : i32
    %c0_i32_0 = arith.constant 0 : i32
    %c0_i32_1 = arith.constant 0 : i32
    return %c0_i32, %c0_i32_0 : i32, i32
  }
  func.func @transform_3(%arg0: i32) -> (i32, i32) {
    %c0_i32 = arith.constant 0 : i32
    %c0_i32_0 = arith.constant 0 : i32
    return %arg0, %c0_i32 : i32, i32
  }
}

module attributes {stable_mosaic.version = 11 : i64} {
  func.func @_conv_pool_kernel(%arg0: i32, %arg1: memref<1x400x32xbf16, #tpu.memory_space<vmem>>, %arg2: memref<32x128xbf16, #tpu.memory_space<vmem>>, %arg3: memref<1x128xf32, #tpu.memory_space<vmem>>, %arg4: memref<400x128xf32, #tpu.memory_space<vmem>>) attributes {dimension_semantics = [#tpu.dimension_semantics<parallel>], iteration_bounds = array<i64: 4>, scalar_prefetch = 0 : i64, scratch_operands = 0 : i64, tpu.core_type = #tpu.core_type<tc>, window_params = [{transform_indices = @transform_0, window_bounds = array<i64: 1, 400, 32>}, {pipeline_mode = #tpu.pipeline_mode<synchronous>, transform_indices = @transform_1, window_bounds = array<i64: 32, 128>}, {pipeline_mode = #tpu.pipeline_mode<synchronous>, transform_indices = @transform_2, window_bounds = array<i64: 1, 128>}, {transform_indices = @transform_3, window_bounds = array<i64: 400, 128>}]} {
    %c0 = arith.constant 0 : index
    %c0_0 = arith.constant 0 : index
    %0 = vector.load %arg2[%c0, %c0_0] : memref<32x128xbf16, #tpu.memory_space<vmem>>, vector<32x128xbf16>
    %c0_1 = arith.constant 0 : index
    %c0_2 = arith.constant 0 : index
    %c0_3 = arith.constant 0 : index
    %1 = vector.load %arg1[%c0_1, %c0_2, %c0_3] : memref<1x400x32xbf16, #tpu.memory_space<vmem>>, vector<1x400x32xbf16>
    %2 = vector.shape_cast %1 : vector<1x400x32xbf16> to vector<400x32xbf16>
    %cst = arith.constant dense<0.000000e+00> : vector<400x128xf32>
    %3 = tpu.matmul %2, %0, %cst {dimension_numbers = #tpu.dot_dimension_numbers<[1], [0], [0], [1], [0, 0, 1, 1], [], []>} : vector<400x32xbf16>, vector<32x128xbf16>, vector<400x128xf32> -> vector<400x128xf32>
    %c0_4 = arith.constant 0 : index
    %c0_5 = arith.constant 0 : index
    %4 = vector.load %arg3[%c0_4, %c0_5] : memref<1x128xf32, #tpu.memory_space<vmem>>, vector<1x128xf32>
    %5 = vector.broadcast %4 : vector<1x128xf32> to vector<400x128xf32>
    %6 = arith.addf %3, %5 : vector<400x128xf32>
    %7 = math.tanh %6 : vector<400x128xf32>
    %c0_6 = arith.constant 0 : index
    %c0_7 = arith.constant 0 : index
    %8 = vector.load %arg4[%c0_6, %c0_7] : memref<400x128xf32, #tpu.memory_space<vmem>>, vector<400x128xf32>
    tpu.vector_store %arg4[%c0_6, %c0_7], %7 {strides = array<i32>} : memref<400x128xf32, #tpu.memory_space<vmem>>, vector<400x128xf32>,
    return
  }
  func.func @transform_0(%arg0: i32) -> (i32, i32, i32) {
    %c0_i32 = arith.constant 0 : i32
    %c0_i32_0 = arith.constant 0 : i32
    %c0_i32_1 = arith.constant 0 : i32
    return %c0_i32, %arg0, %c0_i32_0 : i32, i32, i32
  }
  func.func @transform_1(%arg0: i32) -> (i32, i32) {
    %c0_i32 = arith.constant 0 : i32
    %c0_i32_0 = arith.constant 0 : i32
    %c0_i32_1 = arith.constant 0 : i32
    return %c0_i32, %c0_i32_0 : i32, i32
  }
  func.func @transform_2(%arg0: i32) -> (i32, i32) {
    %c0_i32 = arith.constant 0 : i32
    %c0_i32_0 = arith.constant 0 : i32
    %c0_i32_1 = arith.constant 0 : i32
    return %c0_i32, %c0_i32_0 : i32, i32
  }
  func.func @transform_3(%arg0: i32) -> (i32, i32) {
    %c0_i32 = arith.constant 0 : i32
    %c0_i32_0 = arith.constant 0 : i32
    return %arg0, %c0_i32 : i32, i32
  }
}

</mosaic_0001>

<bundles_post_ra>
// kernel: autoencoder_forward.6
= control target key start
LH: loop header
LB: loop body
LE: loop exit
PB: predicated region body
PF: predicated region fallthrough
CT: control target
= control target key end

     0   :  { %s1855_s12 = smov 0   ;;  %s1857_s13 = smov 0   ;;  %s2186_s0 = inlined_call_operand.vmem [shape: bf16[4,256,32], index: 0, kind: input, shape index: {}]   ;;  %s2187_s1 = inlined_call_operand.vmem [shape: bf16[32,128], index: 1, kind: input, shape index: {}]   ;;  %s2188_s2 = inlined_call_operand.vmem [shape: f32[1,128], index: 2, kind: input, shape index: {}]   ;;  %s2189_s3 = inlined_call_operand.vmem [shape: bf16[256,128], index: 3, kind: output, shape index: {}]  }
   0x1   :  { %s1859_s14 = smov 0  }
   0x2 LB: > { %s1425_s15 = sadd.s32 4294967295, %s1833_s14   ;;  %s1872_s16 = sadd.s32 1, %s1833_s14   ;;  %s1833_s14 = sphi %s1859_s14, %s2192_s14   ;;  %s1829_s13 = sphi %s1857_s13, %s2191_s13   ;;  %s1825_s12 = sphi %s1855_s12, %s2190_s12  }
   0x3   : > { %s17_s17 = ssub.s32 %s1833_s14, %s1872_s16  ;;  %s20_s18 = sadd.s32 1, %s1829_s13 }
   0x4   : > { %p18_p0 = scmp.eq.s32.totalorder %s17_s17, 0  ;;  %p27_p1 = scmp.ne.s32.totalorder %s1829_s13, %s1825_s12 }
   0x5   : > { %p28_p2 = scmp.eq.s32.totalorder %s1833_s14, 0  ;;  %p1428_p4 = scmp.ge.s32.totalorder %s1833_s14, 2 }
   0x6   : > { %s1881_s19 = scalar_select %p18_p0, %s1829_s13, %s20_s18  }
   0x7   : > { %p29_p3 = por %p28_p2, %p27_p1  ;;  %127 = sbr.rel (%p1428_p4) target bundleno = 34 (0x22), region = 24 }
   0xe   : > { %130 = sbr.rel (!%p29_p3) target bundleno = 34 (0x22), region = 28  ;;  %s132_s20 = sand.u32 (%p29_p3), 1, %s1829_s13  }
   0xf   : > { %s1569_s21 = sshll.u32 (%p29_p3), %s1833_s14, 6  ;;  %s1429_s22 = sshll.u32 (%p29_p3), %s132_s20, 8 }
  0x10   : > { %s1889_s25 = scalar_lea.vmem (%p29_p3), %s2186_s0, %s1569_s21  ;;  %s1894_s26 = scalar_lea.vmem (%p29_p3), [#allocation2], %s1429_s22 }
  0x11   : > { %v153_v0 = vld [vmem:[%s1889_s25] sm:$0xff] (%p29_p3)   ;;  %v157_v1 = vld [vmem:[%s1889_s25 + $0x8] sm:$0xff] (%p29_p3)   ;;  %v161_v2 = vld [vmem:[%s1889_s25 + $0x10] sm:$0xff] (%p29_p3)  }
  0x12   : > { %154 = vst [vmem:[%s1894_s26] sm:$0xff] (%p29_p3), %v153_v0   ;;  %158 = vst [vmem:[%s1894_s26 + $0x8] sm:$0xff] (%p29_p3), %v157_v1   ;;  %v165_v3 = vld [vmem:[%s1889_s25 + $0x18] sm:$0xff] (%p29_p3)   ;;  %v169_v4 = vld [vmem:[%s1889_s25 + $0x20] sm:$0xff] (%p29_p3)  }
  0x13   : > { %162 = vst [vmem:[%s1894_s26 + $0x10] sm:$0xff] (%p29_p3), %v161_v2   ;;  %v173_v5 = vld [vmem:[%s1889_s25 + $0x28] sm:$0xff] (%p29_p3)   ;;  %166 = vst [vmem:[%s1894_s26 + $0x18] sm:$0xff] (%p29_p3), %v165_v3   ;;  %v177_v6 = vld [vmem:[%s1889_s25 + $0x30] sm:$0xff] (%p29_p3)  }
  0x14   : > { %170 = vst [vmem:[%s1894_s26 + $0x20] sm:$0xff] (%p29_p3), %v169_v4   ;;  %174 = vst [vmem:[%s1894_s26 + $0x28] sm:$0xff] (%p29_p3), %v173_v5   ;;  %v181_v7 = vld [vmem:[%s1889_s25 + $0x38] sm:$0xff] (%p29_p3)   ;;  %v185_v8 = vld [vmem:[%s1889_s25 + $0x80] sm:$0xff] (%p29_p3)  }
  0x15   : > { %178 = vst [vmem:[%s1894_s26 + $0x30] sm:$0xff] %v177_v6   ;;  %182 = vst [vmem:[%s1894_s26 + $0x38] sm:$0xff] %v181_v7   ;;  %v189_v9 = vld [vmem:[%s1889_s25 + $0x88] sm:$0xff]   ;;  %v193_v10 = vld [vmem:[%s1889_s25 + $0x90] sm:$0xff]  }
  0x16   : > { %186 = vst [vmem:[%s1894_s26 + $0x40] sm:$0xff] %v185_v8   ;;  %v197_v11 = vld [vmem:[%s1889_s25 + $0x98] sm:$0xff]   ;;  %190 = vst [vmem:[%s1894_s26 + $0x48] sm:$0xff] %v189_v9   ;;  %v201_v12 = vld [vmem:[%s1889_s25 + $0xa0] sm:$0xff]  }
  0x17   : > { %194 = vst [vmem:[%s1894_s26 + $0x50] sm:$0xff] %v193_v10   ;;  %198 = vst [vmem:[%s1894_s26 + $0x58] sm:$0xff] %v197_v11   ;;  %v205_v13 = vld [vmem:[%s1889_s25 + $0xa8] sm:$0xff]   ;;  %v209_v14 = vld [vmem:[%s1889_s25 + $0xb0] sm:$0xff]  }
  0x18   : > { %202 = vst [vmem:[%s1894_s26 + $0x60] sm:$0xff] %v201_v12   ;;  %206 = vst [vmem:[%s1894_s26 + $0x68] sm:$0xff] %v205_v13   ;;  %v213_v15 = vld [vmem:[%s1889_s25 + $0xb8] sm:$0xff]   ;;  %v217_v16 = vld [vmem:[%s1889_s25 + $0x100] sm:$0xff]  }
  0x19   : > { %210 = vst [vmem:[%s1894_s26 + $0x70] sm:$0xff] %v209_v14   ;;  %v221_v17 = vld [vmem:[%s1889_s25 + $0x108] sm:$0xff]   ;;  %214 = vst [vmem:[%s1894_s26 + $0x78] sm:$0xff] %v213_v15   ;;  %v225_v18 = vld [vmem:[%s1889_s25 + $0x110] sm:$0xff]  }
  0x1a   : > { %218 = vst [vmem:[%s1894_s26 + $0x80] sm:$0xff] %v217_v16   ;;  %222 = vst [vmem:[%s1894_s26 + $0x88] sm:$0xff] %v221_v17   ;;  %v229_v19 = vld [vmem:[%s1889_s25 + $0x118] sm:$0xff]   ;;  %v233_v20 = vld [vmem:[%s1889_s25 + $0x120] sm:$0xff]  }
  0x1b   : > { %226 = vst [vmem:[%s1894_s26 + $0x90] sm:$0xff] %v225_v18   ;;  %230 = vst [vmem:[%s1894_s26 + $0x98] sm:$0xff] %v229_v19   ;;  %v237_v21 = vld [vmem:[%s1889_s25 + $0x128] sm:$0xff]   ;;  %v241_v22 = vld [vmem:[%s1889_s25 + $0x130] sm:$0xff]  }
  0x1c   : > { %234 = vst [vmem:[%s1894_s26 + $0xa0] sm:$0xff] %v233_v20   ;;  %v245_v23 = vld [vmem:[%s1889_s25 + $0x138] sm:$0xff]   ;;  %238 = vst [vmem:[%s1894_s26 + $0xa8] sm:$0xff] %v237_v21   ;;  %v249_v24 = vld [vmem:[%s1889_s25 + $0x180] sm:$0xff]  }
  0x1d   : > { %242 = vst [vmem:[%s1894_s26 + $0xb0] sm:$0xff] %v241_v22   ;;  %246 = vst [vmem:[%s1894_s26 + $0xb8] sm:$0xff] %v245_v23   ;;  %v253_v25 = vld [vmem:[%s1889_s25 + $0x188] sm:$0xff]   ;;  %v257_v26 = vld [vmem:[%s1889_s25 + $0x190] sm:$0xff]  }
  0x1e   : > { %250 = vst [vmem:[%s1894_s26 + $0xc0] sm:$0xff] %v249_v24   ;;  %254 = vst [vmem:[%s1894_s26 + $0xc8] sm:$0xff] %v253_v25   ;;  %v261_v27 = vld [vmem:[%s1889_s25 + $0x198] sm:$0xff]   ;;  %v265_v28 = vld [vmem:[%s1889_s25 + $0x1a0] sm:$0xff]  }
  0x1f   : > { %258 = vst [vmem:[%s1894_s26 + $0xd0] sm:$0xff] %v257_v26   ;;  %v269_v29 = vld [vmem:[%s1889_s25 + $0x1a8] sm:$0xff]   ;;  %262 = vst [vmem:[%s1894_s26 + $0xd8] sm:$0xff] %v261_v27   ;;  %v273_v30 = vld [vmem:[%s1889_s25 + $0x1b0] sm:$0xff]  }
  0x20   : > { %266 = vst [vmem:[%s1894_s26 + $0xe0] sm:$0xff] %v265_v28   ;;  %270 = vst [vmem:[%s1894_s26 + $0xe8] sm:$0xff] %v269_v29   ;;  %v277_v31 = vld [vmem:[%s1889_s25 + $0x1b8] sm:$0xff]  }
  0x21   : > { %274 = vst [vmem:[%s1894_s26 + $0xf0] sm:$0xff] %v273_v30   ;;  %278 = vst [vmem:[%s1894_s26 + $0xf8] sm:$0xff] %v277_v31  }
  0x22 PF: > { %p1432_p5 = scmp.ge.s32.totalorder %s1833_s14, 1  ;;  %p430_p6 = scmp.lt.s32.totalorder %s1833_s14, 3 }
  0x24   : > { %p431_p7 = pnand %p1432_p5, %p430_p6 }
  0x25   : > { %v1777_v32 = vld [vmem:[%s2187_s1] sm:$0xff] (!%p431_p7)   ;;  %s437_s29 = sand.u32 (!%p431_p7), 1, %s1825_s12   ;;  %v1778_v33 = vld [vmem:[%s2187_s1 + $0x8] sm:$0xff] (!%p431_p7)   ;;  %vm540_vm0 = vcmask (!%p431_p7), 261120   ;;  %s1434_s7 = sshll.u32 (!%p431_p7), %s1425_s15, 4 }
  0x26   : > { %434 = sbr.rel (%p431_p7) target bundleno = 328 (0x148), region = 69  ;;  %s1433_s5 = sshll.u32 (!%p431_p7), %s437_s29, 8  ;;  %1673 = vmatprep.subr.bf16.mxu0 (!%p431_p7), %v1777_v32  ;;  %1693 = vmatprep.subr.bf16.mxu1 (!%p431_p7), %v1777_v32 }
  0x27   : > { %1674 = vmatpush3.bf16.msra.mxu0 (!%p431_p7), %v1777_v32  ;;  %1694 = vmatpush3.bf16.msra.mxu1 (!%p431_p7), %v1777_v32  ;;  %s1966_s6 = scalar_lea.vmem (!%p431_p7), [#allocation2], %s1433_s5  ;;  %p462_p8 = scmp.lt.s32.totalorder (!%p431_p7), %s1434_s7, 31 }
  0x28   : > { %v1779_v34 = vld [vmem:[%s1966_s6] sm:$0xff] (!%p431_p7)   ;;  %1675 = vmatprep.subr.bf16.mxu0 (!%p431_p7), %v1778_v33  ;;  %1695 = vmatprep.subr.bf16.mxu1 (!%p431_p7), %v1778_v33  ;;  %v1781_v36 = vld [vmem:[%s1966_s6 + $0x8] sm:$0xff] (!%p431_p7)   ;;  %v1783_v38 = vld [vmem:[%s1966_s6 + $0x10] sm:$0xff] (!%p431_p7)  }
  0x29   : > { %v1780_v35 = vld [vmem:[%s1966_s6 + $0x40] sm:$0xff] (!%p431_p7)   ;;  %1677 = vmatprep.mubr.msk.bf16.mxu0 (!%p431_p7), %vm540_vm0, %v1779_v34  ;;  %v1782_v37 = vld [vmem:[%s1966_s6 + $0x48] sm:$0xff] (!%p431_p7)   ;;  %v1784_v39 = vld [vmem:[%s1966_s6 + $0x50] sm:$0xff] (!%p431_p7)  }
  0x2a   : > { %1697 = vmatprep.mubr.msk.bf16.mxu1 (!%p431_p7), %vm540_vm0, %v1780_v35  ;;  %v1785_v40 = vld [vmem:[%s1966_s6 + $0x18] sm:$0xff] (!%p431_p7)   ;;  %v1787_v42 = vld [vmem:[%s1966_s6 + $0x20] sm:$0xff] (!%p431_p7)   ;;  %v1789_v44 = vld [vmem:[%s1966_s6 + $0x28] sm:$0xff] (!%p431_p7)  }
  0x2b   : > { %1676 = vmatpush3.bf16.msra.mxu0 (!%p431_p7), %v1778_v33  ;;  %1696 = vmatpush3.bf16.msra.mxu1 (!%p431_p7), %v1778_v33  ;;  %v1786_v41 = vld [vmem:[%s1966_s6 + $0x58] sm:$0xff] (!%p431_p7)   ;;  %v1788_v43 = vld [vmem:[%s1966_s6 + $0x60] sm:$0xff] (!%p431_p7)   ;;  %v1790_v45 = vld [vmem:[%s1966_s6 + $0x68] sm:$0xff] (!%p431_p7)  }
  0x2c   : > { %1713 = vmatprep.subr.bf16.mxu0 (!%p431_p7), %v1777_v32  ;;  %1733 = vmatprep.subr.bf16.mxu1 (!%p431_p7), %v1777_v32  ;;  %v1791_v46 = vld [vmem:[%s1966_s6 + $0x30] sm:$0xff] (!%p431_p7)   ;;  %v1793_v48 = vld [vmem:[%s1966_s6 + $0x38] sm:$0xff] (!%p431_p7)   ;;  %v1795_v50 = vld [vmem:[%s1966_s6 + $0x80] sm:$0xff] (!%p431_p7)  }
  0x2d   : > { %v1792_v47 = vld [vmem:[%s1966_s6 + $0x70] sm:$0xff]   ;;  %v1794_v49 = vld [vmem:[%s1966_s6 + $0x78] sm:$0xff]   ;;  %v1796_v51 = vld [vmem:[%s1966_s6 + $0xc0] sm:$0xff]   ;;  %s2194_s7 = smov (!%p462_p8, %s1434_s7), 31 }
  0x2e   : > { %1678 = vmatmul.mubr.msk.bf16.vlgmr.msra.gmra.mrb[0].mxu0 %vm540_vm0, %v1781_v36  ;;  %1698 = vmatmul.mubr.msk.bf16.vlgmr.msra.gmra.mrb[0].mxu1 %vm540_vm0, %v1782_v37  ;;  %v1797_v52 = vld [vmem:[%s1966_s6 + $0x88] sm:$0xff]   ;;  %v1799_v54 = vld [vmem:[%s1966_s6 + $0x90] sm:$0xff]   ;;  %v1801_v56 = vld [vmem:[%s1966_s6 + $0x98] sm:$0xff]   ;;  %s1435_s10 = sshll.u32 %s2194_s7, 2 }
  0x2f   : > { %1714 = vmatpush3.bf16.msra.mxu0 %v1777_v32  ;;  %1734 = vmatpush3.bf16.msra.mxu1 %v1777_v32  ;;  %v1798_v53 = vld [vmem:[%s1966_s6 + $0xc8] sm:$0xff]   ;;  %v1800_v55 = vld [vmem:[%s1966_s6 + $0xd0] sm:$0xff]   ;;  %v1802_v57 = vld [vmem:[%s1966_s6 + $0xd8] sm:$0xff]   ;;  %s2121_s14 = scalar_lea.vmem %s2189_s3, %s1435_s10 }
  0x30   : > { %1681 = vmatprep.mubr.msk.bf16.mxu0 %vm540_vm0, %v1783_v38  ;;  %1701 = vmatprep.mubr.msk.bf16.mxu1 %vm540_vm0, %v1784_v39  ;;  %v1803_v58 = vld [vmem:[%s1966_s6 + $0xa0] sm:$0xff]   ;;  %v1805_v60 = vld [vmem:[%s1966_s6 + $0xa8] sm:$0xff]   ;;  %v1807_v62 = vld [vmem:[%s1966_s6 + $0xb0] sm:$0xff]  }
  0x31   : > { %1715 = vmatprep.subr.bf16.mxu0 %v1778_v33  ;;  %1735 = vmatprep.subr.bf16.mxu1 %v1778_v33  ;;  %v1804_v59 = vld [vmem:[%s1966_s6 + $0xe0] sm:$0xff]   ;;  %v1806_v61 = vld [vmem:[%s1966_s6 + $0xe8] sm:$0xff]   ;;  %v1808_v63 = vld [vmem:[%s1966_s6 + $0xf0] sm:$0xff]  }
  0x32   : > { %v1809_v0 = vld [vmem:[%s1966_s6 + $0xb8] sm:$0xff]  }
  0x33   : > { %1716 = vmatpush3.bf16.msra.mxu0 %v1778_v33  ;;  %1736 = vmatpush3.bf16.msra.mxu1 %v1778_v33  ;;  %v1810_v1 = vld [vmem:[%s1966_s6 + $0xf8] sm:$0xff]  }
  0x36   : > { %1682 = vmatmul.mubr.msk.bf16.gmra.mrb[4].mxu0 %vm540_vm0, %v1785_v40  ;;  %1702 = vmatmul.mubr.msk.bf16.gmra.mrb[4].mxu1 %vm540_vm0, %v1786_v41 }
  0x37   : > { %1685 = vmatprep.mubr.msk.bf16.mxu0 %vm540_vm0, %v1787_v42  ;;  %1705 = vmatprep.mubr.msk.bf16.mxu1 %vm540_vm0, %v1788_v43 }
  0x3e   : > { %1686 = vmatmul.mubr.msk.bf16.gmra.mrb[8].mxu0 %vm540_vm0, %v1789_v44  ;;  %1706 = vmatmul.mubr.msk.bf16.gmra.mrb[8].mxu1 %vm540_vm0, %v1790_v45 }
  0x3f   : > { %1689 = vmatprep.mubr.msk.bf16.mxu0 %vm540_vm0, %v1791_v46  ;;  %1709 = vmatprep.mubr.msk.bf16.mxu1 %vm540_vm0, %v1792_v47 }
  0x46   : > { %1690 = vmatmul.mubr.msk.bf16.gmra.mrb[12].mxu0 %vm540_vm0, %v1793_v48  ;;  %1710 = vmatmul.mubr.msk.bf16.gmra.mrb[12].mxu1 %vm540_vm0, %v1794_v49 }
  0x47   : > { %1717 = vmatprep.mubr.msk.bf16.mxu0 %vm540_vm0, %v1795_v50  ;;  %1737 = vmatprep.mubr.msk.bf16.mxu1 %vm540_vm0, %v1796_v51 }
  0x4e   : > { %1718 = vmatmul.mubr.msk.bf16.vlgmr.msra.gmra.mrb[16].mxu0 %vm540_vm0, %v1797_v52  ;;  %1738 = vmatmul.mubr.msk.bf16.vlgmr.msra.gmra.mrb[16].mxu1 %vm540_vm0, %v1798_v53 }
  0x4f   : > { %1721 = vmatprep.mubr.msk.bf16.mxu0 %vm540_vm0, %v1799_v54  ;;  %1741 = vmatprep.mubr.msk.bf16.mxu1 %vm540_vm0, %v1800_v55  ;;  %v2109_v55 = vld [vmem:[%s2188_s2] ss:$0 sm:$0xff] }
  0x56   : > { %1722 = vmatmul.mubr.msk.bf16.gmra.mrb[20].mxu0 %vm540_vm0, %v1801_v56  ;;  %1742 = vmatmul.mubr.msk.bf16.gmra.mrb[20].mxu1 %vm540_vm0, %v1802_v57 }
  0x57   : > { %1725 = vmatprep.mubr.msk.bf16.mxu0 %vm540_vm0, %v1803_v58  ;;  %1745 = vmatprep.mubr.msk.bf16.mxu1 %vm540_vm0, %v1804_v59 }
  0x5e   : > { %1726 = vmatmul.mubr.msk.bf16.gmra.mrb[24].mxu0 %vm540_vm0, %v1805_v60  ;;  %1746 = vmatmul.mubr.msk.bf16.gmra.mrb[24].mxu1 %vm540_vm0, %v1806_v61 }
  0x5f   : > { %1729 = vmatprep.mubr.msk.bf16.mxu0 %vm540_vm0, %v1807_v62  ;;  %1749 = vmatprep.mubr.msk.bf16.mxu1 %vm540_vm0, %v1808_v63 }
  0x66   : > { %1730 = vmatmul.mubr.msk.bf16.gmra.mrb[28].mxu0 %vm540_vm0, %v1809_v0  ;;  %1750 = vmatmul.mubr.msk.bf16.gmra.mrb[28].mxu1 %vm540_vm0, %v1810_v1 }
 0x101   : > { %v1679_v2 = vpop.f32.mrb[0].mxu0  ;;  %v1699_v3 = vpop.f32.mrb[0].mxu1 }
 0x102   : > { %v842_v4 = vmax.f32 %v1679_v2, %v1699_v3  ;;  %v599_v5 = vpop.f32.mrb[1].mxu0  ;;  %v777_v6 = vpop.f32.mrb[1].mxu1 }
 0x103   : > { %v840_v7 = vmax.f32 %v599_v5, %v777_v6  ;;  %v1680_v8 = vpop.f32.mrb[2].mxu0  ;;  %v1700_v9 = vpop.f32.mrb[2].mxu1 }
 0x104   : > { %v843_v10 = vmax.f32 %v1680_v8, %v1700_v9  ;;  %v602_v11 = vpop.f32.mrb[3].mxu0  ;;  %v780_v12 = vpop.f32.mrb[3].mxu1 }
 0x105   : > { %v841_v13 = vmax.f32 %v602_v11, %v780_v12 }
 0x109   : > { %v2032_v14 = vpop.f32.mrb[4].mxu0  ;;  %v2034_v15 = vpop.f32.mrb[4].mxu1 }
 0x10a   : > { %v846_v16 = vmax.f32 %v2032_v14, %v2034_v15  ;;  %v2038_v17 = vpop.f32.mrb[5].mxu0  ;;  %v2040_v18 = vpop.f32.mrb[5].mxu1 }
 0x10b   : > { %v844_v19 = vmax.f32 %v2038_v17, %v2040_v18  ;;  %v2044_v20 = vpop.f32.mrb[6].mxu0  ;;  %v2046_v21 = vpop.f32.mrb[6].mxu1 }
 0x10c   : > { %v847_v22 = vmax.f32 %v2044_v20, %v2046_v21  ;;  %v2050_v23 = vpop.f32.mrb[7].mxu0  ;;  %v2052_v24 = vpop.f32.mrb[7].mxu1 }
 0x10d   : > { %v845_v25 = vmax.f32 %v2050_v23, %v2052_v24 }
 0x111   : > { %v2056_v26 = vpop.f32.mrb[8].mxu0  ;;  %v2058_v27 = vpop.f32.mrb[8].mxu1 }
 0x112   : > { %v850_v28 = vmax.f32 %v2056_v26, %v2058_v27  ;;  %v2062_v29 = vpop.f32.mrb[9].mxu0  ;;  %v2064_v30 = vpop.f32.mrb[9].mxu1 }
 0x113   : > { %v848_v31 = vmax.f32 %v2062_v29, %v2064_v30  ;;  %v2068_v32 = vpop.f32.mrb[10].mxu0  ;;  %v2070_v33 = vpop.f32.mrb[10].mxu1 }
 0x114   : > { %v851_v34 = vmax.f32 %v2068_v32, %v2070_v33  ;;  %v2074_v35 = vpop.f32.mrb[11].mxu0  ;;  %v2076_v36 = vpop.f32.mrb[11].mxu1 }
 0x115   : > { %v849_v37 = vmax.f32 %v2074_v35, %v2076_v36 }
 0x119   : > { %v2080_v38 = vpop.f32.mrb[12].mxu0  ;;  %v2082_v39 = vpop.f32.mrb[12].mxu1 }
 0x11a   : > { %v854_v40 = vmax.f32 %v2080_v38, %v2082_v39  ;;  %v2086_v41 = vpop.f32.mrb[13].mxu0  ;;  %v2088_v42 = vpop.f32.mrb[13].mxu1 }
 0x11b   : > { %v852_v43 = vmax.f32 %v2086_v41, %v2088_v42  ;;  %v2092_v44 = vpop.f32.mrb[14].mxu0  ;;  %v2094_v45 = vpop.f32.mrb[14].mxu1 }
 0x11c   : > { %v855_v46 = vmax.f32 %v2092_v44, %v2094_v45  ;;  %v2098_v47 = vpop.f32.mrb[15].mxu0  ;;  %v2100_v48 = vpop.f32.mrb[15].mxu1 }
 0x11d   : > { %v853_v49 = vmax.f32 %v2098_v47, %v2100_v48 }
 0x121   : > { %v1719_v50 = vpop.f32.mrb[16].mxu0  ;;  %v1739_v51 = vpop.f32.mrb[16].mxu1 }
 0x122   : > { %v1036_v52 = vmax.f32 %v842_v4, %v1719_v50  ;;  %v971_v53 = vpop.f32.mrb[17].mxu0  ;;  %v1165_v54 = vpop.f32.mrb[17].mxu1 }
 0x123   : > { %v1034_v56 = vmax.f32 %v840_v7, %v971_v53  ;;  %v1720_v57 = vpop.f32.mrb[18].mxu0  ;;  %v1740_v58 = vpop.f32.mrb[18].mxu1 }
 0x124   : > { %v1230_v59 = vmax.f32 %v1036_v52, %v1739_v51  ;;  %v1037_v60 = vmax.f32 %v843_v10, %v1720_v57  ;;  %v974_v61 = vpop.f32.mrb[19].mxu0  ;;  %v1168_v62 = vpop.f32.mrb[19].mxu1 }
 0x125   : > { %v1228_v63 = vmax.f32 %v1034_v56, %v1165_v54  ;;  %v1035_v0 = vmax.f32 %v841_v13, %v974_v61 }
 0x126   : > { %v1253_v1 = vadd.f32 %v2109_v55, %v1230_v59  ;;  %v1231_v2 = vmax.f32 %v1037_v60, %v1740_v58 }
 0x127   : > { %v1251_v3 = vadd.f32 %v2109_v55, %v1228_v63  ;;  %v1229_v4 = vmax.f32 %v1035_v0, %v1168_v62 }
 0x128   : > { %v1254_v5 = vadd.f32 %v2109_v55, %v1231_v2  ;;  %v1269_v9 = vmax.f32 %v1253_v1, 0.0 }
 0x129   : > { %v1252_v6 = vadd.f32 %v2109_v55, %v1229_v4  ;;  %v1723_v7 = vpop.f32.mrb[20].mxu0  ;;  %v1743_v8 = vpop.f32.mrb[20].mxu1  ;;  %v1267_v50 = vmax.f32 %v1251_v3, 0.0 }
 0x12a   : > { %v1270_v10 = vmax.f32 %v1254_v5, 0.0  ;;  %v1040_v11 = vmax.f32 %v846_v16, %v1723_v7  ;;  %v987_v12 = vpop.f32.mrb[21].mxu0  ;;  %v1181_v13 = vpop.f32.mrb[21].mxu1 }
 0x12b   : > { %v1268_v51 = vmax.f32 %v1252_v6, 0.0  ;;  %v1038_v52 = vmax.f32 %v844_v19, %v987_v12  ;;  %v1724_v53 = vpop.f32.mrb[22].mxu0  ;;  %v1744_v54 = vpop.f32.mrb[22].mxu1 }
 0x12c   : > { %v1594_v56 = vpack.c.bf16 %v1270_v10, %v1269_v9  ;;  %v1234_v14 = vmax.f32 %v1040_v11, %v1743_v8  ;;  %v1041_v15 = vmax.f32 %v847_v22, %v1724_v53  ;;  %v990_v16 = vpop.f32.mrb[23].mxu0  ;;  %v1184_v57 = vpop.f32.mrb[23].mxu1 }
 0x12d   : > { %v1589_v58 = vpack.c.bf16 %v1268_v51, %v1267_v50  ;;  %v1232_v59 = vmax.f32 %v1038_v52, %v1181_v13  ;;  %v1039_v60 = vmax.f32 %v845_v25, %v990_v16 }
 0x12e   : > { %1626 = vst [vmem:[%s2121_s14 + $0x8] sm:$0xff] %v1594_v56   ;;  %v1257_v17 = vadd.f32 %v2109_v55, %v1234_v14  ;;  %v1235_v18 = vmax.f32 %v1041_v15, %v1744_v54 }
 0x12f   : > { %1590 = vst [vmem:[%s2121_s14] sm:$0xff] %v1589_v58   ;;  %v1255_v19 = vadd.f32 %v2109_v55, %v1232_v59  ;;  %v1233_v61 = vmax.f32 %v1039_v60, %v1184_v57 }
 0x130   : > { %v1258_v62 = vadd.f32 %v2109_v55, %v1235_v18  ;;  %v1273_v63 = vmax.f32 %v1257_v17, 0.0 }
 0x131   : > { %v1256_v20 = vadd.f32 %v2109_v55, %v1233_v61  ;;  %v1727_v21 = vpop.f32.mrb[24].mxu0  ;;  %v1747_v22 = vpop.f32.mrb[24].mxu1  ;;  %v1271_v1 = vmax.f32 %v1255_v19, 0.0 }
 0x132   : > { %v1274_v0 = vmax.f32 %v1258_v62, 0.0  ;;  %v1044_v23 = vmax.f32 %v850_v28, %v1727_v21  ;;  %v1003_v24 = vpop.f32.mrb[25].mxu0  ;;  %v1197_v25 = vpop.f32.mrb[25].mxu1 }
 0x133   : > { %v1272_v2 = vmax.f32 %v1256_v20, 0.0  ;;  %v1042_v3 = vmax.f32 %v848_v31, %v1003_v24  ;;  %v1728_v4 = vpop.f32.mrb[26].mxu0  ;;  %v1748_v5 = vpop.f32.mrb[26].mxu1 }
 0x134   : > { %v1604_v6 = vpack.c.bf16 %v1274_v0, %v1273_v63  ;;  %v1238_v7 = vmax.f32 %v1044_v23, %v1747_v22  ;;  %v1045_v8 = vmax.f32 %v851_v34, %v1728_v4  ;;  %v1006_v26 = vpop.f32.mrb[27].mxu0  ;;  %v1200_v27 = vpop.f32.mrb[27].mxu1 }
 0x135   : > { %v1599_v28 = vpack.c.bf16 %v1272_v2, %v1271_v1  ;;  %v1236_v9 = vmax.f32 %v1042_v3, %v1197_v25  ;;  %v1043_v10 = vmax.f32 %v849_v37, %v1006_v26 }
 0x136   : > { %1628 = vst [vmem:[%s2121_s14 + $0x18] sm:$0xff] %v1604_v6   ;;  %v1261_v29 = vadd.f32 %v2109_v55, %v1238_v7  ;;  %v1239_v30 = vmax.f32 %v1045_v8, %v1748_v5 }
 0x137   : > { %1627 = vst [vmem:[%s2121_s14 + $0x10] sm:$0xff] %v1599_v28   ;;  %v1259_v31 = vadd.f32 %v2109_v55, %v1236_v9  ;;  %v1237_v11 = vmax.f32 %v1043_v10, %v1200_v27 }
 0x138   : > { %v1262_v12 = vadd.f32 %v2109_v55, %v1239_v30  ;;  %v1277_v13 = vmax.f32 %v1261_v29, 0.0 }
 0x139   : > { %v1260_v32 = vadd.f32 %v2109_v55, %v1237_v11  ;;  %v1731_v33 = vpop.f32.mrb[28].mxu0  ;;  %v1751_v34 = vpop.f32.mrb[28].mxu1  ;;  %v1275_v51 = vmax.f32 %v1259_v31, 0.0 }
 0x13a   : > { %v1278_v50 = vmax.f32 %v1262_v12, 0.0  ;;  %v1048_v35 = vmax.f32 %v854_v40, %v1731_v33  ;;  %v1019_v36 = vpop.f32.mrb[29].mxu0  ;;  %v1213_v37 = vpop.f32.mrb[29].mxu1 }
 0x13b   : > { %v1276_v52 = vmax.f32 %v1260_v32, 0.0  ;;  %v1046_v53 = vmax.f32 %v852_v43, %v1019_v36  ;;  %v1732_v54 = vpop.f32.mrb[30].mxu0  ;;  %v1752_v56 = vpop.f32.mrb[30].mxu1 }
 0x13c   : > { %v1614_v14 = vpack.c.bf16 %v1278_v50, %v1277_v13  ;;  %v1242_v15 = vmax.f32 %v1048_v35, %v1751_v34  ;;  %v1049_v16 = vmax.f32 %v855_v46, %v1732_v54  ;;  %v1022_v38 = vpop.f32.mrb[31].mxu0  ;;  %v1216_v39 = vpop.f32.mrb[31].mxu1 }
 0x13d   : > { %v1609_v40 = vpack.c.bf16 %v1276_v52, %v1275_v51  ;;  %v1240_v57 = vmax.f32 %v1046_v53, %v1213_v37  ;;  %v1047_v58 = vmax.f32 %v853_v49, %v1022_v38 }
 0x13e   : > { %1630 = vst [vmem:[%s2121_s14 + $0x28] sm:$0xff] %v1614_v14   ;;  %v1265_v41 = vadd.f32 %v2109_v55, %v1242_v15  ;;  %v1243_v42 = vmax.f32 %v1049_v16, %v1752_v56 }
 0x13f   : > { %1629 = vst [vmem:[%s2121_s14 + $0x20] sm:$0xff] %v1609_v40   ;;  %v1263_v43 = vadd.f32 %v2109_v55, %v1240_v57  ;;  %v1241_v59 = vmax.f32 %v1047_v58, %v1216_v39 }
 0x140   : > { %v1266_v44 = vadd.f32 %v2109_v55, %v1243_v42  ;;  %v1281_v46 = vmax.f32 %v1265_v41, 0.0 }
 0x141   : > { %v1264_v45 = vadd.f32 %v2109_v55, %v1241_v59  ;;  %v1279_v17 = vmax.f32 %v1263_v43, 0.0 }
 0x142   : > { %v1282_v60 = vmax.f32 %v1266_v44, 0.0 }
 0x143   : > { %v1280_v18 = vmax.f32 %v1264_v45, 0.0 }
 0x144   : > { %v1624_v47 = vpack.c.bf16 %v1282_v60, %v1281_v46 }
 0x145   : > { %v1619_v48 = vpack.c.bf16 %v1280_v18, %v1279_v17 }
 0x146   : > { %1632 = vst [vmem:[%s2121_s14 + $0x38] sm:$0xff] %v1624_v47  }
 0x147   : > { %1631 = vst [vmem:[%s2121_s14 + $0x30] sm:$0xff] %v1619_v48  }
 0x148 PF: > { %p10_p9 = scmp.ge.s32.totalorder %s1872_s16, 4   ;;  %s2190_s12 = smov %s1829_s13 }
 0x149   : > { %s2191_s13 = smov %s1881_s19  ;;  %s2192_s14 = smov %s1872_s16 }
 0x14a   :  { %12 = sbr.rel (!%p10_p9) target bundleno = 2 (0x2), region = 111 }

// kernel: autoencoder_forward.7
= control target key start
LH: loop header
LB: loop body
LE: loop exit
PB: predicated region body
PF: predicated region fallthrough
CT: control target
= control target key end

     0   :  { %s1340_s1 = inlined_call_operand.vmem [shape: bf16[256,128], index: 1, kind: input, shape index: {}]   ;;  %s1341_s0 = inlined_call_operand.vmem [shape: bf16[4,64,256], index: 0, kind: input, shape index: {}]   ;;  %s1342_s2 = inlined_call_operand.vmem [shape: f32[1,128], index: 2, kind: input, shape index: {}]   ;;  %s1343_s3 = inlined_call_operand.vmem [shape: bf16[64,128], index: 3, kind: output, shape index: {}]  }
   0x1   :  { %v961_v0 = vld [vmem:[%s1340_s1 + $0x40] sm:$0xff]   ;;  %v963_v2 = vld [vmem:[%s1340_s1 + $0x48] sm:$0xff]   ;;  %v965_v4 = vld [vmem:[%s1340_s1 + $0x50] sm:$0xff]  }
   0x2   :  { %v962_v1 = vld [vmem:[%s1340_s1] sm:$0xff]   ;;  %801 = vmatprep.subr.bf16.mxu0 %v961_v0  ;;  %841 = vmatprep.subr.bf16.mxu1 %v961_v0  ;;  %v964_v3 = vld [vmem:[%s1340_s1 + $0x8] sm:$0xff]   ;;  %v1063_v5 = vld [vmem:[%s1340_s1 + $0x10] sm:$0xff]  }
   0x3   :  { %802 = vmatpush3.bf16.msra.mxu0 %v962_v1  ;;  %842 = vmatpush3.bf16.msra.mxu1 %v962_v1  ;;  %v1068_v6 = vld [vmem:[%s1340_s1 + $0x58] sm:$0xff]   ;;  %v1082_v8 = vld [vmem:[%s1340_s1 + $0x60] sm:$0xff]   ;;  %v1096_v10 = vld [vmem:[%s1340_s1 + $0x68] sm:$0xff]  }
   0x4   :  { %803 = vmatprep.subr.bf16.mxu0 %v963_v2  ;;  %843 = vmatprep.subr.bf16.mxu1 %v963_v2  ;;  %v1075_v7 = vld [vmem:[%s1340_s1 + $0x18] sm:$0xff]   ;;  %v1089_v9 = vld [vmem:[%s1340_s1 + $0x20] sm:$0xff]   ;;  %v1109_v13 = vld [vmem:[%s1340_s1 + $0x28] sm:$0xff]  }
   0x5   :  { %v979_v11 = vld [vmem:[%s1341_s0 + $0x4] ss:$8 sps:$4 sm:$0xff]   ;;  %v1116_v14 = vld [vmem:[%s1340_s1 + $0x70] sm:$0xff]   ;;  %v1130_v16 = vld [vmem:[%s1340_s1 + $0x78] sm:$0xff]  }
   0x6   :  { %v982_v12 = vld [vmem:[%s1341_s0 + $0x44] ss:$8 sps:$4 sm:$0xff]   ;;  %223 = vmatprep.mubr.bf16.mxu0 %v979_v11  ;;  %v1123_v15 = vld [vmem:[%s1340_s1 + $0x30] sm:$0xff]   ;;  %v1137_v17 = vld [vmem:[%s1340_s1 + $0x38] sm:$0xff]  }
   0x7   :  { %804 = vmatpush3.bf16.msra.mxu0 %v964_v3  ;;  %844 = vmatpush3.bf16.msra.mxu1 %v964_v3  ;;  %v977_v18 = vld [vmem:[%s1341_s0] ss:$8 sps:$4 sm:$0xff]   ;;  %v983_v20 = vld [vmem:[%s1341_s0 + $0x14] ss:$8 sps:$4 sm:$0xff]   ;;  %v987_v22 = vld [vmem:[%s1341_s0 + $0x10] ss:$8 sps:$4 sm:$0xff]  }
   0x8   :  { %805 = vmatprep.subr.bf16.mxu0 %v965_v4  ;;  %845 = vmatprep.subr.bf16.mxu1 %v965_v4  ;;  %v980_v19 = vld [vmem:[%s1341_s0 + $0x40] ss:$8 sps:$4 sm:$0xff]   ;;  %v985_v21 = vld [vmem:[%s1341_s0 + $0x54] ss:$8 sps:$4 sm:$0xff]   ;;  %v988_v23 = vld [vmem:[%s1341_s0 + $0x50] ss:$8 sps:$4 sm:$0xff]  }
   0x9   :  { %337 = vmatprep.mubr.bf16.mxu1 %v982_v12  ;;  %v989_v24 = vld [vmem:[%s1341_s0 + $0x24] ss:$8 sps:$4 sm:$0xff]   ;;  %v993_v26 = vld [vmem:[%s1341_s0 + $0x20] ss:$8 sps:$4 sm:$0xff]   ;;  %v995_v28 = vld [vmem:[%s1341_s0 + $0x34] ss:$8 sps:$4 sm:$0xff]  }
   0xa   :  { %v991_v25 = vld [vmem:[%s1341_s0 + $0x64] ss:$8 sps:$4 sm:$0xff]   ;;  %v994_v27 = vld [vmem:[%s1341_s0 + $0x60] ss:$8 sps:$4 sm:$0xff]   ;;  %v997_v29 = vld [vmem:[%s1341_s0 + $0x74] ss:$8 sps:$4 sm:$0xff]  }
   0xb   :  { %806 = vmatpush3.bf16.msra.mxu0 %v1063_v5  ;;  %846 = vmatpush3.bf16.msra.mxu1 %v1063_v5  ;;  %v999_v30 = vld [vmem:[%s1341_s0 + $0x30] ss:$8 sps:$4 sm:$0xff]   ;;  %v1003_v32 = vld [vmem:[%s1341_s0 + $0x84] ss:$8 sps:$4 sm:$0xff]   ;;  %v1001_v34 = vld [vmem:[%s1341_s0 + $0x80] ss:$8 sps:$4 sm:$0xff]  }
   0xc   :  { %807 = vmatprep.subr.bf16.mxu0 %v1068_v6  ;;  %847 = vmatprep.subr.bf16.mxu1 %v1068_v6  ;;  %v1000_v31 = vld [vmem:[%s1341_s0 + $0x70] ss:$8 sps:$4 sm:$0xff]   ;;  %v1006_v33 = vld [vmem:[%s1341_s0 + $0xc4] ss:$8 sps:$4 sm:$0xff]   ;;  %v1004_v35 = vld [vmem:[%s1341_s0 + $0xc0] ss:$8 sps:$4 sm:$0xff]  }
   0xd   :  { %v1007_v36 = vld [vmem:[%s1341_s0 + $0x94] ss:$8 sps:$4 sm:$0xff]   ;;  %v1011_v38 = vld [vmem:[%s1341_s0 + $0x90] ss:$8 sps:$4 sm:$0xff]   ;;  %v1013_v40 = vld [vmem:[%s1341_s0 + $0xa4] ss:$8 sps:$4 sm:$0xff]  }
   0xe   :  { %v1009_v37 = vld [vmem:[%s1341_s0 + $0xd4] ss:$8 sps:$4 sm:$0xff]   ;;  %v1012_v39 = vld [vmem:[%s1341_s0 + $0xd0] ss:$8 sps:$4 sm:$0xff]   ;;  %v1015_v41 = vld [vmem:[%s1341_s0 + $0xe4] ss:$8 sps:$4 sm:$0xff]  }
   0xf   :  { %808 = vmatpush3.bf16.msra.mxu0 %v1075_v7  ;;  %848 = vmatpush3.bf16.msra.mxu1 %v1075_v7  ;;  %v1017_v42 = vld [vmem:[%s1341_s0 + $0xa0] ss:$8 sps:$4 sm:$0xff]   ;;  %v1019_v44 = vld [vmem:[%s1341_s0 + $0xb4] ss:$8 sps:$4 sm:$0xff]   ;;  %v1023_v46 = vld [vmem:[%s1341_s0 + $0xb0] ss:$8 sps:$4 sm:$0xff]  }
  0x10   :  { %809 = vmatprep.subr.bf16.mxu0 %v1082_v8  ;;  %849 = vmatprep.subr.bf16.mxu1 %v1082_v8  ;;  %v1018_v43 = vld [vmem:[%s1341_s0 + $0xe0] ss:$8 sps:$4 sm:$0xff]   ;;  %v1021_v45 = vld [vmem:[%s1341_s0 + $0xf4] ss:$8 sps:$4 sm:$0xff]   ;;  %v1024_v47 = vld [vmem:[%s1341_s0 + $0xf0] ss:$8 sps:$4 sm:$0xff]  }
  0x13   :  { %810 = vmatpush3.bf16.msra.mxu0 %v1089_v9  ;;  %850 = vmatpush3.bf16.msra.mxu1 %v1089_v9 }
  0x14   :  { %811 = vmatprep.subr.bf16.mxu0 %v1096_v10  ;;  %851 = vmatprep.subr.bf16.mxu1 %v1096_v10 }
  0x17   :  { %812 = vmatpush3.bf16.msra.mxu0 %v1109_v13  ;;  %852 = vmatpush3.bf16.msra.mxu1 %v1109_v13 }
  0x18   :  { %813 = vmatprep.subr.bf16.mxu0 %v1116_v14  ;;  %853 = vmatprep.subr.bf16.mxu1 %v1116_v14 }
  0x1b   :  { %814 = vmatpush3.bf16.msra.mxu0 %v1123_v15  ;;  %854 = vmatpush3.bf16.msra.mxu1 %v1123_v15 }
  0x1c   :  { %815 = vmatprep.subr.bf16.mxu0 %v1130_v16  ;;  %855 = vmatprep.subr.bf16.mxu1 %v1130_v16 }
  0x1f   :  { %816 = vmatpush3.bf16.msra.mxu0 %v1137_v17  ;;  %856 = vmatpush3.bf16.msra.mxu1 %v1137_v17 }
  0x20   :  { %881 = vmatprep.subr.bf16.mxu0 %v961_v0  ;;  %921 = vmatprep.subr.bf16.mxu1 %v961_v0 }
  0x22   :  { %224 = vmatmul.mubr.bf16.vlgmr.msra.gmra.mrb[0].mxu0 %v977_v18  ;;  %338 = vmatmul.mubr.bf16.vlgmr.msra.gmra.mrb[0].mxu1 %v980_v19 }
  0x23   :  { %882 = vmatpush3.bf16.msra.mxu0 %v962_v1  ;;  %922 = vmatpush3.bf16.msra.mxu1 %v962_v1 }
  0x24   :  { %883 = vmatprep.subr.bf16.mxu0 %v963_v2  ;;  %923 = vmatprep.subr.bf16.mxu1 %v963_v2 }
  0x25   :  { %231 = vmatprep.mubr.bf16.mxu0 %v983_v20  ;;  %345 = vmatprep.mubr.bf16.mxu1 %v985_v21 }
  0x27   :  { %884 = vmatpush3.bf16.msra.mxu0 %v964_v3  ;;  %924 = vmatpush3.bf16.msra.mxu1 %v964_v3 }
  0x28   :  { %885 = vmatprep.subr.bf16.mxu0 %v965_v4  ;;  %925 = vmatprep.subr.bf16.mxu1 %v965_v4 }
  0x2a   :  { %232 = vmatmul.mubr.bf16.gmra.mrb[4].mxu0 %v987_v22  ;;  %346 = vmatmul.mubr.bf16.gmra.mrb[4].mxu1 %v988_v23 }
  0x2b   :  { %886 = vmatpush3.bf16.msra.mxu0 %v1063_v5  ;;  %926 = vmatpush3.bf16.msra.mxu1 %v1063_v5 }
  0x2c   :  { %887 = vmatprep.subr.bf16.mxu0 %v1068_v6  ;;  %927 = vmatprep.subr.bf16.mxu1 %v1068_v6 }
  0x2d   :  { %239 = vmatprep.mubr.bf16.mxu0 %v989_v24  ;;  %353 = vmatprep.mubr.bf16.mxu1 %v991_v25 }
  0x2f   :  { %888 = vmatpush3.bf16.msra.mxu0 %v1075_v7  ;;  %928 = vmatpush3.bf16.msra.mxu1 %v1075_v7 }
  0x30   :  { %889 = vmatprep.subr.bf16.mxu0 %v1082_v8  ;;  %929 = vmatprep.subr.bf16.mxu1 %v1082_v8 }
  0x32   :  { %240 = vmatmul.mubr.bf16.gmra.mrb[8].mxu0 %v993_v26  ;;  %354 = vmatmul.mubr.bf16.gmra.mrb[8].mxu1 %v994_v27 }
  0x33   :  { %890 = vmatpush3.bf16.msra.mxu0 %v1089_v9  ;;  %930 = vmatpush3.bf16.msra.mxu1 %v1089_v9 }
  0x34   :  { %891 = vmatprep.subr.bf16.mxu0 %v1096_v10  ;;  %931 = vmatprep.subr.bf16.mxu1 %v1096_v10 }
  0x35   :  { %247 = vmatprep.mubr.bf16.mxu0 %v995_v28  ;;  %361 = vmatprep.mubr.bf16.mxu1 %v997_v29 }
  0x37   :  { %892 = vmatpush3.bf16.msra.mxu0 %v1109_v13  ;;  %932 = vmatpush3.bf16.msra.mxu1 %v1109_v13 }
  0x38   :  { %893 = vmatprep.subr.bf16.mxu0 %v1116_v14  ;;  %933 = vmatprep.subr.bf16.mxu1 %v1116_v14 }
  0x3a   :  { %248 = vmatmul.mubr.bf16.gmra.mrb[12].mxu0 %v999_v30  ;;  %362 = vmatmul.mubr.bf16.gmra.mrb[12].mxu1 %v1000_v31 }
  0x3b   :  { %894 = vmatpush3.bf16.msra.mxu0 %v1123_v15  ;;  %934 = vmatpush3.bf16.msra.mxu1 %v1123_v15 }
  0x3c   :  { %895 = vmatprep.subr.bf16.mxu0 %v1130_v16  ;;  %935 = vmatprep.subr.bf16.mxu1 %v1130_v16 }
  0x3d   :  { %459 = vmatprep.mubr.bf16.mxu0 %v1003_v32  ;;  %581 = vmatprep.mubr.bf16.mxu1 %v1006_v33 }
  0x3f   :  { %896 = vmatpush3.bf16.msra.mxu0 %v1137_v17  ;;  %936 = vmatpush3.bf16.msra.mxu1 %v1137_v17 }
  0x42   :  { %460 = vmatmul.mubr.bf16.vlgmr.msra.gmra.mrb[16].mxu0 %v1001_v34  ;;  %582 = vmatmul.mubr.bf16.vlgmr.msra.gmra.mrb[16].mxu1 %v1004_v35 }
  0x43   :  { %467 = vmatprep.mubr.bf16.mxu0 %v1007_v36  ;;  %589 = vmatprep.mubr.bf16.mxu1 %v1009_v37 }
  0x4a   :  { %468 = vmatmul.mubr.bf16.gmra.mrb[20].mxu0 %v1011_v38  ;;  %590 = vmatmul.mubr.bf16.gmra.mrb[20].mxu1 %v1012_v39 }
  0x4b   :  { %475 = vmatprep.mubr.bf16.mxu0 %v1013_v40  ;;  %597 = vmatprep.mubr.bf16.mxu1 %v1015_v41 }
  0x52   :  { %476 = vmatmul.mubr.bf16.gmra.mrb[24].mxu0 %v1017_v42  ;;  %598 = vmatmul.mubr.bf16.gmra.mrb[24].mxu1 %v1018_v43 }
  0x53   :  { %483 = vmatprep.mubr.bf16.mxu0 %v1019_v44  ;;  %605 = vmatprep.mubr.bf16.mxu1 %v1021_v45 }
  0x5a   :  { %484 = vmatmul.mubr.bf16.gmra.mrb[28].mxu0 %v1023_v46  ;;  %606 = vmatmul.mubr.bf16.gmra.mrb[28].mxu1 %v1024_v47 }
  0xf5   :  { %v817_v48 = vpop.f32.mrb[0].mxu0  ;;  %v857_v49 = vpop.f32.mrb[0].mxu1 }
  0xf6   :  { %v818_v50 = vpop.f32.mrb[1].mxu0  ;;  %v858_v51 = vpop.f32.mrb[1].mxu1 }
  0xf7   :  { %v1255_v52 = vadd.f32 %v818_v50, %v817_v48  ;;  %v1257_v53 = vadd.f32 %v858_v51, %v857_v49  ;;  %v820_v54 = vpop.f32.mrb[2].mxu0  ;;  %v860_v55 = vpop.f32.mrb[2].mxu1 }
  0xf8   :  { %v821_v56 = vpop.f32.mrb[3].mxu0  ;;  %v861_v57 = vpop.f32.mrb[3].mxu1 }
  0xf9   :  { %v370_v58 = vmax.f32 %v1255_v52, %v1257_v53  ;;  %v822_v59 = vadd.f32 %v821_v56, %v820_v54  ;;  %v862_v60 = vadd.f32 %v861_v57, %v860_v55  ;;  %v1300_v53 = vld [vmem:[%s1342_s2] ss:$0 sm:$0xff] }
  0xfb   :  { %v371_v61 = vmax.f32 %v822_v59, %v862_v60 }
  0xfd   :  { %v823_v62 = vpop.f32.mrb[4].mxu0  ;;  %v863_v63 = vpop.f32.mrb[4].mxu1 }
  0xfe   :  { %v824_v0 = vpop.f32.mrb[5].mxu0  ;;  %v864_v1 = vpop.f32.mrb[5].mxu1 }
  0xff   :  { %v1261_v2 = vadd.f32 %v824_v0, %v823_v62  ;;  %v1263_v3 = vadd.f32 %v864_v1, %v863_v63  ;;  %v826_v4 = vpop.f32.mrb[6].mxu0  ;;  %v866_v5 = vpop.f32.mrb[6].mxu1 }
 0x100   :  { %v827_v6 = vpop.f32.mrb[7].mxu0  ;;  %v867_v7 = vpop.f32.mrb[7].mxu1 }
 0x101   :  { %v372_v8 = vmax.f32 %v1261_v2, %v1263_v3  ;;  %v1267_v9 = vadd.f32 %v827_v6, %v826_v4  ;;  %v1269_v10 = vadd.f32 %v867_v7, %v866_v5 }
 0x103   :  { %v373_v11 = vmax.f32 %v1267_v9, %v1269_v10 }
 0x105   :  { %v829_v12 = vpop.f32.mrb[8].mxu0  ;;  %v869_v13 = vpop.f32.mrb[8].mxu1 }
 0x106   :  { %v830_v14 = vpop.f32.mrb[9].mxu0  ;;  %v870_v15 = vpop.f32.mrb[9].mxu1 }
 0x107   :  { %v1273_v16 = vadd.f32 %v830_v14, %v829_v12  ;;  %v1275_v17 = vadd.f32 %v870_v15, %v869_v13  ;;  %v832_v18 = vpop.f32.mrb[10].mxu0  ;;  %v872_v19 = vpop.f32.mrb[10].mxu1 }
 0x108   :  { %v833_v20 = vpop.f32.mrb[11].mxu0  ;;  %v873_v21 = vpop.f32.mrb[11].mxu1 }
 0x109   :  { %v374_v22 = vmax.f32 %v1273_v16, %v1275_v17  ;;  %v1279_v23 = vadd.f32 %v833_v20, %v832_v18  ;;  %v1281_v24 = vadd.f32 %v873_v21, %v872_v19 }
 0x10b   :  { %v375_v25 = vmax.f32 %v1279_v23, %v1281_v24 }
 0x10d   :  { %v835_v26 = vpop.f32.mrb[12].mxu0  ;;  %v875_v27 = vpop.f32.mrb[12].mxu1 }
 0x10e   :  { %v836_v28 = vpop.f32.mrb[13].mxu0  ;;  %v876_v29 = vpop.f32.mrb[13].mxu1 }
 0x10f   :  { %v1285_v30 = vadd.f32 %v836_v28, %v835_v26  ;;  %v1287_v31 = vadd.f32 %v876_v29, %v875_v27  ;;  %v838_v32 = vpop.f32.mrb[14].mxu0  ;;  %v878_v33 = vpop.f32.mrb[14].mxu1 }
 0x110   :  { %v839_v34 = vpop.f32.mrb[15].mxu0  ;;  %v879_v35 = vpop.f32.mrb[15].mxu1 }
 0x111   :  { %v376_v36 = vmax.f32 %v1285_v30, %v1287_v31  ;;  %v1291_v37 = vadd.f32 %v839_v34, %v838_v32  ;;  %v1293_v38 = vadd.f32 %v879_v35, %v878_v33 }
 0x113   :  { %v377_v39 = vmax.f32 %v1291_v37, %v1293_v38 }
 0x115   :  { %v897_v40 = vpop.f32.mrb[16].mxu0  ;;  %v937_v41 = vpop.f32.mrb[16].mxu1 }
 0x116   :  { %v898_v42 = vpop.f32.mrb[17].mxu0  ;;  %v938_v43 = vpop.f32.mrb[17].mxu1 }
 0x117   :  { %v899_v44 = vadd.f32 %v898_v42, %v897_v40  ;;  %v939_v45 = vadd.f32 %v938_v43, %v937_v41  ;;  %v900_v46 = vpop.f32.mrb[18].mxu0  ;;  %v940_v47 = vpop.f32.mrb[18].mxu1 }
 0x118   :  { %v901_v48 = vpop.f32.mrb[19].mxu0  ;;  %v941_v49 = vpop.f32.mrb[19].mxu1 }
 0x119   :  { %v492_v50 = vmax.f32 %v370_v58, %v899_v44  ;;  %v902_v51 = vadd.f32 %v901_v48, %v900_v46  ;;  %v942_v52 = vadd.f32 %v941_v49, %v940_v47 }
 0x11b   :  { %v614_v54 = vmax.f32 %v492_v50, %v939_v45  ;;  %v493_v55 = vmax.f32 %v371_v61, %v902_v51 }
 0x11d   :  { %v629_v56 = vadd.f32 %v1300_v53, %v614_v54  ;;  %v615_v57 = vmax.f32 %v493_v55, %v942_v52  ;;  %v903_v59 = vpop.f32.mrb[20].mxu0  ;;  %v943_v60 = vpop.f32.mrb[20].mxu1 }
 0x11e   :  { %v904_v62 = vpop.f32.mrb[21].mxu0  ;;  %v944_v63 = vpop.f32.mrb[21].mxu1 }
 0x11f   :  { %v630_v0 = vadd.f32 %v1300_v53, %v615_v57  ;;  %v905_v1 = vadd.f32 %v904_v62, %v903_v59  ;;  %v945_v58 = vadd.f32 %v944_v63, %v943_v60  ;;  %v906_v4 = vpop.f32.mrb[22].mxu0  ;;  %v946_v5 = vpop.f32.mrb[22].mxu1  ;;  %v637_v6 = vmax.f32 %v629_v56, 0.0 }
 0x120   :  { %v907_v7 = vpop.f32.mrb[23].mxu0  ;;  %v947_v12 = vpop.f32.mrb[23].mxu1 }
 0x121   :  { %v638_v13 = vmax.f32 %v630_v0, 0.0  ;;  %v494_v61 = vmax.f32 %v372_v8, %v905_v1  ;;  %v908_v14 = vadd.f32 %v907_v7, %v906_v4  ;;  %v948_v15 = vadd.f32 %v947_v12, %v946_v5 }
 0x123   :  { %v781_v18 = vpack.c.bf16 %v638_v13, %v637_v6  ;;  %v616_v19 = vmax.f32 %v494_v61, %v945_v58  ;;  %v495_v20 = vmax.f32 %v373_v11, %v908_v14 }
 0x125   :  { %782 = vst [vmem:[%s1343_s3] sm:$0xff] %v781_v18   ;;  %v631_v21 = vadd.f32 %v1300_v53, %v616_v19  ;;  %v617_v26 = vmax.f32 %v495_v20, %v948_v15  ;;  %v909_v27 = vpop.f32.mrb[24].mxu0  ;;  %v949_v28 = vpop.f32.mrb[24].mxu1 }
 0x126   :  { %v910_v29 = vpop.f32.mrb[25].mxu0  ;;  %v950_v2 = vpop.f32.mrb[25].mxu1 }
 0x127   :  { %v632_v3 = vadd.f32 %v1300_v53, %v617_v26  ;;  %v911_v8 = vadd.f32 %v910_v29, %v909_v27  ;;  %v951_v32 = vadd.f32 %v950_v2, %v949_v28  ;;  %v912_v33 = vpop.f32.mrb[26].mxu0  ;;  %v952_v34 = vpop.f32.mrb[26].mxu1  ;;  %v639_v35 = vmax.f32 %v631_v21, 0.0 }
 0x128   :  { %v913_v9 = vpop.f32.mrb[27].mxu0  ;;  %v953_v10 = vpop.f32.mrb[27].mxu1 }
 0x129   :  { %v640_v11 = vmax.f32 %v632_v3, 0.0  ;;  %v496_v40 = vmax.f32 %v374_v22, %v911_v8  ;;  %v914_v41 = vadd.f32 %v913_v9, %v912_v33  ;;  %v954_v42 = vadd.f32 %v953_v10, %v952_v34 }
 0x12b   :  { %v786_v43 = vpack.c.bf16 %v640_v11, %v639_v35  ;;  %v618_v44 = vmax.f32 %v496_v40, %v951_v32  ;;  %v497_v45 = vmax.f32 %v375_v25, %v914_v41 }
 0x12d   :  { %798 = vst [vmem:[%s1343_s3 + $0x8] sm:$0xff] %v786_v43   ;;  %v633_v46 = vadd.f32 %v1300_v53, %v618_v44  ;;  %v619_v47 = vmax.f32 %v497_v45, %v954_v42  ;;  %v915_v48 = vpop.f32.mrb[28].mxu0  ;;  %v955_v49 = vpop.f32.mrb[28].mxu1 }
 0x12e   :  { %v916_v50 = vpop.f32.mrb[29].mxu0  ;;  %v956_v16 = vpop.f32.mrb[29].mxu1 }
 0x12f   :  { %v634_v17 = vadd.f32 %v1300_v53, %v619_v47  ;;  %v917_v22 = vadd.f32 %v916_v50, %v915_v48  ;;  %v957_v51 = vadd.f32 %v956_v16, %v955_v49  ;;  %v918_v52 = vpop.f32.mrb[30].mxu0  ;;  %v958_v54 = vpop.f32.mrb[30].mxu1  ;;  %v641_v55 = vmax.f32 %v633_v46, 0.0 }
 0x130   :  { %v919_v23 = vpop.f32.mrb[31].mxu0  ;;  %v959_v24 = vpop.f32.mrb[31].mxu1 }
 0x131   :  { %v642_v25 = vmax.f32 %v634_v17, 0.0  ;;  %v498_v56 = vmax.f32 %v376_v36, %v917_v22  ;;  %v920_v57 = vadd.f32 %v919_v23, %v918_v52  ;;  %v960_v59 = vadd.f32 %v959_v24, %v958_v54 }
 0x133   :  { %v791_v60 = vpack.c.bf16 %v642_v25, %v641_v55  ;;  %v620_v62 = vmax.f32 %v498_v56, %v957_v51  ;;  %v499_v63 = vmax.f32 %v377_v39, %v920_v57 }
 0x135   :  { %799 = vst [vmem:[%s1343_s3 + $0x10] sm:$0xff] %v791_v60   ;;  %v635_v0 = vadd.f32 %v1300_v53, %v620_v62  ;;  %v621_v1 = vmax.f32 %v499_v63, %v960_v59 }
 0x137   :  { %v636_v58 = vadd.f32 %v1300_v53, %v621_v1  ;;  %v643_v4 = vmax.f32 %v635_v0, 0.0 }
 0x139   :  { %v644_v30 = vmax.f32 %v636_v58, 0.0 }
 0x13b   :  { %v796_v31 = vpack.c.bf16 %v644_v30, %v643_v4 }
 0x13d   :  { %800 = vst [vmem:[%s1343_s3 + $0x18] sm:$0xff] %v796_v31  }

// kernel: autoencoder_forward.8
= control target key start
LH: loop header
LB: loop body
LE: loop exit
PB: predicated region body
PF: predicated region fallthrough
CT: control target
= control target key end

     0   :  { %v461_v1 = vmov 0.0   ;;  %vm462_vm0 = vmmov 0   ;;  %s600_s1 = inlined_call_operand.vmem [shape: bf16[256,128], index: 1, kind: input, shape index: {}]   ;;  %s601_s0 = inlined_call_operand.vmem [shape: bf16[16,256], index: 0, kind: input, shape index: {}]   ;;  %s602_s3 = inlined_call_operand.vmem [shape: bf16[128,128], index: 3, kind: input, shape index: {}]   ;;  %s603_s2 = inlined_call_operand.vmem [shape: f32[1,128], index: 2, kind: input, shape index: {}]   ;;  %s604_s5 = inlined_call_operand.vmem [shape: f32[16,128], index: 5, kind: output, shape index: {0}]   ;;  %s605_s4 = inlined_call_operand.vmem [shape: f32[1,128], index: 4, kind: input, shape index: {}]   ;;  %s606_s6 = inlined_call_operand.vmem [shape: bf16[16,128], index: 6, kind: output, shape index: {1}]  }
   0x1   :  { %v434_v0 = vld [vmem:[%s600_s1 + $0x40] sm:$0xff]   ;;  %412 = vmatprep.subr.bf16.mxu1 %v461_v1  ;;  %v436_v3 = vld [vmem:[%s600_s1 + $0x48] sm:$0xff]   ;;  %v438_v5 = vld [vmem:[%s600_s1 + $0x50] sm:$0xff]   ;;  %428 = vmatprep.mubr.msk.bf16.mxu1 %vm462_vm0, %v461_v1 }
   0x2   :  { %v435_v2 = vld [vmem:[%s600_s1] sm:$0xff]   ;;  %381 = vmatprep.subr.bf16.mxu0 %v434_v0  ;;  %v437_v4 = vld [vmem:[%s600_s1 + $0x8] sm:$0xff]   ;;  %v439_v6 = vld [vmem:[%s600_s1 + $0x10] sm:$0xff]  }
   0x3   :  { %382 = vmatpush3.bf16.msra.mxu0 %v435_v2  ;;  %v440_v7 = vld [vmem:[%s600_s1 + $0x58] sm:$0xff]   ;;  %v442_v9 = vld [vmem:[%s600_s1 + $0x60] sm:$0xff]   ;;  %v444_v11 = vld [vmem:[%s600_s1 + $0x68] sm:$0xff]  }
   0x4   :  { %383 = vmatprep.subr.bf16.mxu0 %v436_v3  ;;  %v441_v8 = vld [vmem:[%s600_s1 + $0x18] sm:$0xff]   ;;  %v443_v10 = vld [vmem:[%s600_s1 + $0x20] sm:$0xff]   ;;  %v445_v12 = vld [vmem:[%s600_s1 + $0x28] sm:$0xff]  }
   0x5   :  { %v452_v13 = vld [vmem:[%s601_s0 + $0x4] ss:$8 sps:$4 sm:$0xff]   ;;  %v446_v15 = vld [vmem:[%s600_s1 + $0x70] sm:$0xff]   ;;  %v448_v18 = vld [vmem:[%s600_s1 + $0x78] sm:$0xff]  }
   0x6   :  { %v453_v14 = vld [vmem:[%s602_s3] sm:$0xff]   ;;  %202 = vmatprep.mubr.bf16.mxu0 %v452_v13  ;;  %v454_v16 = vld [vmem:[%s602_s3 + $0x8] sm:$0xff]   ;;  %v447_v17 = vld [vmem:[%s600_s1 + $0x30] sm:$0xff]  }
   0x7   :  { %384 = vmatpush3.bf16.msra.mxu0 %v437_v4  ;;  %413 = vmatpush3.bf16.msra.mxu1 %v453_v14  ;;  %v455_v19 = vld [vmem:[%s602_s3 + $0x10] sm:$0xff]   ;;  %v449_v20 = vld [vmem:[%s600_s1 + $0x38] sm:$0xff]   ;;  %v450_v22 = vld [vmem:[%s601_s0] ss:$8 sps:$4 sm:$0xff]  }
   0x8   :  { %385 = vmatprep.subr.bf16.mxu0 %v438_v5  ;;  %414 = vmatprep.subr.bf16.mxu1 %v461_v1  ;;  %v456_v21 = vld [vmem:[%s602_s3 + $0x18] sm:$0xff]   ;;  %v457_v23 = vld [vmem:[%s602_s3 + $0x20] sm:$0xff]   ;;  %v458_v24 = vld [vmem:[%s602_s3 + $0x28] sm:$0xff]  }
   0x9   :  { %v459_v25 = vld [vmem:[%s602_s3 + $0x30] sm:$0xff]   ;;  %v460_v26 = vld [vmem:[%s602_s3 + $0x38] sm:$0xff]   ;;  %v344_v28 = vld [vmem:[%s603_s2] ss:$0 sm:$0xff] }
   0xa   :  { %v363_v37 = vld [vmem:[%s605_s4] ss:$0 sm:$0xff] }
   0xb   :  { %386 = vmatpush3.bf16.msra.mxu0 %v439_v6  ;;  %415 = vmatpush3.bf16.msra.mxu1 %v454_v16 }
   0xc   :  { %387 = vmatprep.subr.bf16.mxu0 %v440_v7  ;;  %416 = vmatprep.subr.bf16.mxu1 %v461_v1 }
   0xf   :  { %388 = vmatpush3.bf16.msra.mxu0 %v441_v8  ;;  %417 = vmatpush3.bf16.msra.mxu1 %v455_v19 }
  0x10   :  { %389 = vmatprep.subr.bf16.mxu0 %v442_v9  ;;  %418 = vmatprep.subr.bf16.mxu1 %v461_v1 }
  0x13   :  { %390 = vmatpush3.bf16.msra.mxu0 %v443_v10  ;;  %419 = vmatpush3.bf16.msra.mxu1 %v456_v21 }
  0x14   :  { %391 = vmatprep.subr.bf16.mxu0 %v444_v11  ;;  %420 = vmatprep.subr.bf16.mxu1 %v461_v1 }
  0x17   :  { %392 = vmatpush3.bf16.msra.mxu0 %v445_v12  ;;  %421 = vmatpush3.bf16.msra.mxu1 %v457_v23 }
  0x18   :  { %393 = vmatprep.subr.bf16.mxu0 %v446_v15  ;;  %422 = vmatprep.subr.bf16.mxu1 %v461_v1 }
  0x1b   :  { %394 = vmatpush3.bf16.msra.mxu0 %v447_v17  ;;  %423 = vmatpush3.bf16.msra.mxu1 %v458_v24 }
  0x1c   :  { %395 = vmatprep.subr.bf16.mxu0 %v448_v18  ;;  %424 = vmatprep.subr.bf16.mxu1 %v461_v1 }
  0x1f   :  { %396 = vmatpush3.bf16.msra.mxu0 %v449_v20  ;;  %425 = vmatpush3.bf16.msra.mxu1 %v459_v25 }
  0x20   :  { %426 = vmatprep.subr.bf16.mxu1 %v461_v1 }
  0x22   :  { %203 = vmatmul.mubr.bf16.vlgmr.msra.gmra.mrb[0].mxu0 %v450_v22 }
  0x23   :  { %427 = vmatpush3.bf16.msra.mxu1 %v460_v26 }
  0xf5   :  { %v397_v27 = vpop.f32.mrb[0].mxu0 }
  0xf6   :  { %v398_v29 = vpop.f32.mrb[1].mxu0 }
  0xf7   :  { %v399_v30 = vadd.f32 %v398_v29, %v397_v27  ;;  %v400_v31 = vpop.f32.mrb[2].mxu0 }
  0xf8   :  { %v401_v32 = vpop.f32.mrb[3].mxu0 }
  0xf9   :  { %v205_v33 = vadd.f32 %v399_v30, %v344_v28  ;;  %v402_v34 = vadd.f32 %v401_v32, %v400_v31 }
  0xfb   :  { %211 = vst [vmem:[%s604_s5] sm:$0xff] %v205_v33  ;;  %v208_v35 = vadd.f32 %v402_v34, %v344_v28 }
  0xfd   :  { %212 = vst [vmem:[%s604_s5 + $0x8] sm:$0xff] %v208_v35  ;;  %v213_v36 = vpack.c.bf16 %v208_v35, %v205_v33 }
  0xff   :  { %429 = vmatmul.mubr.bf16.vlgmr.msra.gmra.mrb[0].mxu1 %v213_v36 }
 0x1d2   :  { %v319_v38 = vpop.f32.mrb[0].mxu1 }
 0x1d3   :  { %v430_v39 = vpop.f32.mrb[1].mxu1  ;;  %v320_v41 = vadd.f32 %v363_v37, %v319_v38 }
 0x1d4   :  { %v322_v40 = vpop.f32.mrb[2].mxu1 }
 0x1d5   :  { %v323_v42 = vadd.f32 %v363_v37, %v322_v40  ;;  %v431_v43 = vpop.f32.mrb[3].mxu1 }
 0x1d7   :  { %v379_v44 = vpack.c.bf16 %v323_v42, %v320_v41 }
 0x1d9   :  { %380 = vst [vmem:[%s606_s6] sm:$0xff] %v379_v44  }

// kernel: autoencoder_forward.9
= control target key start
LH: loop header
LB: loop body
LE: loop exit
PB: predicated region body
PF: predicated region fallthrough
CT: control target
= control target key end

     0   :  { %s422_s1 = inlined_call_operand.vmem [shape: bf16[128,128], index: 1, kind: input, shape index: {}]   ;;  %s423_s0 = inlined_call_operand.vmem [shape: bf16[1,64,128], index: 0, kind: input, shape index: {}]   ;;  %s424_s2 = inlined_call_operand.vmem [shape: f32[1,128], index: 2, kind: input, shape index: {}]   ;;  %s425_s3 = inlined_call_operand.vmem [shape: bf16[64,128], index: 3, kind: output, shape index: {}]  }
   0x1   :  { %v339_v0 = vld [vmem:[%s422_s1] sm:$0xff]   ;;  %v340_v1 = vld [vmem:[%s422_s1 + $0x8] sm:$0xff]   ;;  %v341_v2 = vld [vmem:[%s422_s1 + $0x10] sm:$0xff]  }
   0x2   :  { %299 = vmatprep.subr.bf16.mxu0 %v339_v0  ;;  %323 = vmatprep.subr.bf16.mxu1 %v339_v0  ;;  %v342_v3 = vld [vmem:[%s422_s1 + $0x18] sm:$0xff]   ;;  %v347_v4 = vld [vmem:[%s423_s0] sm:$0xff]   ;;  %v348_v5 = vld [vmem:[%s423_s0 + $0x10] sm:$0xff]  }
   0x3   :  { %300 = vmatpush3.bf16.msra.mxu0 %v339_v0  ;;  %331 = vmatpush3.bf16.msra.mxu1 %v339_v0  ;;  %v343_v6 = vld [vmem:[%s422_s1 + $0x20] sm:$0xff]   ;;  %v344_v7 = vld [vmem:[%s422_s1 + $0x28] sm:$0xff]   ;;  %v345_v8 = vld [vmem:[%s422_s1 + $0x30] sm:$0xff]  }
   0x4   :  { %301 = vmatprep.subr.bf16.mxu0 %v340_v1  ;;  %324 = vmatprep.subr.bf16.mxu1 %v340_v1  ;;  %v346_v9 = vld [vmem:[%s422_s1 + $0x38] sm:$0xff]   ;;  %v349_v10 = vld [vmem:[%s423_s0 + $0x8] sm:$0xff]   ;;  %v235_v12 = vld [vmem:[%s424_s2] ss:$0 sm:$0xff] }
   0x5   :  { %315 = vmatprep.mubr.bf16.mxu0 %v347_v4  ;;  %319 = vmatprep.mubr.bf16.mxu1 %v348_v5  ;;  %v350_v11 = vld [vmem:[%s423_s0 + $0x18] sm:$0xff]  }
   0x7   :  { %302 = vmatpush3.bf16.msra.mxu0 %v340_v1  ;;  %332 = vmatpush3.bf16.msra.mxu1 %v340_v1 }
   0x8   :  { %303 = vmatprep.subr.bf16.mxu0 %v341_v2  ;;  %325 = vmatprep.subr.bf16.mxu1 %v341_v2 }
   0xb   :  { %304 = vmatpush3.bf16.msra.mxu0 %v341_v2  ;;  %333 = vmatpush3.bf16.msra.mxu1 %v341_v2 }
   0xc   :  { %305 = vmatprep.subr.bf16.mxu0 %v342_v3  ;;  %326 = vmatprep.subr.bf16.mxu1 %v342_v3 }
   0xf   :  { %306 = vmatpush3.bf16.msra.mxu0 %v342_v3  ;;  %334 = vmatpush3.bf16.msra.mxu1 %v342_v3 }
  0x10   :  { %307 = vmatprep.subr.bf16.mxu0 %v343_v6  ;;  %327 = vmatprep.subr.bf16.mxu1 %v343_v6 }
  0x13   :  { %308 = vmatpush3.bf16.msra.mxu0 %v343_v6  ;;  %335 = vmatpush3.bf16.msra.mxu1 %v343_v6 }
  0x14   :  { %309 = vmatprep.subr.bf16.mxu0 %v344_v7  ;;  %328 = vmatprep.subr.bf16.mxu1 %v344_v7 }
  0x17   :  { %310 = vmatpush3.bf16.msra.mxu0 %v344_v7  ;;  %336 = vmatpush3.bf16.msra.mxu1 %v344_v7 }
  0x18   :  { %311 = vmatprep.subr.bf16.mxu0 %v345_v8  ;;  %329 = vmatprep.subr.bf16.mxu1 %v345_v8 }
  0x1b   :  { %312 = vmatpush3.bf16.msra.mxu0 %v345_v8  ;;  %337 = vmatpush3.bf16.msra.mxu1 %v345_v8 }
  0x1c   :  { %313 = vmatprep.subr.bf16.mxu0 %v346_v9  ;;  %330 = vmatprep.subr.bf16.mxu1 %v346_v9 }
  0x1f   :  { %314 = vmatpush3.bf16.msra.mxu0 %v346_v9  ;;  %338 = vmatpush3.bf16.msra.mxu1 %v346_v9 }
  0x22   :  { %316 = vmatmul.mubr.bf16.vlgmr.msra.gmra.mrb[0].mxu0 %v349_v10  ;;  %320 = vmatmul.mubr.bf16.vlgmr.msra.gmra.mrb[0].mxu1 %v350_v11 }
  0xf5   :  { %v317_v13 = vpop.f32.mrb[0].mxu0  ;;  %v321_v14 = vpop.f32.mrb[0].mxu1 }
  0xf6   :  { %v161_v15 = vadd.f32 %v317_v13, %v235_v12  ;;  %v177_v16 = vadd.f32 %v321_v14, %v235_v12  ;;  %v152_v17 = vpop.f32.mrb[1].mxu0  ;;  %v168_v18 = vpop.f32.mrb[1].mxu1 }
  0xf7   :  { %v153_v19 = vadd.f32 %v235_v12, %v152_v17  ;;  %v169_v20 = vadd.f32 %v235_v12, %v168_v18  ;;  %v318_v21 = vpop.f32.mrb[2].mxu0  ;;  %v322_v22 = vpop.f32.mrb[2].mxu1 }
  0xf8   :  { %v164_v23 = vadd.f32 %v318_v21, %v235_v12  ;;  %v180_v24 = vadd.f32 %v322_v22, %v235_v12  ;;  %v155_v25 = vpop.f32.mrb[3].mxu0  ;;  %v171_v26 = vpop.f32.mrb[3].mxu1  ;;  %v185_v29 = vmax.f32 %v161_v15, 0.0  ;;  %v189_v30 = vmax.f32 %v177_v16, 0.0 }
  0xf9   :  { %v156_v27 = vadd.f32 %v235_v12, %v155_v25  ;;  %v172_v28 = vadd.f32 %v235_v12, %v171_v26  ;;  %v183_v33 = vmax.f32 %v153_v19, 0.0  ;;  %v187_v34 = vmax.f32 %v169_v20, 0.0 }
  0xfa   :  { %v186_v31 = vmax.f32 %v164_v23, 0.0  ;;  %v190_v32 = vmax.f32 %v180_v24, 0.0 }
  0xfb   :  { %v184_v35 = vmax.f32 %v156_v27, 0.0  ;;  %v188_v36 = vmax.f32 %v172_v28, 0.0 }
  0xfc   :  { %v272_v37 = vpack.c.bf16 %v186_v31, %v185_v29  ;;  %v282_v38 = vpack.c.bf16 %v190_v32, %v189_v30 }
  0xfd   :  { %v267_v39 = vpack.c.bf16 %v184_v35, %v183_v33  ;;  %v277_v40 = vpack.c.bf16 %v188_v36, %v187_v34 }
  0xfe   :  { %284 = vst [vmem:[%s425_s3 + $0x8] sm:$0xff] %v272_v37   ;;  %286 = vst [vmem:[%s425_s3 + $0x18] sm:$0xff] %v282_v38  }
  0xff   :  { %268 = vst [vmem:[%s425_s3] sm:$0xff] %v267_v39   ;;  %285 = vst [vmem:[%s425_s3 + $0x10] sm:$0xff] %v277_v40  }

// kernel: autoencoder_forward.10
= control target key start
LH: loop header
LB: loop body
LE: loop exit
PB: predicated region body
PF: predicated region fallthrough
CT: control target
= control target key end

     0   :  { %s1966_s12 = smov 0   ;;  %s2199_s0 = inlined_call_operand.vmem [shape: bf16[1,480,512], index: 0, kind: input, shape index: {}]   ;;  %s2200_s1 = inlined_call_operand.vmem [shape: bf16[512,128], index: 1, kind: input, shape index: {}]   ;;  %s2201_s2 = inlined_call_operand.vmem [shape: f32[1,128], index: 2, kind: input, shape index: {}]   ;;  %s2202_s3 = inlined_call_operand.vmem [shape: bf16[480,128], index: 3, kind: output, shape index: {}]  }
   0x1 LB: > { %s1343_s13 = sadd.s32 4294967295, %s1944_s12   ;;  %p1347_p0 = scmp.ge.s32.totalorder %s1944_s12, 1  ;;  %s1944_s12 = sphi %s1966_s12, %s13_s12  }
   0x2   : > { %p139_p1 = scmp.lt.s32.totalorder %s1944_s12, 3 }
   0x4   : > { %p140_p2 = pnand %p1347_p0, %p139_p1 }
   0x5   : > { %v1816_v0 = vld [vmem:[%s2200_s1 + $0x40] sm:$0xff] (!%p140_p2)   ;;  %v1820_v4 = vld [vmem:[%s2200_s1 + $0x48] sm:$0xff] (!%p140_p2)   ;;  %v1824_v8 = vld [vmem:[%s2200_s1 + $0x50] sm:$0xff] (!%p140_p2)   ;;  %s164_s19 = smul.u32 (!%p140_p2), 30, %s1343_s13 }
   0x6   : > { %143 = sbr.rel (%p140_p2) target bundleno = 377 (0x179), region = 32  ;;  %v1817_v1 = vld [vmem:[%s2200_s1 + $0xc0] sm:$0xff] (!%p140_p2)   ;;  %1596 = vmatprep.subr.bf16.mxu0 (!%p140_p2), %v1816_v0  ;;  %v1821_v5 = vld [vmem:[%s2200_s1 + $0xc8] sm:$0xff] (!%p140_p2)   ;;  %v1825_v9 = vld [vmem:[%s2200_s1 + $0xd0] sm:$0xff] (!%p140_p2)  }
   0x7   : > { %v1818_v2 = vld [vmem:[%s2200_s1] sm:$0xff] (!%p140_p2)   ;;  %1702 = vmatprep.subr.bf16.mxu1 (!%p140_p2), %v1817_v1  ;;  %v1822_v6 = vld [vmem:[%s2200_s1 + $0x8] sm:$0xff] (!%p140_p2)   ;;  %v1826_v10 = vld [vmem:[%s2200_s1 + $0x10] sm:$0xff] (!%p140_p2)   ;;  %p165_p3 = scmp.lt.s32.totalorder (!%p140_p2), %s164_s19, 59 }
   0x8   : > { %v1819_v3 = vld [vmem:[%s2200_s1 + $0x80] sm:$0xff] (!%p140_p2)   ;;  %1597 = vmatpush3.bf16.msra.mxu0 (!%p140_p2), %v1818_v2  ;;  %v1823_v7 = vld [vmem:[%s2200_s1 + $0x88] sm:$0xff] (!%p140_p2)   ;;  %v1827_v11 = vld [vmem:[%s2200_s1 + $0x90] sm:$0xff] (!%p140_p2)  }
   0x9   : > { %1703 = vmatpush3.bf16.msra.mxu1 (!%p140_p2), %v1819_v3  ;;  %1598 = vmatprep.subr.bf16.mxu0 (!%p140_p2), %v1820_v4  ;;  %v1828_v12 = vld [vmem:[%s2200_s1 + $0x58] sm:$0xff] (!%p140_p2)   ;;  %v1832_v16 = vld [vmem:[%s2200_s1 + $0x60] sm:$0xff] (!%p140_p2)   ;;  %v1836_v20 = vld [vmem:[%s2200_s1 + $0x68] sm:$0xff] (!%p140_p2)  }
   0xa   : > { %1704 = vmatprep.subr.bf16.mxu1 (!%p140_p2), %v1821_v5  ;;  %v1829_v13 = vld [vmem:[%s2200_s1 + $0xd8] sm:$0xff] (!%p140_p2)   ;;  %v1833_v17 = vld [vmem:[%s2200_s1 + $0xe0] sm:$0xff] (!%p140_p2)   ;;  %v1837_v21 = vld [vmem:[%s2200_s1 + $0xe8] sm:$0xff] (!%p140_p2)  }
   0xb   : > { %v1830_v14 = vld [vmem:[%s2200_s1 + $0x18] sm:$0xff] (!%p140_p2)   ;;  %v1834_v18 = vld [vmem:[%s2200_s1 + $0x20] sm:$0xff] (!%p140_p2)   ;;  %v1838_v22 = vld [vmem:[%s2200_s1 + $0x28] sm:$0xff] (!%p140_p2)  }
   0xc   : > { %1599 = vmatpush3.bf16.msra.mxu0 (!%p140_p2), %v1822_v6  ;;  %v1831_v15 = vld [vmem:[%s2200_s1 + $0x98] sm:$0xff] (!%p140_p2)   ;;  %v1835_v19 = vld [vmem:[%s2200_s1 + $0xa0] sm:$0xff] (!%p140_p2)   ;;  %v1839_v23 = vld [vmem:[%s2200_s1 + $0xa8] sm:$0xff] (!%p140_p2)  }
   0xd   : > { %1705 = vmatpush3.bf16.msra.mxu1 %v1823_v7  ;;  %1600 = vmatprep.subr.bf16.mxu0 %v1824_v8  ;;  %s2204_s19 = smov (!%p165_p3, %s164_s19), 59  ;;  %v1840_v24 = vld [vmem:[%s2200_s1 + $0x70] sm:$0xff]   ;;  %v1844_v28 = vld [vmem:[%s2200_s1 + $0x78] sm:$0xff]  }
   0xe   : > { %1706 = vmatprep.subr.bf16.mxu1 %v1825_v9  ;;  %v1841_v25 = vld [vmem:[%s2200_s1 + $0xf0] sm:$0xff]   ;;  %s1476_s18 = sshll.u32 %s2204_s19, 4  ;;  %v1845_v29 = vld [vmem:[%s2200_s1 + $0xf8] sm:$0xff]   ;;  %s1350_s7 = sshll.u32 %s2204_s19, 2 }
   0xf   : > { %v1842_v26 = vld [vmem:[%s2200_s1 + $0x30] sm:$0xff]   ;;  %s2072_s13 = scalar_lea.vmem %s2199_s0, %s1476_s18  ;;  %v1846_v30 = vld [vmem:[%s2200_s1 + $0x38] sm:$0xff]   ;;  %s2151_s10 = scalar_lea.vmem %s2202_s3, %s1350_s7 }
  0x10   : > { %1601 = vmatpush3.bf16.msra.mxu0 %v1826_v10  ;;  %v1843_v27 = vld [vmem:[%s2200_s1 + $0xb0] sm:$0xff]   ;;  %v1847_v31 = vld [vmem:[%s2200_s1 + $0xb8] sm:$0xff]  }
  0x11   : > { %1707 = vmatpush3.bf16.msra.mxu1 %v1827_v11  ;;  %1602 = vmatprep.subr.bf16.mxu0 %v1828_v12  ;;  %v1848_v32 = vld [vmem:[%s2072_s13] ss:$16 sps:$4 sm:$0xff]   ;;  %v1850_v33 = vld [vmem:[%s2072_s13 + $0x4] ss:$16 sps:$4 sm:$0xff]   ;;  %v1851_v34 = vld [vmem:[%s2072_s13 + $0x8] ss:$16 sps:$4 sm:$0xff]  }
  0x12   : > { %1708 = vmatprep.subr.bf16.mxu1 %v1829_v13  ;;  %v1853_v35 = vld [vmem:[%s2072_s13 + $0xc] ss:$16 sps:$4 sm:$0xff]   ;;  %833 = vmatprep.mubr.bf16.mxu0 %v1850_v33  ;;  %v1854_v36 = vld [vmem:[%s2072_s13 + $0x24] ss:$16 sps:$4 sm:$0xff]   ;;  %v1858_v38 = vld [vmem:[%s2072_s13 + $0x20] ss:$16 sps:$4 sm:$0xff]  }
  0x13   : > { %986 = vmatprep.mubr.bf16.mxu1 %v1853_v35  ;;  %v1856_v37 = vld [vmem:[%s2072_s13 + $0x2c] ss:$16 sps:$4 sm:$0xff]   ;;  %v1859_v39 = vld [vmem:[%s2072_s13 + $0x28] ss:$16 sps:$4 sm:$0xff]   ;;  %v1860_v40 = vld [vmem:[%s2072_s13 + $0x44] ss:$16 sps:$4 sm:$0xff]  }
  0x14   : > { %1603 = vmatpush3.bf16.msra.mxu0 %v1830_v14  ;;  %v1862_v41 = vld [vmem:[%s2072_s13 + $0x4c] ss:$16 sps:$4 sm:$0xff]   ;;  %v1864_v42 = vld [vmem:[%s2072_s13 + $0x40] ss:$16 sps:$4 sm:$0xff]   ;;  %v1865_v43 = vld [vmem:[%s2072_s13 + $0x48] ss:$16 sps:$4 sm:$0xff]  }
  0x15   : > { %1709 = vmatpush3.bf16.msra.mxu1 %v1831_v15  ;;  %1604 = vmatprep.subr.bf16.mxu0 %v1832_v16  ;;  %v1866_v44 = vld [vmem:[%s2072_s13 + $0x64] ss:$16 sps:$4 sm:$0xff]   ;;  %v1868_v45 = vld [vmem:[%s2072_s13 + $0x6c] ss:$16 sps:$4 sm:$0xff]   ;;  %v1870_v46 = vld [vmem:[%s2072_s13 + $0x60] ss:$16 sps:$4 sm:$0xff]  }
  0x16   : > { %1710 = vmatprep.subr.bf16.mxu1 %v1833_v17  ;;  %v1871_v47 = vld [vmem:[%s2072_s13 + $0x68] ss:$16 sps:$4 sm:$0xff]   ;;  %v1872_v48 = vld [vmem:[%s2072_s13 + $0x84] ss:$16 sps:$4 sm:$0xff]   ;;  %v1874_v49 = vld [vmem:[%s2072_s13 + $0x8c] ss:$16 sps:$4 sm:$0xff]  }
  0x17   : > { %v1876_v50 = vld [vmem:[%s2072_s13 + $0x80] ss:$16 sps:$4 sm:$0xff]   ;;  %v1877_v51 = vld [vmem:[%s2072_s13 + $0x88] ss:$16 sps:$4 sm:$0xff]   ;;  %v1878_v52 = vld [vmem:[%s2072_s13 + $0xa4] ss:$16 sps:$4 sm:$0xff]  }
  0x18   : > { %1605 = vmatpush3.bf16.msra.mxu0 %v1834_v18  ;;  %v1880_v53 = vld [vmem:[%s2072_s13 + $0xac] ss:$16 sps:$4 sm:$0xff]   ;;  %v1882_v54 = vld [vmem:[%s2072_s13 + $0xa0] ss:$16 sps:$4 sm:$0xff]   ;;  %v1883_v55 = vld [vmem:[%s2072_s13 + $0xa8] ss:$16 sps:$4 sm:$0xff]  }
  0x19   : > { %1711 = vmatpush3.bf16.msra.mxu1 %v1835_v19  ;;  %1606 = vmatprep.subr.bf16.mxu0 %v1836_v20  ;;  %v1884_v56 = vld [vmem:[%s2072_s13 + $0xc4] ss:$16 sps:$4 sm:$0xff]   ;;  %v1886_v57 = vld [vmem:[%s2072_s13 + $0xcc] ss:$16 sps:$4 sm:$0xff]   ;;  %v1888_v58 = vld [vmem:[%s2072_s13 + $0xc0] ss:$16 sps:$4 sm:$0xff]  }
  0x1a   : > { %1712 = vmatprep.subr.bf16.mxu1 %v1837_v21  ;;  %v1889_v59 = vld [vmem:[%s2072_s13 + $0xc8] ss:$16 sps:$4 sm:$0xff]   ;;  %v1890_v60 = vld [vmem:[%s2072_s13 + $0xe4] ss:$16 sps:$4 sm:$0xff]   ;;  %v1892_v61 = vld [vmem:[%s2072_s13 + $0xec] ss:$16 sps:$4 sm:$0xff]  }
  0x1b   : > { %v1894_v62 = vld [vmem:[%s2072_s13 + $0xe0] ss:$16 sps:$4 sm:$0xff]   ;;  %v1895_v63 = vld [vmem:[%s2072_s13 + $0xe8] ss:$16 sps:$4 sm:$0xff]   ;;  %v1896_v0 = vld [vmem:[%s2072_s13 + $0x104] ss:$16 sps:$4 sm:$0xff]  }
  0x1c   : > { %1607 = vmatpush3.bf16.msra.mxu0 %v1838_v22  ;;  %v1898_v1 = vld [vmem:[%s2072_s13 + $0x10c] ss:$16 sps:$4 sm:$0xff]   ;;  %v1900_v2 = vld [vmem:[%s2072_s13 + $0x100] ss:$16 sps:$4 sm:$0xff]   ;;  %v1901_v3 = vld [vmem:[%s2072_s13 + $0x108] ss:$16 sps:$4 sm:$0xff]  }
  0x1d   : > { %1713 = vmatpush3.bf16.msra.mxu1 %v1839_v23  ;;  %1608 = vmatprep.subr.bf16.mxu0 %v1840_v24  ;;  %v1902_v4 = vld [vmem:[%s2072_s13 + $0x124] ss:$16 sps:$4 sm:$0xff]   ;;  %v1904_v5 = vld [vmem:[%s2072_s13 + $0x12c] ss:$16 sps:$4 sm:$0xff]   ;;  %v1906_v6 = vld [vmem:[%s2072_s13 + $0x120] ss:$16 sps:$4 sm:$0xff]  }
  0x1e   : > { %1714 = vmatprep.subr.bf16.mxu1 %v1841_v25  ;;  %v1907_v7 = vld [vmem:[%s2072_s13 + $0x128] ss:$16 sps:$4 sm:$0xff]   ;;  %v1908_v8 = vld [vmem:[%s2072_s13 + $0x144] ss:$16 sps:$4 sm:$0xff]   ;;  %v1910_v9 = vld [vmem:[%s2072_s13 + $0x14c] ss:$16 sps:$4 sm:$0xff]  }
  0x1f   : > { %v1912_v10 = vld [vmem:[%s2072_s13 + $0x140] ss:$16 sps:$4 sm:$0xff]   ;;  %v1913_v11 = vld [vmem:[%s2072_s13 + $0x148] ss:$16 sps:$4 sm:$0xff]   ;;  %v1914_v12 = vld [vmem:[%s2072_s13 + $0x164] ss:$16 sps:$4 sm:$0xff]  }
  0x20   : > { %1609 = vmatpush3.bf16.msra.mxu0 %v1842_v26  ;;  %v1916_v13 = vld [vmem:[%s2072_s13 + $0x16c] ss:$16 sps:$4 sm:$0xff]   ;;  %v1918_v14 = vld [vmem:[%s2072_s13 + $0x160] ss:$16 sps:$4 sm:$0xff]   ;;  %v1919_v15 = vld [vmem:[%s2072_s13 + $0x168] ss:$16 sps:$4 sm:$0xff]  }
  0x21   : > { %1715 = vmatpush3.bf16.msra.mxu1 %v1843_v27  ;;  %1610 = vmatprep.subr.bf16.mxu0 %v1844_v28  ;;  %v1920_v16 = vld [vmem:[%s2072_s13 + $0x184] ss:$16 sps:$4 sm:$0xff]   ;;  %v1922_v17 = vld [vmem:[%s2072_s13 + $0x18c] ss:$16 sps:$4 sm:$0xff]   ;;  %v1924_v18 = vld [vmem:[%s2072_s13 + $0x180] ss:$16 sps:$4 sm:$0xff]  }
  0x22   : > { %1716 = vmatprep.subr.bf16.mxu1 %v1845_v29  ;;  %v1925_v19 = vld [vmem:[%s2072_s13 + $0x188] ss:$16 sps:$4 sm:$0xff]   ;;  %v1926_v20 = vld [vmem:[%s2072_s13 + $0x1a4] ss:$16 sps:$4 sm:$0xff]   ;;  %v1928_v21 = vld [vmem:[%s2072_s13 + $0x1ac] ss:$16 sps:$4 sm:$0xff]  }
  0x23   : > { %v1930_v22 = vld [vmem:[%s2072_s13 + $0x1a0] ss:$16 sps:$4 sm:$0xff]   ;;  %v1931_v23 = vld [vmem:[%s2072_s13 + $0x1a8] ss:$16 sps:$4 sm:$0xff]   ;;  %v1932_v24 = vld [vmem:[%s2072_s13 + $0x1c4] ss:$16 sps:$4 sm:$0xff]  }
  0x24   : > { %1611 = vmatpush3.bf16.msra.mxu0 %v1846_v30  ;;  %v1934_v25 = vld [vmem:[%s2072_s13 + $0x1cc] ss:$16 sps:$4 sm:$0xff]   ;;  %v1936_v26 = vld [vmem:[%s2072_s13 + $0x1c0] ss:$16 sps:$4 sm:$0xff]   ;;  %v1937_v27 = vld [vmem:[%s2072_s13 + $0x1c8] ss:$16 sps:$4 sm:$0xff]  }
  0x25   : > { %1717 = vmatpush3.bf16.msra.mxu1 %v1847_v31  ;;  %v2143_v30 = vld [vmem:[%s2201_s2] ss:$0 sm:$0xff] }
  0x27   : > { %834 = vmatmul.mubr.bf16.vlgmr.msra.gmra.mrb[0].mxu0 %v1848_v32 }
  0x28   : > { %987 = vmatmul.mubr.bf16.vlgmr.msra.gmra.mrb[0].mxu1 %v1851_v34  ;;  %841 = vmatprep.mubr.bf16.mxu0 %v1854_v36 }
  0x29   : > { %994 = vmatprep.mubr.bf16.mxu1 %v1856_v37 }
  0x2f   : > { %842 = vmatmul.mubr.bf16.gmra.mrb[4].mxu0 %v1858_v38 }
  0x30   : > { %995 = vmatmul.mubr.bf16.gmra.mrb[4].mxu1 %v1859_v39  ;;  %849 = vmatprep.mubr.bf16.mxu0 %v1860_v40 }
  0x31   : > { %1002 = vmatprep.mubr.bf16.mxu1 %v1862_v41 }
  0x37   : > { %850 = vmatmul.mubr.bf16.gmra.mrb[8].mxu0 %v1864_v42 }
  0x38   : > { %1003 = vmatmul.mubr.bf16.gmra.mrb[8].mxu1 %v1865_v43  ;;  %857 = vmatprep.mubr.bf16.mxu0 %v1866_v44 }
  0x39   : > { %1010 = vmatprep.mubr.bf16.mxu1 %v1868_v45 }
  0x3f   : > { %858 = vmatmul.mubr.bf16.gmra.mrb[12].mxu0 %v1870_v46 }
  0x40   : > { %1011 = vmatmul.mubr.bf16.gmra.mrb[12].mxu1 %v1871_v47  ;;  %865 = vmatprep.mubr.bf16.mxu0 %v1872_v48 }
  0x41   : > { %1018 = vmatprep.mubr.bf16.mxu1 %v1874_v49 }
  0x47   : > { %866 = vmatmul.mubr.bf16.gmra.mrb[16].mxu0 %v1876_v50 }
  0x48   : > { %1019 = vmatmul.mubr.bf16.gmra.mrb[16].mxu1 %v1877_v51  ;;  %873 = vmatprep.mubr.bf16.mxu0 %v1878_v52 }
  0x49   : > { %1026 = vmatprep.mubr.bf16.mxu1 %v1880_v53 }
  0x4f   : > { %874 = vmatmul.mubr.bf16.gmra.mrb[20].mxu0 %v1882_v54 }
  0x50   : > { %1027 = vmatmul.mubr.bf16.gmra.mrb[20].mxu1 %v1883_v55  ;;  %881 = vmatprep.mubr.bf16.mxu0 %v1884_v56 }
  0x51   : > { %1034 = vmatprep.mubr.bf16.mxu1 %v1886_v57 }
  0x57   : > { %882 = vmatmul.mubr.bf16.gmra.mrb[24].mxu0 %v1888_v58 }
  0x58   : > { %1035 = vmatmul.mubr.bf16.gmra.mrb[24].mxu1 %v1889_v59  ;;  %889 = vmatprep.mubr.bf16.mxu0 %v1890_v60 }
  0x59   : > { %1042 = vmatprep.mubr.bf16.mxu1 %v1892_v61 }
  0x5f   : > { %890 = vmatmul.mubr.bf16.gmra.mrb[28].mxu0 %v1894_v62 }
  0x60   : > { %1043 = vmatmul.mubr.bf16.gmra.mrb[28].mxu1 %v1895_v63  ;;  %897 = vmatprep.mubr.bf16.mxu0 %v1896_v0 }
  0x61   : > { %1050 = vmatprep.mubr.bf16.mxu1 %v1898_v1 }
  0x67   : > { %898 = vmatmul.mubr.bf16.gmra.mrb[32].mxu0 %v1900_v2 }
  0x68   : > { %1051 = vmatmul.mubr.bf16.gmra.mrb[32].mxu1 %v1901_v3  ;;  %905 = vmatprep.mubr.bf16.mxu0 %v1902_v4 }
  0x69   : > { %1058 = vmatprep.mubr.bf16.mxu1 %v1904_v5 }
  0x6f   : > { %906 = vmatmul.mubr.bf16.gmra.mrb[36].mxu0 %v1906_v6 }
  0x70   : > { %1059 = vmatmul.mubr.bf16.gmra.mrb[36].mxu1 %v1907_v7  ;;  %913 = vmatprep.mubr.bf16.mxu0 %v1908_v8 }
  0x71   : > { %1066 = vmatprep.mubr.bf16.mxu1 %v1910_v9 }
  0x77   : > { %914 = vmatmul.mubr.bf16.gmra.mrb[40].mxu0 %v1912_v10 }
  0x78   : > { %1067 = vmatmul.mubr.bf16.gmra.mrb[40].mxu1 %v1913_v11  ;;  %921 = vmatprep.mubr.bf16.mxu0 %v1914_v12 }
  0x79   : > { %1074 = vmatprep.mubr.bf16.mxu1 %v1916_v13 }
  0x7f   : > { %922 = vmatmul.mubr.bf16.gmra.mrb[44].mxu0 %v1918_v14 }
  0x80   : > { %1075 = vmatmul.mubr.bf16.gmra.mrb[44].mxu1 %v1919_v15  ;;  %929 = vmatprep.mubr.bf16.mxu0 %v1920_v16 }
  0x81   : > { %1082 = vmatprep.mubr.bf16.mxu1 %v1922_v17 }
  0x87   : > { %930 = vmatmul.mubr.bf16.gmra.mrb[48].mxu0 %v1924_v18 }
  0x88   : > { %1083 = vmatmul.mubr.bf16.gmra.mrb[48].mxu1 %v1925_v19  ;;  %937 = vmatprep.mubr.bf16.mxu0 %v1926_v20 }
  0x89   : > { %1090 = vmatprep.mubr.bf16.mxu1 %v1928_v21 }
  0x8f   : > { %938 = vmatmul.mubr.bf16.gmra.mrb[52].mxu0 %v1930_v22 }
  0x90   : > { %1091 = vmatmul.mubr.bf16.gmra.mrb[52].mxu1 %v1931_v23  ;;  %945 = vmatprep.mubr.bf16.mxu0 %v1932_v24 }
  0x91   : > { %1098 = vmatprep.mubr.bf16.mxu1 %v1934_v25 }
  0x97   : > { %946 = vmatmul.mubr.bf16.gmra.mrb[56].mxu0 %v1936_v26 }
  0x98   : > { %1099 = vmatmul.mubr.bf16.gmra.mrb[56].mxu1 %v1937_v27 }
  0xfa   : > { %v1612_v28 = vpop.f32.mrb[0].mxu0 }
  0xfb   : > { %v1718_v29 = vpop.f32.mrb[0].mxu1  ;;  %v1613_v31 = vpop.f32.mrb[1].mxu0 }
  0xfc   : > { %v1614_v32 = vadd.f32 %v1613_v31, %v1612_v28  ;;  %v1719_v33 = vpop.f32.mrb[1].mxu1  ;;  %v1615_v34 = vpop.f32.mrb[2].mxu0 }
  0xfd   : > { %v1720_v35 = vadd.f32 %v1719_v33, %v1718_v29  ;;  %v1721_v36 = vpop.f32.mrb[2].mxu1  ;;  %v1616_v37 = vpop.f32.mrb[3].mxu0 }
  0xfe   : > { %v836_v38 = vadd.f32 %v1614_v32, %v2143_v30  ;;  %v1617_v39 = vadd.f32 %v1616_v37, %v1615_v34  ;;  %v1722_v40 = vpop.f32.mrb[3].mxu1 }
  0xff   : > { %v1723_v41 = vadd.f32 %v1722_v40, %v1721_v36 }
 0x100   : > { %v989_v42 = vadd.f32 %v1720_v35, %v836_v38  ;;  %v839_v43 = vadd.f32 %v1617_v39, %v2143_v30 }
 0x102   : > { %v992_v44 = vadd.f32 %v1723_v41, %v839_v43  ;;  %v1618_v45 = vpop.f32.mrb[4].mxu0  ;;  %v1107_v48 = vmax.f32 %v989_v42, 0.0 }
 0x103   : > { %v1724_v46 = vpop.f32.mrb[4].mxu1  ;;  %v1619_v47 = vpop.f32.mrb[5].mxu0 }
 0x104   : > { %v1108_v49 = vmax.f32 %v992_v44, 0.0  ;;  %v1620_v50 = vadd.f32 %v1619_v47, %v1618_v45  ;;  %v1725_v51 = vpop.f32.mrb[5].mxu1  ;;  %v1621_v52 = vpop.f32.mrb[6].mxu0 }
 0x105   : > { %v1726_v53 = vadd.f32 %v1725_v51, %v1724_v46  ;;  %v1727_v54 = vpop.f32.mrb[6].mxu1  ;;  %v1622_v55 = vpop.f32.mrb[7].mxu0 }
 0x106   : > { %v1510_v56 = vpack.c.bf16 %v1108_v49, %v1107_v48  ;;  %v844_v57 = vadd.f32 %v1620_v50, %v2143_v30  ;;  %v1623_v58 = vadd.f32 %v1622_v55, %v1621_v52  ;;  %v1728_v59 = vpop.f32.mrb[7].mxu1 }
 0x107   : > { %v1729_v60 = vadd.f32 %v1728_v59, %v1727_v54 }
 0x108   : > { %1511 = vst [vmem:[%s2151_s10] sm:$0xff] %v1510_v56   ;;  %v997_v61 = vadd.f32 %v1726_v53, %v844_v57  ;;  %v847_v62 = vadd.f32 %v1623_v58, %v2143_v30 }
 0x10a   : > { %v1000_v63 = vadd.f32 %v1729_v60, %v847_v62  ;;  %v1624_v0 = vpop.f32.mrb[8].mxu0  ;;  %v1109_v3 = vmax.f32 %v997_v61, 0.0 }
 0x10b   : > { %v1730_v1 = vpop.f32.mrb[8].mxu1  ;;  %v1625_v2 = vpop.f32.mrb[9].mxu0 }
 0x10c   : > { %v1110_v4 = vmax.f32 %v1000_v63, 0.0  ;;  %v1626_v5 = vadd.f32 %v1625_v2, %v1624_v0  ;;  %v1731_v6 = vpop.f32.mrb[9].mxu1  ;;  %v1627_v7 = vpop.f32.mrb[10].mxu0 }
 0x10d   : > { %v1732_v8 = vadd.f32 %v1731_v6, %v1730_v1  ;;  %v1733_v9 = vpop.f32.mrb[10].mxu1  ;;  %v1628_v10 = vpop.f32.mrb[11].mxu0 }
 0x10e   : > { %v1515_v11 = vpack.c.bf16 %v1110_v4, %v1109_v3  ;;  %v852_v12 = vadd.f32 %v1626_v5, %v2143_v30  ;;  %v1629_v13 = vadd.f32 %v1628_v10, %v1627_v7  ;;  %v1734_v14 = vpop.f32.mrb[11].mxu1 }
 0x10f   : > { %v1735_v15 = vadd.f32 %v1734_v14, %v1733_v9 }
 0x110   : > { %1582 = vst [vmem:[%s2151_s10 + $0x8] sm:$0xff] %v1515_v11   ;;  %v1005_v16 = vadd.f32 %v1732_v8, %v852_v12  ;;  %v855_v17 = vadd.f32 %v1629_v13, %v2143_v30 }
 0x112   : > { %v1008_v18 = vadd.f32 %v1735_v15, %v855_v17  ;;  %v1630_v19 = vpop.f32.mrb[12].mxu0  ;;  %v1111_v22 = vmax.f32 %v1005_v16, 0.0 }
 0x113   : > { %v1736_v20 = vpop.f32.mrb[12].mxu1  ;;  %v1631_v21 = vpop.f32.mrb[13].mxu0 }
 0x114   : > { %v1112_v23 = vmax.f32 %v1008_v18, 0.0  ;;  %v1632_v24 = vadd.f32 %v1631_v21, %v1630_v19  ;;  %v1737_v25 = vpop.f32.mrb[13].mxu1  ;;  %v1633_v26 = vpop.f32.mrb[14].mxu0 }
 0x115   : > { %v1738_v27 = vadd.f32 %v1737_v25, %v1736_v20  ;;  %v1739_v28 = vpop.f32.mrb[14].mxu1  ;;  %v1634_v29 = vpop.f32.mrb[15].mxu0 }
 0x116   : > { %v1520_v31 = vpack.c.bf16 %v1112_v23, %v1111_v22  ;;  %v860_v32 = vadd.f32 %v1632_v24, %v2143_v30  ;;  %v1635_v33 = vadd.f32 %v1634_v29, %v1633_v26  ;;  %v1740_v34 = vpop.f32.mrb[15].mxu1 }
 0x117   : > { %v1741_v35 = vadd.f32 %v1740_v34, %v1739_v28 }
 0x118   : > { %1583 = vst [vmem:[%s2151_s10 + $0x10] sm:$0xff] %v1520_v31   ;;  %v1013_v36 = vadd.f32 %v1738_v27, %v860_v32  ;;  %v863_v37 = vadd.f32 %v1635_v33, %v2143_v30 }
 0x11a   : > { %v1016_v38 = vadd.f32 %v1741_v35, %v863_v37  ;;  %v1636_v39 = vpop.f32.mrb[16].mxu0  ;;  %v1113_v42 = vmax.f32 %v1013_v36, 0.0 }
 0x11b   : > { %v1742_v40 = vpop.f32.mrb[16].mxu1  ;;  %v1637_v41 = vpop.f32.mrb[17].mxu0 }
 0x11c   : > { %v1114_v43 = vmax.f32 %v1016_v38, 0.0  ;;  %v1638_v44 = vadd.f32 %v1637_v41, %v1636_v39  ;;  %v1743_v45 = vpop.f32.mrb[17].mxu1  ;;  %v1639_v46 = vpop.f32.mrb[18].mxu0 }
 0x11d   : > { %v1744_v47 = vadd.f32 %v1743_v45, %v1742_v40  ;;  %v1745_v48 = vpop.f32.mrb[18].mxu1  ;;  %v1640_v49 = vpop.f32.mrb[19].mxu0 }
 0x11e   : > { %v1525_v50 = vpack.c.bf16 %v1114_v43, %v1113_v42  ;;  %v868_v51 = vadd.f32 %v1638_v44, %v2143_v30  ;;  %v1641_v52 = vadd.f32 %v1640_v49, %v1639_v46  ;;  %v1746_v53 = vpop.f32.mrb[19].mxu1 }
 0x11f   : > { %v1747_v54 = vadd.f32 %v1746_v53, %v1745_v48 }
 0x120   : > { %1584 = vst [vmem:[%s2151_s10 + $0x18] sm:$0xff] %v1525_v50   ;;  %v1021_v55 = vadd.f32 %v1744_v47, %v868_v51  ;;  %v871_v56 = vadd.f32 %v1641_v52, %v2143_v30 }
 0x122   : > { %v1024_v57 = vadd.f32 %v1747_v54, %v871_v56  ;;  %v1642_v58 = vpop.f32.mrb[20].mxu0  ;;  %v1115_v61 = vmax.f32 %v1021_v55, 0.0 }
 0x123   : > { %v1748_v59 = vpop.f32.mrb[20].mxu1  ;;  %v1643_v60 = vpop.f32.mrb[21].mxu0 }
 0x124   : > { %v1116_v62 = vmax.f32 %v1024_v57, 0.0  ;;  %v1644_v63 = vadd.f32 %v1643_v60, %v1642_v58  ;;  %v1749_v0 = vpop.f32.mrb[21].mxu1  ;;  %v1645_v1 = vpop.f32.mrb[22].mxu0 }
 0x125   : > { %v1750_v2 = vadd.f32 %v1749_v0, %v1748_v59  ;;  %v1751_v3 = vpop.f32.mrb[22].mxu1  ;;  %v1646_v4 = vpop.f32.mrb[23].mxu0 }
 0x126   : > { %v1530_v5 = vpack.c.bf16 %v1116_v62, %v1115_v61  ;;  %v876_v6 = vadd.f32 %v1644_v63, %v2143_v30  ;;  %v1647_v7 = vadd.f32 %v1646_v4, %v1645_v1  ;;  %v1752_v8 = vpop.f32.mrb[23].mxu1 }
 0x127   : > { %v1753_v9 = vadd.f32 %v1752_v8, %v1751_v3 }
 0x128   : > { %1585 = vst [vmem:[%s2151_s10 + $0x20] sm:$0xff] %v1530_v5   ;;  %v1029_v10 = vadd.f32 %v1750_v2, %v876_v6  ;;  %v879_v11 = vadd.f32 %v1647_v7, %v2143_v30 }
 0x12a   : > { %v1032_v12 = vadd.f32 %v1753_v9, %v879_v11  ;;  %v1648_v13 = vpop.f32.mrb[24].mxu0  ;;  %v1117_v16 = vmax.f32 %v1029_v10, 0.0 }
 0x12b   : > { %v1754_v14 = vpop.f32.mrb[24].mxu1  ;;  %v1649_v15 = vpop.f32.mrb[25].mxu0 }
 0x12c   : > { %v1118_v17 = vmax.f32 %v1032_v12, 0.0  ;;  %v1650_v18 = vadd.f32 %v1649_v15, %v1648_v13  ;;  %v1755_v19 = vpop.f32.mrb[25].mxu1  ;;  %v1651_v20 = vpop.f32.mrb[26].mxu0 }
 0x12d   : > { %v1756_v21 = vadd.f32 %v1755_v19, %v1754_v14  ;;  %v1757_v22 = vpop.f32.mrb[26].mxu1  ;;  %v1652_v23 = vpop.f32.mrb[27].mxu0 }
 0x12e   : > { %v1535_v24 = vpack.c.bf16 %v1118_v17, %v1117_v16  ;;  %v884_v25 = vadd.f32 %v1650_v18, %v2143_v30  ;;  %v1653_v26 = vadd.f32 %v1652_v23, %v1651_v20  ;;  %v1758_v27 = vpop.f32.mrb[27].mxu1 }
 0x12f   : > { %v1759_v28 = vadd.f32 %v1758_v27, %v1757_v22 }
 0x130   : > { %1586 = vst [vmem:[%s2151_s10 + $0x28] sm:$0xff] %v1535_v24   ;;  %v1037_v29 = vadd.f32 %v1756_v21, %v884_v25  ;;  %v887_v31 = vadd.f32 %v1653_v26, %v2143_v30 }
 0x132   : > { %v1040_v32 = vadd.f32 %v1759_v28, %v887_v31  ;;  %v1654_v33 = vpop.f32.mrb[28].mxu0  ;;  %v1119_v36 = vmax.f32 %v1037_v29, 0.0 }
 0x133   : > { %v1760_v34 = vpop.f32.mrb[28].mxu1  ;;  %v1655_v35 = vpop.f32.mrb[29].mxu0 }
 0x134   : > { %v1120_v37 = vmax.f32 %v1040_v32, 0.0  ;;  %v1656_v38 = vadd.f32 %v1655_v35, %v1654_v33  ;;  %v1761_v39 = vpop.f32.mrb[29].mxu1  ;;  %v1657_v40 = vpop.f32.mrb[30].mxu0 }
 0x135   : > { %v1762_v41 = vadd.f32 %v1761_v39, %v1760_v34  ;;  %v1763_v42 = vpop.f32.mrb[30].mxu1  ;;  %v1658_v43 = vpop.f32.mrb[31].mxu0 }
 0x136   : > { %v1540_v44 = vpack.c.bf16 %v1120_v37, %v1119_v36  ;;  %v892_v45 = vadd.f32 %v1656_v38, %v2143_v30  ;;  %v1659_v46 = vadd.f32 %v1658_v43, %v1657_v40  ;;  %v1764_v47 = vpop.f32.mrb[31].mxu1 }
 0x137   : > { %v1765_v48 = vadd.f32 %v1764_v47, %v1763_v42 }
 0x138   : > { %1587 = vst [vmem:[%s2151_s10 + $0x30] sm:$0xff] %v1540_v44   ;;  %v1045_v49 = vadd.f32 %v1762_v41, %v892_v45  ;;  %v895_v50 = vadd.f32 %v1659_v46, %v2143_v30 }
 0x13a   : > { %v1048_v51 = vadd.f32 %v1765_v48, %v895_v50  ;;  %v1660_v52 = vpop.f32.mrb[32].mxu0  ;;  %v1121_v55 = vmax.f32 %v1045_v49, 0.0 }
 0x13b   : > { %v1766_v53 = vpop.f32.mrb[32].mxu1  ;;  %v1661_v54 = vpop.f32.mrb[33].mxu0 }
 0x13c   : > { %v1122_v56 = vmax.f32 %v1048_v51, 0.0  ;;  %v1662_v57 = vadd.f32 %v1661_v54, %v1660_v52  ;;  %v1767_v58 = vpop.f32.mrb[33].mxu1  ;;  %v1663_v59 = vpop.f32.mrb[34].mxu0 }
 0x13d   : > { %v1768_v60 = vadd.f32 %v1767_v58, %v1766_v53  ;;  %v1769_v61 = vpop.f32.mrb[34].mxu1  ;;  %v1664_v62 = vpop.f32.mrb[35].mxu0 }
 0x13e   : > { %v1545_v63 = vpack.c.bf16 %v1122_v56, %v1121_v55  ;;  %v900_v0 = vadd.f32 %v1662_v57, %v2143_v30  ;;  %v1665_v1 = vadd.f32 %v1664_v62, %v1663_v59  ;;  %v1770_v2 = vpop.f32.mrb[35].mxu1 }
 0x13f   : > { %v1771_v3 = vadd.f32 %v1770_v2, %v1769_v61 }
 0x140   : > { %1588 = vst [vmem:[%s2151_s10 + $0x38] sm:$0xff] %v1545_v63   ;;  %v1053_v4 = vadd.f32 %v1768_v60, %v900_v0  ;;  %v903_v5 = vadd.f32 %v1665_v1, %v2143_v30 }
 0x142   : > { %v1056_v6 = vadd.f32 %v1771_v3, %v903_v5  ;;  %v1666_v7 = vpop.f32.mrb[36].mxu0  ;;  %v1123_v10 = vmax.f32 %v1053_v4, 0.0 }
 0x143   : > { %v1772_v8 = vpop.f32.mrb[36].mxu1  ;;  %v1667_v9 = vpop.f32.mrb[37].mxu0 }
 0x144   : > { %v1124_v11 = vmax.f32 %v1056_v6, 0.0  ;;  %v1668_v12 = vadd.f32 %v1667_v9, %v1666_v7  ;;  %v1773_v13 = vpop.f32.mrb[37].mxu1  ;;  %v1669_v14 = vpop.f32.mrb[38].mxu0 }
 0x145   : > { %v1774_v15 = vadd.f32 %v1773_v13, %v1772_v8  ;;  %v1775_v16 = vpop.f32.mrb[38].mxu1  ;;  %v1670_v17 = vpop.f32.mrb[39].mxu0 }
 0x146   : > { %v1550_v18 = vpack.c.bf16 %v1124_v11, %v1123_v10  ;;  %v908_v19 = vadd.f32 %v1668_v12, %v2143_v30  ;;  %v1671_v20 = vadd.f32 %v1670_v17, %v1669_v14  ;;  %v1776_v21 = vpop.f32.mrb[39].mxu1 }
 0x147   : > { %v1777_v22 = vadd.f32 %v1776_v21, %v1775_v16 }
 0x148   : > { %1589 = vst [vmem:[%s2151_s10 + $0x40] sm:$0xff] %v1550_v18   ;;  %v1061_v23 = vadd.f32 %v1774_v15, %v908_v19  ;;  %v911_v24 = vadd.f32 %v1671_v20, %v2143_v30 }
 0x14a   : > { %v1064_v25 = vadd.f32 %v1777_v22, %v911_v24  ;;  %v1672_v26 = vpop.f32.mrb[40].mxu0  ;;  %v1125_v29 = vmax.f32 %v1061_v23, 0.0 }
 0x14b   : > { %v1778_v27 = vpop.f32.mrb[40].mxu1  ;;  %v1673_v28 = vpop.f32.mrb[41].mxu0 }
 0x14c   : > { %v1126_v31 = vmax.f32 %v1064_v25, 0.0  ;;  %v1674_v32 = vadd.f32 %v1673_v28, %v1672_v26  ;;  %v1779_v33 = vpop.f32.mrb[41].mxu1  ;;  %v1675_v34 = vpop.f32.mrb[42].mxu0 }
 0x14d   : > { %v1780_v35 = vadd.f32 %v1779_v33, %v1778_v27  ;;  %v1781_v36 = vpop.f32.mrb[42].mxu1  ;;  %v1676_v37 = vpop.f32.mrb[43].mxu0 }
 0x14e   : > { %v1555_v38 = vpack.c.bf16 %v1126_v31, %v1125_v29  ;;  %v916_v39 = vadd.f32 %v1674_v32, %v2143_v30  ;;  %v1677_v40 = vadd.f32 %v1676_v37, %v1675_v34  ;;  %v1782_v41 = vpop.f32.mrb[43].mxu1 }
 0x14f   : > { %v1783_v42 = vadd.f32 %v1782_v41, %v1781_v36 }
 0x150   : > { %1590 = vst [vmem:[%s2151_s10 + $0x48] sm:$0xff] %v1555_v38   ;;  %v1069_v43 = vadd.f32 %v1780_v35, %v916_v39  ;;  %v919_v44 = vadd.f32 %v1677_v40, %v2143_v30 }
 0x152   : > { %v1072_v45 = vadd.f32 %v1783_v42, %v919_v44  ;;  %v1678_v46 = vpop.f32.mrb[44].mxu0  ;;  %v1127_v49 = vmax.f32 %v1069_v43, 0.0 }
 0x153   : > { %v1784_v47 = vpop.f32.mrb[44].mxu1  ;;  %v1679_v48 = vpop.f32.mrb[45].mxu0 }
 0x154   : > { %v1128_v50 = vmax.f32 %v1072_v45, 0.0  ;;  %v1680_v51 = vadd.f32 %v1679_v48, %v1678_v46  ;;  %v1785_v52 = vpop.f32.mrb[45].mxu1  ;;  %v1681_v53 = vpop.f32.mrb[46].mxu0 }
 0x155   : > { %v1786_v54 = vadd.f32 %v1785_v52, %v1784_v47  ;;  %v1787_v55 = vpop.f32.mrb[46].mxu1  ;;  %v1682_v56 = vpop.f32.mrb[47].mxu0 }
 0x156   : > { %v1560_v57 = vpack.c.bf16 %v1128_v50, %v1127_v49  ;;  %v924_v58 = vadd.f32 %v1680_v51, %v2143_v30  ;;  %v1683_v59 = vadd.f32 %v1682_v56, %v1681_v53  ;;  %v1788_v60 = vpop.f32.mrb[47].mxu1 }
 0x157   : > { %v1789_v61 = vadd.f32 %v1788_v60, %v1787_v55 }
 0x158   : > { %1591 = vst [vmem:[%s2151_s10 + $0x50] sm:$0xff] %v1560_v57   ;;  %v1077_v62 = vadd.f32 %v1786_v54, %v924_v58  ;;  %v927_v63 = vadd.f32 %v1683_v59, %v2143_v30 }
 0x15a   : > { %v1080_v0 = vadd.f32 %v1789_v61, %v927_v63  ;;  %v1684_v1 = vpop.f32.mrb[48].mxu0  ;;  %v1129_v4 = vmax.f32 %v1077_v62, 0.0 }
 0x15b   : > { %v1790_v2 = vpop.f32.mrb[48].mxu1  ;;  %v1685_v3 = vpop.f32.mrb[49].mxu0 }
 0x15c   : > { %v1130_v5 = vmax.f32 %v1080_v0, 0.0  ;;  %v1686_v6 = vadd.f32 %v1685_v3, %v1684_v1  ;;  %v1791_v7 = vpop.f32.mrb[49].mxu1  ;;  %v1687_v8 = vpop.f32.mrb[50].mxu0 }
 0x15d   : > { %v1792_v9 = vadd.f32 %v1791_v7, %v1790_v2  ;;  %v1793_v10 = vpop.f32.mrb[50].mxu1  ;;  %v1688_v11 = vpop.f32.mrb[51].mxu0 }
 0x15e   : > { %v1565_v12 = vpack.c.bf16 %v1130_v5, %v1129_v4  ;;  %v932_v13 = vadd.f32 %v1686_v6, %v2143_v30  ;;  %v1689_v14 = vadd.f32 %v1688_v11, %v1687_v8  ;;  %v1794_v15 = vpop.f32.mrb[51].mxu1 }
 0x15f   : > { %v1795_v16 = vadd.f32 %v1794_v15, %v1793_v10 }
 0x160   : > { %1592 = vst [vmem:[%s2151_s10 + $0x58] sm:$0xff] %v1565_v12   ;;  %v1085_v17 = vadd.f32 %v1792_v9, %v932_v13  ;;  %v935_v18 = vadd.f32 %v1689_v14, %v2143_v30 }
 0x162   : > { %v1088_v19 = vadd.f32 %v1795_v16, %v935_v18  ;;  %v1690_v20 = vpop.f32.mrb[52].mxu0  ;;  %v1131_v23 = vmax.f32 %v1085_v17, 0.0 }
 0x163   : > { %v1796_v21 = vpop.f32.mrb[52].mxu1  ;;  %v1691_v22 = vpop.f32.mrb[53].mxu0 }
 0x164   : > { %v1132_v24 = vmax.f32 %v1088_v19, 0.0  ;;  %v1692_v25 = vadd.f32 %v1691_v22, %v1690_v20  ;;  %v1797_v26 = vpop.f32.mrb[53].mxu1  ;;  %v1693_v27 = vpop.f32.mrb[54].mxu0 }
 0x165   : > { %v1798_v28 = vadd.f32 %v1797_v26, %v1796_v21  ;;  %v1799_v29 = vpop.f32.mrb[54].mxu1  ;;  %v1694_v31 = vpop.f32.mrb[55].mxu0 }
 0x166   : > { %v1570_v32 = vpack.c.bf16 %v1132_v24, %v1131_v23  ;;  %v940_v33 = vadd.f32 %v1692_v25, %v2143_v30  ;;  %v1695_v34 = vadd.f32 %v1694_v31, %v1693_v27  ;;  %v1800_v35 = vpop.f32.mrb[55].mxu1 }
 0x167   : > { %v1801_v36 = vadd.f32 %v1800_v35, %v1799_v29 }
 0x168   : > { %1593 = vst [vmem:[%s2151_s10 + $0x60] sm:$0xff] %v1570_v32   ;;  %v1093_v37 = vadd.f32 %v1798_v28, %v940_v33  ;;  %v943_v38 = vadd.f32 %v1695_v34, %v2143_v30 }
 0x16a   : > { %v1096_v39 = vadd.f32 %v1801_v36, %v943_v38  ;;  %v1696_v40 = vpop.f32.mrb[56].mxu0  ;;  %v1133_v43 = vmax.f32 %v1093_v37, 0.0 }
 0x16b   : > { %v1802_v41 = vpop.f32.mrb[56].mxu1  ;;  %v1697_v42 = vpop.f32.mrb[57].mxu0 }
 0x16c   : > { %v1134_v44 = vmax.f32 %v1096_v39, 0.0  ;;  %v1698_v45 = vadd.f32 %v1697_v42, %v1696_v40  ;;  %v1803_v46 = vpop.f32.mrb[57].mxu1  ;;  %v1699_v47 = vpop.f32.mrb[58].mxu0 }
 0x16d   : > { %v1804_v48 = vadd.f32 %v1803_v46, %v1802_v41  ;;  %v1805_v49 = vpop.f32.mrb[58].mxu1  ;;  %v1700_v50 = vpop.f32.mrb[59].mxu0 }
 0x16e   : > { %v1575_v51 = vpack.c.bf16 %v1134_v44, %v1133_v43  ;;  %v948_v52 = vadd.f32 %v1698_v45, %v2143_v30  ;;  %v1701_v53 = vadd.f32 %v1700_v50, %v1699_v47  ;;  %v1806_v54 = vpop.f32.mrb[59].mxu1 }
 0x16f   : > { %v1807_v55 = vadd.f32 %v1806_v54, %v1805_v49 }
 0x170   : > { %1594 = vst [vmem:[%s2151_s10 + $0x68] sm:$0xff] %v1575_v51   ;;  %v1101_v56 = vadd.f32 %v1804_v48, %v948_v52  ;;  %v951_v57 = vadd.f32 %v1701_v53, %v2143_v30 }
 0x172   : > { %v1104_v58 = vadd.f32 %v1807_v55, %v951_v57  ;;  %v1135_v59 = vmax.f32 %v1101_v56, 0.0 }
 0x174   : > { %v1136_v60 = vmax.f32 %v1104_v58, 0.0 }
 0x176   : > { %v1580_v61 = vpack.c.bf16 %v1136_v60, %v1135_v59 }
 0x178   : > { %1595 = vst [vmem:[%s2151_s10 + $0x70] sm:$0xff] %v1580_v61  }
 0x179 PF: > { %s13_s12 = sadd.s32 1, %s1944_s12  }
 0x17a   : > { %p10_p4 = scmp.ge.s32.totalorder %s13_s12, 4  }
 0x17c   :  { %12 = sbr.rel (!%p10_p4) target bundleno = 1 (0x1), region = 62 }

// kernel: autoencoder_forward.11
= control target key start
LH: loop header
LB: loop body
LE: loop exit
PB: predicated region body
PF: predicated region fallthrough
CT: control target
= control target key end

     0   :  { %s1202_s12 = smov 0   ;;  %s1442_s0 = inlined_call_operand.vmem [shape: bf16[1,1600,32], index: 0, kind: input, shape index: {}]   ;;  %s1443_s1 = inlined_call_operand.vmem [shape: bf16[32,128], index: 1, kind: input, shape index: {}]   ;;  %s1444_s2 = inlined_call_operand.vmem [shape: f32[1,128], index: 2, kind: input, shape index: {}]   ;;  %s1445_s3 = inlined_call_operand.vmem [shape: f32[1600,128], index: 3, kind: output, shape index: {}]  }
   0x1 LB: > { %s838_s13 = sadd.s32 4294967295, %s1178_s12   ;;  %p842_p0 = scmp.ge.s32.totalorder %s1178_s12, 1  ;;  %s1178_s12 = sphi %s1202_s12, %s13_s12  }
   0x2   : > { %p138_p1 = scmp.lt.s32.totalorder %s1178_s12, 5 }
   0x4   : > { %p139_p2 = pnand %p842_p0, %p138_p1 }
   0x5   : > { %v1045_v0 = vld [vmem:[%s1443_s1] sm:$0xff] (!%p139_p2)   ;;  %v1180_v1 = vmov (!%p139_p2), 0.0   ;;  %v1046_v2 = vld [vmem:[%s1443_s1 + $0x8] sm:$0xff] (!%p139_p2)   ;;  %s162_s18 = smul.u32 (!%p139_p2), 50, %s838_s13  ;;  %vm1181_vm0 = vmmov (!%p139_p2), 0   ;;  %vm373_vm1 = vcmask (!%p139_p2), 261120  }
   0x6   : > { %142 = sbr.rel (%p139_p2) target bundleno = 341 (0x155), region = 32  ;;  %927 = vmatprep.subr.bf16.mxu0 (!%p139_p2), %v1180_v1  ;;  %1031 = vmatprep.subr.bf16.mxu1 (!%p139_p2), %v1180_v1  ;;  %v1331_v28 = vld [vmem:[%s1444_s2] ss:$0 sm:$0xff] (!%p139_p2) }
   0x7   : > { %928 = vmatpush3.bf16.msra.mxu0 (!%p139_p2), %v1045_v0  ;;  %1033 = vmatpush3.bf16.msra.mxu1 (!%p139_p2), %v1045_v0  ;;  %p163_p3 = scmp.lt.s32.totalorder (!%p139_p2), %s162_s18, 199 }
   0x8   : > { %929 = vmatprep.subr.bf16.mxu0 (!%p139_p2), %v1180_v1  ;;  %931 = vmatprep.mubr.msk.bf16.mxu0 (!%p139_p2), %vm1181_vm0, %v1180_v1 }
   0x9   : > { %1032 = vmatprep.subr.bf16.mxu1 (!%p139_p2), %v1180_v1  ;;  %983 = vmatprep.mubr.msk.bf16.mxu1 (!%p139_p2), %vm1181_vm0, %v1180_v1 }
   0xb   : > { %930 = vmatpush3.bf16.msra.mxu0 (!%p139_p2), %v1046_v2  ;;  %1034 = vmatpush3.bf16.msra.mxu1 (!%p139_p2), %v1046_v2 }
   0xd   : > { %s1447_s18 = smov (!%p163_p3, %s162_s18), 199 }
   0xe   : > { %s843_s19 = sshll.u32 %s1447_s18, 2  ;;  %s844_s25 = sshll.u32 %s1447_s18, 3 }
   0xf   : > { %s1230_s22 = scalar_lea.vmem %s1442_s0, %s843_s19  ;;  %s1343_s28 = scalar_lea.vmem %s1445_s3, %s844_s25 }
  0x10   : > { %v1047_v3 = vld [vmem:[%s1230_s22] sm:$0xff]   ;;  %v1048_v4 = vld [vmem:[%s1230_s22 + $0x68] sm:$0xff]   ;;  %v1050_v6 = vld [vmem:[%s1230_s22 + $0x70] sm:$0xff]  }
  0x11   : > { %932 = vmatmul.mubr.msk.bf16.vlgmr.msra.gmra.mrb[0].mxu0 %vm373_vm1, %v1047_v3  ;;  %984 = vmatmul.mubr.msk.bf16.vlgmr.msra.gmra.mrb[0].mxu1 %vm373_vm1, %v1048_v4  ;;  %v1049_v5 = vld [vmem:[%s1230_s22 + $0x8] sm:$0xff]   ;;  %v1051_v7 = vld [vmem:[%s1230_s22 + $0x10] sm:$0xff]   ;;  %v1052_v8 = vld [vmem:[%s1230_s22 + $0x78] sm:$0xff]  }
  0x12   : > { %935 = vmatprep.mubr.msk.bf16.mxu0 %vm1181_vm0, %v1180_v1  ;;  %987 = vmatprep.mubr.msk.bf16.mxu1 %vm1181_vm0, %v1180_v1  ;;  %v1053_v9 = vld [vmem:[%s1230_s22 + $0x18] sm:$0xff]   ;;  %v1054_v10 = vld [vmem:[%s1230_s22 + $0x80] sm:$0xff]   ;;  %v1056_v12 = vld [vmem:[%s1230_s22 + $0x88] sm:$0xff]  }
  0x13   : > { %v1055_v11 = vld [vmem:[%s1230_s22 + $0x20] sm:$0xff]   ;;  %v1057_v13 = vld [vmem:[%s1230_s22 + $0x28] sm:$0xff]   ;;  %v1058_v14 = vld [vmem:[%s1230_s22 + $0x90] sm:$0xff]  }
  0x14   : > { %v1059_v15 = vld [vmem:[%s1230_s22 + $0x30] sm:$0xff]   ;;  %v1060_v16 = vld [vmem:[%s1230_s22 + $0x98] sm:$0xff]   ;;  %v1062_v18 = vld [vmem:[%s1230_s22 + $0xa0] sm:$0xff]  }
  0x15   : > { %v1061_v17 = vld [vmem:[%s1230_s22 + $0x38] sm:$0xff]   ;;  %v1063_v19 = vld [vmem:[%s1230_s22 + $0x40] sm:$0xff]   ;;  %v1064_v20 = vld [vmem:[%s1230_s22 + $0xa8] sm:$0xff]  }
  0x16   : > { %v1065_v21 = vld [vmem:[%s1230_s22 + $0x48] sm:$0xff]   ;;  %v1066_v22 = vld [vmem:[%s1230_s22 + $0xb0] sm:$0xff]   ;;  %v1068_v24 = vld [vmem:[%s1230_s22 + $0xb8] sm:$0xff]  }
  0x17   : > { %v1067_v23 = vld [vmem:[%s1230_s22 + $0x50] sm:$0xff]   ;;  %v1069_v25 = vld [vmem:[%s1230_s22 + $0x58] sm:$0xff]   ;;  %v1070_v26 = vld [vmem:[%s1230_s22 + $0xc0] sm:$0xff]  }
  0x18   : > { %v1071_v27 = vld [vmem:[%s1230_s22 + $0x60] sm:$0xff]  }
  0x19   : > { %936 = vmatmul.mubr.msk.bf16.gmra.mrb[4].mxu0 %vm373_vm1, %v1049_v5  ;;  %988 = vmatmul.mubr.msk.bf16.gmra.mrb[4].mxu1 %vm373_vm1, %v1050_v6 }
  0x1a   : > { %939 = vmatprep.mubr.msk.bf16.mxu0 %vm1181_vm0, %v1180_v1  ;;  %991 = vmatprep.mubr.msk.bf16.mxu1 %vm1181_vm0, %v1180_v1 }
  0x21   : > { %940 = vmatmul.mubr.msk.bf16.gmra.mrb[8].mxu0 %vm373_vm1, %v1051_v7  ;;  %992 = vmatmul.mubr.msk.bf16.gmra.mrb[8].mxu1 %vm373_vm1, %v1052_v8 }
  0x22   : > { %943 = vmatprep.mubr.msk.bf16.mxu0 %vm1181_vm0, %v1180_v1  ;;  %995 = vmatprep.mubr.msk.bf16.mxu1 %vm1181_vm0, %v1180_v1 }
  0x29   : > { %944 = vmatmul.mubr.msk.bf16.gmra.mrb[12].mxu0 %vm373_vm1, %v1053_v9  ;;  %996 = vmatmul.mubr.msk.bf16.gmra.mrb[12].mxu1 %vm373_vm1, %v1054_v10 }
  0x2a   : > { %947 = vmatprep.mubr.msk.bf16.mxu0 %vm1181_vm0, %v1180_v1  ;;  %999 = vmatprep.mubr.msk.bf16.mxu1 %vm1181_vm0, %v1180_v1 }
  0x31   : > { %948 = vmatmul.mubr.msk.bf16.gmra.mrb[16].mxu0 %vm373_vm1, %v1055_v11  ;;  %1000 = vmatmul.mubr.msk.bf16.gmra.mrb[16].mxu1 %vm373_vm1, %v1056_v12 }
  0x32   : > { %951 = vmatprep.mubr.msk.bf16.mxu0 %vm1181_vm0, %v1180_v1  ;;  %1003 = vmatprep.mubr.msk.bf16.mxu1 %vm1181_vm0, %v1180_v1 }
  0x39   : > { %952 = vmatmul.mubr.msk.bf16.gmra.mrb[20].mxu0 %vm373_vm1, %v1057_v13  ;;  %1004 = vmatmul.mubr.msk.bf16.gmra.mrb[20].mxu1 %vm373_vm1, %v1058_v14 }
  0x3a   : > { %955 = vmatprep.mubr.msk.bf16.mxu0 %vm1181_vm0, %v1180_v1  ;;  %1007 = vmatprep.mubr.msk.bf16.mxu1 %vm1181_vm0, %v1180_v1 }
  0x41   : > { %956 = vmatmul.mubr.msk.bf16.gmra.mrb[24].mxu0 %vm373_vm1, %v1059_v15  ;;  %1008 = vmatmul.mubr.msk.bf16.gmra.mrb[24].mxu1 %vm373_vm1, %v1060_v16 }
  0x42   : > { %959 = vmatprep.mubr.msk.bf16.mxu0 %vm1181_vm0, %v1180_v1  ;;  %1011 = vmatprep.mubr.msk.bf16.mxu1 %vm1181_vm0, %v1180_v1 }
  0x49   : > { %960 = vmatmul.mubr.msk.bf16.gmra.mrb[28].mxu0 %vm373_vm1, %v1061_v17  ;;  %1012 = vmatmul.mubr.msk.bf16.gmra.mrb[28].mxu1 %vm373_vm1, %v1062_v18 }
  0x4a   : > { %963 = vmatprep.mubr.msk.bf16.mxu0 %vm1181_vm0, %v1180_v1  ;;  %1015 = vmatprep.mubr.msk.bf16.mxu1 %vm1181_vm0, %v1180_v1 }
  0x51   : > { %964 = vmatmul.mubr.msk.bf16.gmra.mrb[32].mxu0 %vm373_vm1, %v1063_v19  ;;  %1016 = vmatmul.mubr.msk.bf16.gmra.mrb[32].mxu1 %vm373_vm1, %v1064_v20 }
  0x52   : > { %967 = vmatprep.mubr.msk.bf16.mxu0 %vm1181_vm0, %v1180_v1  ;;  %1019 = vmatprep.mubr.msk.bf16.mxu1 %vm1181_vm0, %v1180_v1 }
  0x59   : > { %968 = vmatmul.mubr.msk.bf16.gmra.mrb[36].mxu0 %vm373_vm1, %v1065_v21  ;;  %1020 = vmatmul.mubr.msk.bf16.gmra.mrb[36].mxu1 %vm373_vm1, %v1066_v22 }
  0x5a   : > { %971 = vmatprep.mubr.msk.bf16.mxu0 %vm1181_vm0, %v1180_v1  ;;  %1023 = vmatprep.mubr.msk.bf16.mxu1 %vm1181_vm0, %v1180_v1 }
  0x61   : > { %972 = vmatmul.mubr.msk.bf16.gmra.mrb[40].mxu0 %vm373_vm1, %v1067_v23  ;;  %1024 = vmatmul.mubr.msk.bf16.gmra.mrb[40].mxu1 %vm373_vm1, %v1068_v24 }
  0x62   : > { %975 = vmatprep.mubr.msk.bf16.mxu0 %vm1181_vm0, %v1180_v1  ;;  %1027 = vmatprep.mubr.msk.bf16.mxu1 %vm1181_vm0, %v1180_v1 }
  0x69   : > { %976 = vmatmul.mubr.msk.bf16.gmra.mrb[44].mxu0 %vm373_vm1, %v1069_v25  ;;  %1028 = vmatmul.mubr.msk.bf16.gmra.mrb[44].mxu1 %vm373_vm1, %v1070_v26 }
  0x6a   : > { %979 = vmatprep.mubr.msk.bf16.mxu0 %vm1181_vm0, %v1180_v1 }
  0x71   : > { %980 = vmatmul.mubr.msk.bf16.gmra.mrb[48].mxu0 %vm373_vm1, %v1071_v27 }
  0xe4   : > { %v483_v29 = vpop.f32.mrb[0].mxu0  ;;  %v587_v32 = vpop.f32.mrb[0].mxu1 }
  0xe5   : > { %v484_v30 = vadd.f32 %v1331_v28, %v483_v29  ;;  %v933_v31 = vpop.f32.mrb[1].mxu0  ;;  %v588_v34 = vadd.f32 %v1331_v28, %v587_v32  ;;  %v985_v35 = vpop.f32.mrb[1].mxu1 }
  0xe6   : > { %v486_v33 = vpop.f32.mrb[2].mxu0  ;;  %v590_v38 = vpop.f32.mrb[2].mxu1 }
  0xe7   : > { %1072 = vtanh.f32 %v484_v30  ;;  %v487_v36 = vadd.f32 %v1331_v28, %v486_v33  ;;  %v934_v37 = vpop.f32.mrb[3].mxu0  ;;  %v591_v39 = vadd.f32 %v1331_v28, %v590_v38  ;;  %v986_v40 = vpop.f32.mrb[3].mxu1 }
  0xe8   : > { %1074 = vtanh.f32 %v588_v34 }
  0xe9   : > { %1076 = vtanh.f32 %v487_v36 }
  0xea   : > { %1078 = vtanh.f32 %v591_v39 }
  0xec   : > { %v491_v41 = vpop.f32.mrb[4].mxu0  ;;  %v595_v44 = vpop.f32.mrb[4].mxu1 }
  0xed   : > { %v492_v42 = vadd.f32 %v1331_v28, %v491_v41  ;;  %v937_v43 = vpop.f32.mrb[5].mxu0  ;;  %v596_v46 = vadd.f32 %v1331_v28, %v595_v44  ;;  %v989_v47 = vpop.f32.mrb[5].mxu1 }
  0xee   : > { %v494_v45 = vpop.f32.mrb[6].mxu0  ;;  %v598_v50 = vpop.f32.mrb[6].mxu1 }
  0xef   : > { %1080 = vtanh.f32 %v492_v42  ;;  %v495_v48 = vadd.f32 %v1331_v28, %v494_v45  ;;  %v938_v49 = vpop.f32.mrb[7].mxu0  ;;  %v599_v51 = vadd.f32 %v1331_v28, %v598_v50  ;;  %v990_v52 = vpop.f32.mrb[7].mxu1 }
  0xf0   : > { %1082 = vtanh.f32 %v596_v46 }
  0xf1   : > { %v1073_v53 = vpop.eup %1072  ;;  %1084 = vtanh.f32 %v495_v48 }
  0xf2   : > { %v1075_v54 = vpop.eup %1074  ;;  %732 = vst [vmem:[%s1343_s28] sm:$0xff] %v1073_v53  ;;  %1086 = vtanh.f32 %v599_v51 }
  0xf3   : > { %v1077_v55 = vpop.eup %1076  ;;  %758 = vst [vmem:[%s1343_s28 + $0xd0] sm:$0xff] %v1075_v54 }
  0xf4   : > { %v1079_v56 = vpop.eup %1078  ;;  %733 = vst [vmem:[%s1343_s28 + $0x8] sm:$0xff] %v1077_v55  ;;  %v499_v57 = vpop.f32.mrb[8].mxu0 }
  0xf5   : > { %759 = vst [vmem:[%s1343_s28 + $0xd8] sm:$0xff] %v1079_v56  ;;  %v500_v58 = vadd.f32 %v1331_v28, %v499_v57  ;;  %v941_v59 = vpop.f32.mrb[9].mxu0  ;;  %v603_v60 = vpop.f32.mrb[8].mxu1 }
  0xf6   : > { %v502_v61 = vpop.f32.mrb[10].mxu0  ;;  %v604_v62 = vadd.f32 %v1331_v28, %v603_v60  ;;  %v993_v63 = vpop.f32.mrb[9].mxu1 }
  0xf7   : > { %1088 = vtanh.f32 %v500_v58  ;;  %v503_v0 = vadd.f32 %v1331_v28, %v502_v61  ;;  %v942_v1 = vpop.f32.mrb[11].mxu0  ;;  %v606_v2 = vpop.f32.mrb[10].mxu1 }
  0xf8   : > { %1090 = vtanh.f32 %v604_v62  ;;  %v607_v3 = vadd.f32 %v1331_v28, %v606_v2  ;;  %v994_v4 = vpop.f32.mrb[11].mxu1 }
  0xf9   : > { %v1081_v5 = vpop.eup %1080  ;;  %1092 = vtanh.f32 %v503_v0 }
  0xfa   : > { %v1083_v6 = vpop.eup %1082  ;;  %734 = vst [vmem:[%s1343_s28 + $0x10] sm:$0xff] %v1081_v5  ;;  %1094 = vtanh.f32 %v607_v3 }
  0xfb   : > { %v1085_v7 = vpop.eup %1084  ;;  %760 = vst [vmem:[%s1343_s28 + $0xe0] sm:$0xff] %v1083_v6 }
  0xfc   : > { %v1087_v8 = vpop.eup %1086  ;;  %735 = vst [vmem:[%s1343_s28 + $0x18] sm:$0xff] %v1085_v7  ;;  %v507_v9 = vpop.f32.mrb[12].mxu0 }
  0xfd   : > { %761 = vst [vmem:[%s1343_s28 + $0xe8] sm:$0xff] %v1087_v8  ;;  %v508_v10 = vadd.f32 %v1331_v28, %v507_v9  ;;  %v945_v11 = vpop.f32.mrb[13].mxu0  ;;  %v611_v12 = vpop.f32.mrb[12].mxu1 }
  0xfe   : > { %v510_v13 = vpop.f32.mrb[14].mxu0  ;;  %v612_v14 = vadd.f32 %v1331_v28, %v611_v12  ;;  %v997_v15 = vpop.f32.mrb[13].mxu1 }
  0xff   : > { %1096 = vtanh.f32 %v508_v10  ;;  %v511_v16 = vadd.f32 %v1331_v28, %v510_v13  ;;  %v946_v17 = vpop.f32.mrb[15].mxu0  ;;  %v614_v18 = vpop.f32.mrb[14].mxu1 }
 0x100   : > { %1098 = vtanh.f32 %v612_v14  ;;  %v615_v19 = vadd.f32 %v1331_v28, %v614_v18  ;;  %v998_v20 = vpop.f32.mrb[15].mxu1 }
 0x101   : > { %v1089_v21 = vpop.eup %1088  ;;  %1100 = vtanh.f32 %v511_v16 }
 0x102   : > { %v1091_v22 = vpop.eup %1090  ;;  %736 = vst [vmem:[%s1343_s28 + $0x20] sm:$0xff] %v1089_v21  ;;  %1102 = vtanh.f32 %v615_v19 }
 0x103   : > { %v1093_v23 = vpop.eup %1092  ;;  %762 = vst [vmem:[%s1343_s28 + $0xf0] sm:$0xff] %v1091_v22 }
 0x104   : > { %v1095_v24 = vpop.eup %1094  ;;  %737 = vst [vmem:[%s1343_s28 + $0x28] sm:$0xff] %v1093_v23  ;;  %v515_v25 = vpop.f32.mrb[16].mxu0 }
 0x105   : > { %763 = vst [vmem:[%s1343_s28 + $0xf8] sm:$0xff] %v1095_v24  ;;  %v516_v26 = vadd.f32 %v1331_v28, %v515_v25  ;;  %v949_v27 = vpop.f32.mrb[17].mxu0  ;;  %v619_v29 = vpop.f32.mrb[16].mxu1 }
 0x106   : > { %v518_v30 = vpop.f32.mrb[18].mxu0  ;;  %v620_v31 = vadd.f32 %v1331_v28, %v619_v29  ;;  %v1001_v32 = vpop.f32.mrb[17].mxu1 }
 0x107   : > { %1104 = vtanh.f32 %v516_v26  ;;  %v519_v33 = vadd.f32 %v1331_v28, %v518_v30  ;;  %v950_v34 = vpop.f32.mrb[19].mxu0  ;;  %v622_v35 = vpop.f32.mrb[18].mxu1 }
 0x108   : > { %1106 = vtanh.f32 %v620_v31  ;;  %v623_v36 = vadd.f32 %v1331_v28, %v622_v35  ;;  %v1002_v37 = vpop.f32.mrb[19].mxu1 }
 0x109   : > { %v1097_v38 = vpop.eup %1096  ;;  %1108 = vtanh.f32 %v519_v33 }
 0x10a   : > { %v1099_v39 = vpop.eup %1098  ;;  %738 = vst [vmem:[%s1343_s28 + $0x30] sm:$0xff] %v1097_v38  ;;  %1110 = vtanh.f32 %v623_v36 }
 0x10b   : > { %v1101_v40 = vpop.eup %1100  ;;  %764 = vst [vmem:[%s1343_s28 + $0x100] sm:$0xff] %v1099_v39 }
 0x10c   : > { %v1103_v41 = vpop.eup %1102  ;;  %739 = vst [vmem:[%s1343_s28 + $0x38] sm:$0xff] %v1101_v40  ;;  %v523_v42 = vpop.f32.mrb[20].mxu0 }
 0x10d   : > { %765 = vst [vmem:[%s1343_s28 + $0x108] sm:$0xff] %v1103_v41  ;;  %v524_v43 = vadd.f32 %v1331_v28, %v523_v42  ;;  %v953_v44 = vpop.f32.mrb[21].mxu0  ;;  %v627_v45 = vpop.f32.mrb[20].mxu1 }
 0x10e   : > { %v526_v46 = vpop.f32.mrb[22].mxu0  ;;  %v628_v47 = vadd.f32 %v1331_v28, %v627_v45  ;;  %v1005_v48 = vpop.f32.mrb[21].mxu1 }
 0x10f   : > { %1112 = vtanh.f32 %v524_v43  ;;  %v527_v49 = vadd.f32 %v1331_v28, %v526_v46  ;;  %v954_v50 = vpop.f32.mrb[23].mxu0  ;;  %v630_v51 = vpop.f32.mrb[22].mxu1 }
 0x110   : > { %1114 = vtanh.f32 %v628_v47  ;;  %v631_v52 = vadd.f32 %v1331_v28, %v630_v51  ;;  %v1006_v53 = vpop.f32.mrb[23].mxu1 }
 0x111   : > { %v1105_v54 = vpop.eup %1104  ;;  %1116 = vtanh.f32 %v527_v49 }
 0x112   : > { %v1107_v55 = vpop.eup %1106  ;;  %740 = vst [vmem:[%s1343_s28 + $0x40] sm:$0xff] %v1105_v54  ;;  %1118 = vtanh.f32 %v631_v52 }
 0x113   : > { %v1109_v56 = vpop.eup %1108  ;;  %766 = vst [vmem:[%s1343_s28 + $0x110] sm:$0xff] %v1107_v55 }
 0x114   : > { %v1111_v57 = vpop.eup %1110  ;;  %741 = vst [vmem:[%s1343_s28 + $0x48] sm:$0xff] %v1109_v56  ;;  %v531_v58 = vpop.f32.mrb[24].mxu0 }
 0x115   : > { %767 = vst [vmem:[%s1343_s28 + $0x118] sm:$0xff] %v1111_v57  ;;  %v532_v59 = vadd.f32 %v1331_v28, %v531_v58  ;;  %v957_v60 = vpop.f32.mrb[25].mxu0  ;;  %v635_v61 = vpop.f32.mrb[24].mxu1 }
 0x116   : > { %v534_v62 = vpop.f32.mrb[26].mxu0  ;;  %v636_v63 = vadd.f32 %v1331_v28, %v635_v61  ;;  %v1009_v0 = vpop.f32.mrb[25].mxu1 }
 0x117   : > { %1120 = vtanh.f32 %v532_v59  ;;  %v535_v1 = vadd.f32 %v1331_v28, %v534_v62  ;;  %v958_v2 = vpop.f32.mrb[27].mxu0  ;;  %v638_v3 = vpop.f32.mrb[26].mxu1 }
 0x118   : > { %1122 = vtanh.f32 %v636_v63  ;;  %v639_v4 = vadd.f32 %v1331_v28, %v638_v3  ;;  %v1010_v5 = vpop.f32.mrb[27].mxu1 }
 0x119   : > { %v1113_v6 = vpop.eup %1112  ;;  %1124 = vtanh.f32 %v535_v1 }
 0x11a   : > { %v1115_v7 = vpop.eup %1114  ;;  %742 = vst [vmem:[%s1343_s28 + $0x50] sm:$0xff] %v1113_v6  ;;  %1126 = vtanh.f32 %v639_v4 }
 0x11b   : > { %v1117_v8 = vpop.eup %1116  ;;  %768 = vst [vmem:[%s1343_s28 + $0x120] sm:$0xff] %v1115_v7 }
 0x11c   : > { %v1119_v9 = vpop.eup %1118  ;;  %743 = vst [vmem:[%s1343_s28 + $0x58] sm:$0xff] %v1117_v8  ;;  %v539_v10 = vpop.f32.mrb[28].mxu0 }
 0x11d   : > { %769 = vst [vmem:[%s1343_s28 + $0x128] sm:$0xff] %v1119_v9  ;;  %v540_v11 = vadd.f32 %v1331_v28, %v539_v10  ;;  %v961_v12 = vpop.f32.mrb[29].mxu0  ;;  %v643_v13 = vpop.f32.mrb[28].mxu1 }
 0x11e   : > { %v542_v14 = vpop.f32.mrb[30].mxu0  ;;  %v644_v15 = vadd.f32 %v1331_v28, %v643_v13  ;;  %v1013_v16 = vpop.f32.mrb[29].mxu1 }
 0x11f   : > { %1128 = vtanh.f32 %v540_v11  ;;  %v543_v17 = vadd.f32 %v1331_v28, %v542_v14  ;;  %v962_v18 = vpop.f32.mrb[31].mxu0  ;;  %v646_v19 = vpop.f32.mrb[30].mxu1 }
 0x120   : > { %1130 = vtanh.f32 %v644_v15  ;;  %v647_v20 = vadd.f32 %v1331_v28, %v646_v19  ;;  %v1014_v21 = vpop.f32.mrb[31].mxu1 }
 0x121   : > { %v1121_v22 = vpop.eup %1120  ;;  %1132 = vtanh.f32 %v543_v17 }
 0x122   : > { %v1123_v23 = vpop.eup %1122  ;;  %744 = vst [vmem:[%s1343_s28 + $0x60] sm:$0xff] %v1121_v22  ;;  %1134 = vtanh.f32 %v647_v20 }
 0x123   : > { %v1125_v24 = vpop.eup %1124  ;;  %770 = vst [vmem:[%s1343_s28 + $0x130] sm:$0xff] %v1123_v23 }
 0x124   : > { %v1127_v25 = vpop.eup %1126  ;;  %745 = vst [vmem:[%s1343_s28 + $0x68] sm:$0xff] %v1125_v24  ;;  %v547_v26 = vpop.f32.mrb[32].mxu0 }
 0x125   : > { %771 = vst [vmem:[%s1343_s28 + $0x138] sm:$0xff] %v1127_v25  ;;  %v548_v27 = vadd.f32 %v1331_v28, %v547_v26  ;;  %v965_v29 = vpop.f32.mrb[33].mxu0  ;;  %v651_v30 = vpop.f32.mrb[32].mxu1 }
 0x126   : > { %v550_v31 = vpop.f32.mrb[34].mxu0  ;;  %v652_v32 = vadd.f32 %v1331_v28, %v651_v30  ;;  %v1017_v33 = vpop.f32.mrb[33].mxu1 }
 0x127   : > { %1136 = vtanh.f32 %v548_v27  ;;  %v551_v34 = vadd.f32 %v1331_v28, %v550_v31  ;;  %v966_v35 = vpop.f32.mrb[35].mxu0  ;;  %v654_v36 = vpop.f32.mrb[34].mxu1 }
 0x128   : > { %1138 = vtanh.f32 %v652_v32  ;;  %v655_v37 = vadd.f32 %v1331_v28, %v654_v36  ;;  %v1018_v38 = vpop.f32.mrb[35].mxu1 }
 0x129   : > { %v1129_v39 = vpop.eup %1128  ;;  %1140 = vtanh.f32 %v551_v34 }
 0x12a   : > { %v1131_v40 = vpop.eup %1130  ;;  %746 = vst [vmem:[%s1343_s28 + $0x70] sm:$0xff] %v1129_v39  ;;  %1142 = vtanh.f32 %v655_v37 }
 0x12b   : > { %v1133_v41 = vpop.eup %1132  ;;  %772 = vst [vmem:[%s1343_s28 + $0x140] sm:$0xff] %v1131_v40 }
 0x12c   : > { %v1135_v42 = vpop.eup %1134  ;;  %747 = vst [vmem:[%s1343_s28 + $0x78] sm:$0xff] %v1133_v41  ;;  %v555_v43 = vpop.f32.mrb[36].mxu0 }
 0x12d   : > { %773 = vst [vmem:[%s1343_s28 + $0x148] sm:$0xff] %v1135_v42  ;;  %v556_v44 = vadd.f32 %v1331_v28, %v555_v43  ;;  %v969_v45 = vpop.f32.mrb[37].mxu0  ;;  %v659_v46 = vpop.f32.mrb[36].mxu1 }
 0x12e   : > { %v558_v47 = vpop.f32.mrb[38].mxu0  ;;  %v660_v48 = vadd.f32 %v1331_v28, %v659_v46  ;;  %v1021_v49 = vpop.f32.mrb[37].mxu1 }
 0x12f   : > { %1144 = vtanh.f32 %v556_v44  ;;  %v559_v50 = vadd.f32 %v1331_v28, %v558_v47  ;;  %v970_v51 = vpop.f32.mrb[39].mxu0  ;;  %v662_v52 = vpop.f32.mrb[38].mxu1 }
 0x130   : > { %1146 = vtanh.f32 %v660_v48  ;;  %v663_v53 = vadd.f32 %v1331_v28, %v662_v52  ;;  %v1022_v54 = vpop.f32.mrb[39].mxu1 }
 0x131   : > { %v1137_v55 = vpop.eup %1136  ;;  %1148 = vtanh.f32 %v559_v50 }
 0x132   : > { %v1139_v56 = vpop.eup %1138  ;;  %748 = vst [vmem:[%s1343_s28 + $0x80] sm:$0xff] %v1137_v55  ;;  %1150 = vtanh.f32 %v663_v53 }
 0x133   : > { %v1141_v57 = vpop.eup %1140  ;;  %774 = vst [vmem:[%s1343_s28 + $0x150] sm:$0xff] %v1139_v56 }
 0x134   : > { %v1143_v58 = vpop.eup %1142  ;;  %749 = vst [vmem:[%s1343_s28 + $0x88] sm:$0xff] %v1141_v57  ;;  %v563_v59 = vpop.f32.mrb[40].mxu0 }
 0x135   : > { %775 = vst [vmem:[%s1343_s28 + $0x158] sm:$0xff] %v1143_v58  ;;  %v564_v60 = vadd.f32 %v1331_v28, %v563_v59  ;;  %v973_v61 = vpop.f32.mrb[41].mxu0  ;;  %v667_v62 = vpop.f32.mrb[40].mxu1 }
 0x136   : > { %v566_v63 = vpop.f32.mrb[42].mxu0  ;;  %v668_v0 = vadd.f32 %v1331_v28, %v667_v62  ;;  %v1025_v1 = vpop.f32.mrb[41].mxu1 }
 0x137   : > { %1152 = vtanh.f32 %v564_v60  ;;  %v567_v2 = vadd.f32 %v1331_v28, %v566_v63  ;;  %v974_v3 = vpop.f32.mrb[43].mxu0  ;;  %v670_v4 = vpop.f32.mrb[42].mxu1 }
 0x138   : > { %1154 = vtanh.f32 %v668_v0  ;;  %v671_v5 = vadd.f32 %v1331_v28, %v670_v4  ;;  %v1026_v6 = vpop.f32.mrb[43].mxu1 }
 0x139   : > { %v1145_v7 = vpop.eup %1144  ;;  %1156 = vtanh.f32 %v567_v2 }
 0x13a   : > { %v1147_v8 = vpop.eup %1146  ;;  %750 = vst [vmem:[%s1343_s28 + $0x90] sm:$0xff] %v1145_v7  ;;  %1158 = vtanh.f32 %v671_v5 }
 0x13b   : > { %v1149_v9 = vpop.eup %1148  ;;  %776 = vst [vmem:[%s1343_s28 + $0x160] sm:$0xff] %v1147_v8 }
 0x13c   : > { %v1151_v10 = vpop.eup %1150  ;;  %751 = vst [vmem:[%s1343_s28 + $0x98] sm:$0xff] %v1149_v9  ;;  %v571_v11 = vpop.f32.mrb[44].mxu0 }
 0x13d   : > { %777 = vst [vmem:[%s1343_s28 + $0x168] sm:$0xff] %v1151_v10  ;;  %v572_v12 = vadd.f32 %v1331_v28, %v571_v11  ;;  %v977_v13 = vpop.f32.mrb[45].mxu0  ;;  %v675_v14 = vpop.f32.mrb[44].mxu1 }
 0x13e   : > { %v574_v15 = vpop.f32.mrb[46].mxu0  ;;  %v676_v16 = vadd.f32 %v1331_v28, %v675_v14  ;;  %v1029_v17 = vpop.f32.mrb[45].mxu1 }
 0x13f   : > { %1160 = vtanh.f32 %v572_v12  ;;  %v575_v18 = vadd.f32 %v1331_v28, %v574_v15  ;;  %v978_v19 = vpop.f32.mrb[47].mxu0  ;;  %v678_v20 = vpop.f32.mrb[46].mxu1 }
 0x140   : > { %1162 = vtanh.f32 %v676_v16  ;;  %v679_v21 = vadd.f32 %v1331_v28, %v678_v20  ;;  %v1030_v22 = vpop.f32.mrb[47].mxu1 }
 0x141   : > { %v1153_v23 = vpop.eup %1152  ;;  %1164 = vtanh.f32 %v575_v18 }
 0x142   : > { %v1155_v24 = vpop.eup %1154  ;;  %752 = vst [vmem:[%s1343_s28 + $0xa0] sm:$0xff] %v1153_v23  ;;  %1166 = vtanh.f32 %v679_v21 }
 0x143   : > { %v1157_v25 = vpop.eup %1156  ;;  %778 = vst [vmem:[%s1343_s28 + $0x170] sm:$0xff] %v1155_v24 }
 0x144   : > { %v1159_v26 = vpop.eup %1158  ;;  %753 = vst [vmem:[%s1343_s28 + $0xa8] sm:$0xff] %v1157_v25  ;;  %v579_v27 = vpop.f32.mrb[48].mxu0 }
 0x145   : > { %779 = vst [vmem:[%s1343_s28 + $0x178] sm:$0xff] %v1159_v26  ;;  %v580_v29 = vadd.f32 %v1331_v28, %v579_v27  ;;  %v981_v30 = vpop.f32.mrb[49].mxu0 }
 0x146   : > { %v582_v31 = vpop.f32.mrb[50].mxu0 }
 0x147   : > { %1168 = vtanh.f32 %v580_v29  ;;  %v583_v32 = vadd.f32 %v1331_v28, %v582_v31  ;;  %v982_v33 = vpop.f32.mrb[51].mxu0 }
 0x149   : > { %v1161_v34 = vpop.eup %1160  ;;  %1170 = vtanh.f32 %v583_v32 }
 0x14a   : > { %v1163_v35 = vpop.eup %1162  ;;  %754 = vst [vmem:[%s1343_s28 + $0xb0] sm:$0xff] %v1161_v34 }
 0x14b   : > { %v1165_v36 = vpop.eup %1164  ;;  %780 = vst [vmem:[%s1343_s28 + $0x180] sm:$0xff] %v1163_v35 }
 0x14c   : > { %v1167_v37 = vpop.eup %1166  ;;  %755 = vst [vmem:[%s1343_s28 + $0xb8] sm:$0xff] %v1165_v36 }
 0x14d   : > { %781 = vst [vmem:[%s1343_s28 + $0x188] sm:$0xff] %v1167_v37 }
 0x151   : > { %v1169_v38 = vpop.eup %1168 }
 0x152   : > { %756 = vst [vmem:[%s1343_s28 + $0xc0] sm:$0xff] %v1169_v38 }
 0x153   : > { %v1171_v39 = vpop.eup %1170 }
 0x154   : > { %757 = vst [vmem:[%s1343_s28 + $0xc8] sm:$0xff] %v1171_v39 }
 0x155 PF: > { %s13_s12 = sadd.s32 1, %s1178_s12  }
 0x156   : > { %p10_p4 = scmp.ge.s32.totalorder %s13_s12, 6  }
 0x158   :  { %12 = sbr.rel (!%p10_p4) target bundleno = 1 (0x1), region = 62 }

</bundles_post_ra>
